<compile_context>
chip_gen: v5e
topology: v5e:2x2
jax: 0.10.0
libtpu: 0.0.40
codegen_flags: <defaults>
</compile_context>

<pallas_src>
import math

import jax
import jax.numpy as jnp
from jax import lax
from jax.experimental import pallas as pl
from jax.experimental.pallas import tpu as pltpu

EMBED_DIM = 768
HIDDEN_DIM = 500
NUM_CLASSES = 28

# Lane-aligned padded dims used inside the kernel.
HIDDEN_PAD = 512   # 500 -> 512 (multiple of 128)
OUT_PAD = 128      # 28  -> 128 (multiple of 128)

SUBLANE = 16       # bf16 packed sublane tile; batch tile is a multiple of this.


def _round_up(n, m):
    return ((n + m - 1) // m) * m


def _cdiv(a, b):
    return -(-a // b)


def _gelu_exact(x):
    # PyTorch nn.GELU() default: 0.5 * x * (1 + erf(x / sqrt(2)))
    return 0.5 * x * (1.0 + lax.erf(x * (1.0 / math.sqrt(2.0))))


def _mlp_kernel(x_ref, w1_ref, b1_ref, w2_ref, b2_ref, w3_ref, b3_ref, o_ref):
    # x_ref: (TB, EMBED_DIM) f32 -> cast to bf16 in-kernel (no external cast pass).
    # Weights bf16; biases f32 (1, out).  MXU matmuls accumulate in f32; the
    # bias-added activations are packed back to bf16 for GELU + the next matmul.
    x = x_ref[...].astype(jnp.bfloat16)

    h = jnp.dot(x, w1_ref[...], preferred_element_type=jnp.float32)
    h = _gelu_exact((h + b1_ref[...]).astype(jnp.bfloat16))

    h = jnp.dot(h, w2_ref[...], preferred_element_type=jnp.float32)
    h = _gelu_exact((h + b2_ref[...]).astype(jnp.bfloat16))

    h = jnp.dot(h, w3_ref[...], preferred_element_type=jnp.float32)
    o_ref[...] = (h + b3_ref[...]).astype(o_ref.dtype)


def prepare_params(params):
    """Pad to lane-aligned dims and cast weights to bf16 (biases stay f32)."""
    w1, b1, w2, b2, w3, b3 = params
    hp = HIDDEN_PAD - HIDDEN_DIM
    op = OUT_PAD - NUM_CLASSES
    w1p = jnp.pad(w1, ((0, 0), (0, hp))).astype(jnp.bfloat16)
    b1p = jnp.pad(b1, ((0, 0), (0, hp))).astype(jnp.float32)
    w2p = jnp.pad(w2, ((0, hp), (0, hp))).astype(jnp.bfloat16)
    b2p = jnp.pad(b2, ((0, 0), (0, hp))).astype(jnp.float32)
    w3p = jnp.pad(w3, ((0, hp), (0, op))).astype(jnp.bfloat16)
    b3p = jnp.pad(b3, ((0, 0), (0, op))).astype(jnp.float32)
    return (w1p, b1p, w2p, b2p, w3p, b3p)


def classifier_forward(x, params, *, block_b=2048):
    """x: (B, EMBED_DIM) float32. Returns (B, NUM_CLASSES) float32."""
    B = x.shape[0]
    x = x.astype(jnp.float32)

    # Batch tiling: tile size is a multiple of 16 (bf16 packed sublane), capped at
    # block_b.  Force >= 2 grid steps whenever the batch allows so the "parallel"
    # batch axis shards across both TensorCores on v7x.
    cap = _round_up(block_b, SUBLANE)
    b_ceil = _round_up(B, SUBLANE)
    g = max(1, _cdiv(b_ceil, cap))
    if g == 1 and b_ceil >= 2 * SUBLANE:
        g = 2
    tb = _round_up(_cdiv(B, g), SUBLANE)
    b_pad = tb * g
    if b_pad != B:
        x = jnp.pad(x, ((0, b_pad - B), (0, 0)))

    w1, b1, w2, b2, w3, b3 = prepare_params(params)

    resident = lambda shape: pl.BlockSpec(shape, lambda i: (0, 0))

    flops = 2 * b_pad * (EMBED_DIM * HIDDEN_PAD
                         + HIDDEN_PAD * HIDDEN_PAD
                         + HIDDEN_PAD * OUT_PAD)
    bytes_accessed = (
        b_pad * EMBED_DIM * 4                         # f32 activations in
        + (w1.size + w2.size + w3.size) * 2           # bf16 weights
        + (b1.size + b2.size + b3.size) * 4           # f32 biases
        + b_pad * OUT_PAD * 2                         # bf16 output
    )

    out_padded = pl.pallas_call(
        _mlp_kernel,
        out_shape=jax.ShapeDtypeStruct((b_pad, OUT_PAD), jnp.bfloat16),
        grid_spec=pltpu.PrefetchScalarGridSpec(
            num_scalar_prefetch=0,
            grid=(g,),
            in_specs=[
                pl.BlockSpec((tb, EMBED_DIM), lambda i: (i, 0)),  # x: batch-tiled
                resident(w1.shape),
                resident(b1.shape),
                resident(w2.shape),
                resident(b2.shape),
                resident(w3.shape),
                resident(b3.shape),
            ],
            out_specs=pl.BlockSpec((tb, OUT_PAD), lambda i: (i, 0)),
        ),
        compiler_params=pltpu.CompilerParams(
            dimension_semantics=("parallel",),
            vmem_limit_bytes=64 * 1024 * 1024,
        ),
        cost_estimate=pl.CostEstimate(
            flops=flops,
            transcendentals=2 * b_pad * HIDDEN_PAD,
            bytes_accessed=bytes_accessed,
        ),
    )(x, w1, b1, w2, b2, w3, b3)

    return out_padded[:B, :NUM_CLASSES].astype(jnp.float32)


def init_params(key):
    """Deterministic init matching the module's parameter shapes.

    Weights stored as (in_features, out_features); biases as (1, out_features).
    Kaiming-uniform-like bounds similar to torch.nn.Linear defaults.
    """
    def linear_init(key, fan_in, fan_out):
        kw, kb = jax.random.split(key)
        bound = 1.0 / math.sqrt(fan_in)
        w = jax.random.uniform(kw, (fan_in, fan_out), jnp.float32,
                               minval=-bound, maxval=bound)
        b = jax.random.uniform(kb, (1, fan_out), jnp.float32,
                               minval=-bound, maxval=bound)
        return w, b

    k1, k2, k3 = jax.random.split(key, 3)
    w1, b1 = linear_init(k1, EMBED_DIM, HIDDEN_DIM)
    w2, b2 = linear_init(k2, HIDDEN_DIM, HIDDEN_DIM)
    w3, b3 = linear_init(k3, HIDDEN_DIM, NUM_CLASSES)
    return (w1, b1, w2, b2, w3, b3)


def _reference_f32(x, params):
    """Pure f32 reference (loose check — kernel uses bf16 matmul/GELU feeds)."""
    w1, b1, w2, b2, w3, b3 = params
    h = _gelu_exact(x @ w1 + b1)
    h = _gelu_exact(h @ w2 + b2)
    return h @ w3 + b3


def _reference_bf16(x, params):
    """Mirrors the kernel's numerics: bf16 matmul feeds, f32 accumulate,
    bias add in f32 then bf16 GELU, bf16 output store."""
    w1, b1, w2, b2, w3, b3 = params
    bf = jnp.bfloat16
    h = jnp.dot(x.astype(bf), w1.astype(bf), preferred_element_type=jnp.float32)
    h = _gelu_exact((h + b1).astype(bf))
    h = jnp.dot(h, w2.astype(bf), preferred_element_type=jnp.float32)
    h = _gelu_exact((h + b2).astype(bf))
    h = jnp.dot(h, w3.astype(bf), preferred_element_type=jnp.float32)
    return (h + b3).astype(bf).astype(jnp.float32)


if __name__ == "__main__":
    key = jax.random.PRNGKey(0)
    k_params, k_x, k_x2 = jax.random.split(key, 3)

    params = init_params(k_params)

    # Small batch check.
    B = 8
    x = jax.random.normal(k_x, (B, EMBED_DIM), jnp.float32)
    out = jax.block_until_ready(classifier_forward(x, params))
    assert out.shape == (B, NUM_CLASSES)
    assert out.dtype == jnp.float32

    ref_bf16 = _reference_bf16(x, params)
    ref_f32 = _reference_f32(x, params)
    assert jnp.allclose(out, ref_bf16, atol=5e-3, rtol=5e-3), \
        "Pallas output mismatch vs bf16-matmul reference"
    assert jnp.allclose(out, ref_f32, atol=1e-1, rtol=1e-1), \
        "Pallas output mismatch vs f32 reference"

    # Multi-tile / ragged-batch path (grid > 1, batch padding + output slicing).
    B2 = 200
    x2 = jax.random.normal(k_x2, (B2, EMBED_DIM), jnp.float32)
    out2 = jax.block_until_ready(classifier_forward(x2, params, block_b=64))
    assert out2.shape == (B2, NUM_CLASSES)
    assert jnp.allclose(out2, _reference_bf16(x2, params), atol=5e-3, rtol=5e-3), \
        "Pallas multi-tile output mismatch vs bf16-matmul reference"

    # Default (large-tile) config on the same ragged batch: grid forced to 2 steps.
    out3 = jax.block_until_ready(classifier_forward(x2, params))
    assert out3.shape == (B2, NUM_CLASSES)
    assert jnp.allclose(out3, _reference_bf16(x2, params), atol=5e-3, rtol=5e-3), \
        "Pallas large-tile output mismatch vs bf16-matmul reference"

    print("KERNEL_OK")
</pallas_src>

<mosaic_0001>
module attributes {stable_mosaic.version = 11 : i64} {
  func.func @_mlp_kernel(%arg0: i32, %arg1: memref<16x768xf32, #tpu.memory_space<vmem>>, %arg2: memref<768x512xbf16, #tpu.memory_space<vmem>>, %arg3: memref<1x512xf32, #tpu.memory_space<vmem>>, %arg4: memref<512x512xbf16, #tpu.memory_space<vmem>>, %arg5: memref<1x512xf32, #tpu.memory_space<vmem>>, %arg6: memref<512x128xbf16, #tpu.memory_space<vmem>>, %arg7: memref<1x128xf32, #tpu.memory_space<vmem>>, %arg8: memref<16x128xbf16, #tpu.memory_space<vmem>>) attributes {dimension_semantics = [#tpu.dimension_semantics<parallel>], iteration_bounds = array<i64: 1>, scalar_prefetch = 0 : i64, scratch_operands = 0 : i64, tpu.core_type = #tpu.core_type<tc>, window_params = [{transform_indices = @transform_0, window_bounds = array<i64: 16, 768>}, {pipeline_mode = #tpu.pipeline_mode<synchronous>, transform_indices = @transform_1, window_bounds = array<i64: 768, 512>}, {pipeline_mode = #tpu.pipeline_mode<synchronous>, transform_indices = @transform_2, window_bounds = array<i64: 1, 512>}, {pipeline_mode = #tpu.pipeline_mode<synchronous>, transform_indices = @transform_3, window_bounds = array<i64: 512, 512>}, {pipeline_mode = #tpu.pipeline_mode<synchronous>, transform_indices = @transform_4, window_bounds = array<i64: 1, 512>}, {pipeline_mode = #tpu.pipeline_mode<synchronous>, transform_indices = @transform_5, window_bounds = array<i64: 512, 128>}, {pipeline_mode = #tpu.pipeline_mode<synchronous>, transform_indices = @transform_6, window_bounds = array<i64: 1, 128>}, {transform_indices = @transform_7, window_bounds = array<i64: 16, 128>}]} {
    %c0 = arith.constant 0 : index
    %c0_0 = arith.constant 0 : index
    %0 = vector.load %arg1[%c0, %c0_0] : memref<16x768xf32, #tpu.memory_space<vmem>>, vector<16x768xf32>
    %1 = arith.truncf %0 : vector<16x768xf32> to vector<16x768xbf16>
    %c0_1 = arith.constant 0 : index
    %c0_2 = arith.constant 0 : index
    %2 = vector.load %arg2[%c0_1, %c0_2] : memref<768x512xbf16, #tpu.memory_space<vmem>>, vector<768x512xbf16>
    %cst = arith.constant dense<0.000000e+00> : vector<16x512xf32>
    %3 = tpu.matmul %1, %2, %cst {dimension_numbers = #tpu.dot_dimension_numbers<[1], [0], [0], [1], [0, 0, 1, 1], [], []>} : vector<16x768xbf16>, vector<768x512xbf16>, vector<16x512xf32> -> vector<16x512xf32>
    %c0_3 = arith.constant 0 : index
    %c0_4 = arith.constant 0 : index
    %4 = vector.load %arg3[%c0_3, %c0_4] : memref<1x512xf32, #tpu.memory_space<vmem>>, vector<1x512xf32>
    %5 = vector.broadcast %4 : vector<1x512xf32> to vector<16x512xf32>
    %6 = arith.addf %3, %5 : vector<16x512xf32>
    %7 = arith.truncf %6 : vector<16x512xf32> to vector<16x512xbf16>
    %cst_5 = arith.constant 5.000000e-01 : bf16
    %8 = vector.broadcast %cst_5 : bf16 to vector<16x512xbf16>
    %9 = arith.mulf %8, %7 : vector<16x512xbf16>
    %cst_6 = arith.constant 7.070310e-01 : bf16
    %10 = vector.broadcast %cst_6 : bf16 to vector<16x512xbf16>
    %11 = arith.mulf %7, %10 : vector<16x512xbf16>
    %12 = math.erf %11 : vector<16x512xbf16>
    %cst_7 = arith.constant 1.000000e+00 : bf16
    %13 = vector.broadcast %cst_7 : bf16 to vector<16x512xbf16>
    %14 = arith.addf %13, %12 : vector<16x512xbf16>
    %15 = arith.mulf %9, %14 : vector<16x512xbf16>
    %c0_8 = arith.constant 0 : index
    %c0_9 = arith.constant 0 : index
    %16 = vector.load %arg4[%c0_8, %c0_9] : memref<512x512xbf16, #tpu.memory_space<vmem>>, vector<512x512xbf16>
    %cst_10 = arith.constant dense<0.000000e+00> : vector<16x512xf32>
    %17 = tpu.matmul %15, %16, %cst_10 {dimension_numbers = #tpu.dot_dimension_numbers<[1], [0], [0], [1], [0, 0, 1, 1], [], []>} : vector<16x512xbf16>, vector<512x512xbf16>, vector<16x512xf32> -> vector<16x512xf32>
    %c0_11 = arith.constant 0 : index
    %c0_12 = arith.constant 0 : index
    %18 = vector.load %arg5[%c0_11, %c0_12] : memref<1x512xf32, #tpu.memory_space<vmem>>, vector<1x512xf32>
    %19 = vector.broadcast %18 : vector<1x512xf32> to vector<16x512xf32>
    %20 = arith.addf %17, %19 : vector<16x512xf32>
    %21 = arith.truncf %20 : vector<16x512xf32> to vector<16x512xbf16>
    %cst_13 = arith.constant 5.000000e-01 : bf16
    %22 = vector.broadcast %cst_13 : bf16 to vector<16x512xbf16>
    %23 = arith.mulf %22, %21 : vector<16x512xbf16>
    %cst_14 = arith.constant 7.070310e-01 : bf16
    %24 = vector.broadcast %cst_14 : bf16 to vector<16x512xbf16>
    %25 = arith.mulf %21, %24 : vector<16x512xbf16>
    %26 = math.erf %25 : vector<16x512xbf16>
    %cst_15 = arith.constant 1.000000e+00 : bf16
    %27 = vector.broadcast %cst_15 : bf16 to vector<16x512xbf16>
    %28 = arith.addf %27, %26 : vector<16x512xbf16>
    %29 = arith.mulf %23, %28 : vector<16x512xbf16>
    %c0_16 = arith.constant 0 : index
    %c0_17 = arith.constant 0 : index
    %30 = vector.load %arg6[%c0_16, %c0_17] : memref<512x128xbf16, #tpu.memory_space<vmem>>, vector<512x128xbf16>
    %cst_18 = arith.constant dense<0.000000e+00> : vector<16x128xf32>
    %31 = tpu.matmul %29, %30, %cst_18 {dimension_numbers = #tpu.dot_dimension_numbers<[1], [0], [0], [1], [0, 0, 1, 1], [], []>} : vector<16x512xbf16>, vector<512x128xbf16>, vector<16x128xf32> -> vector<16x128xf32>
    %c0_19 = arith.constant 0 : index
    %c0_20 = arith.constant 0 : index
    %32 = vector.load %arg7[%c0_19, %c0_20] : memref<1x128xf32, #tpu.memory_space<vmem>>, vector<1x128xf32>
    %33 = vector.broadcast %32 : vector<1x128xf32> to vector<16x128xf32>
    %34 = arith.addf %31, %33 : vector<16x128xf32>
    %35 = arith.truncf %34 : vector<16x128xf32> to vector<16x128xbf16>
    %c0_21 = arith.constant 0 : index
    %c0_22 = arith.constant 0 : index
    %36 = vector.load %arg8[%c0_21, %c0_22] : memref<16x128xbf16, #tpu.memory_space<vmem>>, vector<16x128xbf16>
    tpu.vector_store %arg8[%c0_21, %c0_22], %35 {strides = array<i32>} : memref<16x128xbf16, #tpu.memory_space<vmem>>, vector<16x128xbf16>,
    return
  }
  func.func @transform_0(%arg0: i32) -> (i32, i32) {
    %c0_i32 = arith.constant 0 : i32
    %c0_i32_0 = arith.constant 0 : i32
    return %arg0, %c0_i32 : i32, i32
  }
  func.func @transform_1(%arg0: i32) -> (i32, i32) {
    %c0_i32 = arith.constant 0 : i32
    %c0_i32_0 = arith.constant 0 : i32
    %c0_i32_1 = arith.constant 0 : i32
    return %c0_i32, %c0_i32_0 : i32, i32
  }
  func.func @transform_2(%arg0: i32) -> (i32, i32) {
    %c0_i32 = arith.constant 0 : i32
    %c0_i32_0 = arith.constant 0 : i32
    %c0_i32_1 = arith.constant 0 : i32
    return %c0_i32, %c0_i32_0 : i32, i32
  }
  func.func @transform_3(%arg0: i32) -> (i32, i32) {
    %c0_i32 = arith.constant 0 : i32
    %c0_i32_0 = arith.constant 0 : i32
    %c0_i32_1 = arith.constant 0 : i32
    return %c0_i32, %c0_i32_0 : i32, i32
  }
  func.func @transform_4(%arg0: i32) -> (i32, i32) {
    %c0_i32 = arith.constant 0 : i32
    %c0_i32_0 = arith.constant 0 : i32
    %c0_i32_1 = arith.constant 0 : i32
    return %c0_i32, %c0_i32_0 : i32, i32
  }
  func.func @transform_5(%arg0: i32) -> (i32, i32) {
    %c0_i32 = arith.constant 0 : i32
    %c0_i32_0 = arith.constant 0 : i32
    %c0_i32_1 = arith.constant 0 : i32
    return %c0_i32, %c0_i32_0 : i32, i32
  }
  func.func @transform_6(%arg0: i32) -> (i32, i32) {
    %c0_i32 = arith.constant 0 : i32
    %c0_i32_0 = arith.constant 0 : i32
    %c0_i32_1 = arith.constant 0 : i32
    return %c0_i32, %c0_i32_0 : i32, i32
  }
  func.func @transform_7(%arg0: i32) -> (i32, i32) {
    %c0_i32 = arith.constant 0 : i32
    %c0_i32_0 = arith.constant 0 : i32
    return %arg0, %c0_i32 : i32, i32
  }
}

</mosaic_0001>

<bundles_post_ra>
// kernel: tpu_custom_call.1
= control target key start
LH: loop header
LB: loop body
LE: loop exit
PB: predicated region body
PF: predicated region fallthrough
CT: control target
= control target key end

     0   :  { %12 = vsyncpa [#allocation3], 0  ;;  %s6785_s0 = inlined_call_operand.hbm [shape: f32[16,768], index: 0, kind: input, shape index: {}]   ;;  %s6786_s1 = inlined_call_operand.hbm [shape: bf16[768,512], index: 1, kind: input, shape index: {}]   ;;  %s6787_s2 = inlined_call_operand.hbm [shape: f32[1,512], index: 2, kind: input, shape index: {}]   ;;  %s6788_s3 = inlined_call_operand.hbm [shape: bf16[512,512], index: 3, kind: input, shape index: {}]   ;;  %s6789_s4 = inlined_call_operand.hbm [shape: f32[1,512], index: 4, kind: input, shape index: {}]   ;;  %s6790_s5 = inlined_call_operand.hbm [shape: bf16[512,128], index: 5, kind: input, shape index: {}]   ;;  %s6791_s6 = inlined_call_operand.vmem [shape: f32[1,128], index: 6, kind: input, shape index: {}]   ;;  %s6792_s7 = inlined_call_operand.hbm [shape: bf16[16,128], index: 7, kind: output, shape index: {}]  }
   0x1   :  { %13 = vsyncpa [#allocation6], 0 }
   0x2   :  { %14 = vsyncpa [#allocation9], 0 }
   0x3   :  { %15 = vsyncpa [#allocation12], 0  ;;  %s34_s26 = sshll.u32 %s6786_s1, 4  ;;  %s35_s26 = int_to_ptr.hbm [resolvable:$true] %s34_s26 }
   0x4   :  { %16 = vsyncpa [#allocation4], 0  ;;  %s5814_s27 = smov [#allocation5]   ;;  %s58_s8 = sshll.u32 %s6788_s3, 4  ;;  %s59_s8 = int_to_ptr.hbm [resolvable:$true] %s58_s8 }
   0x5   :  { %s36_s28 = sshll.u32 %s5814_s27, 4  ;;  %s5815_s9 = smov 256   ;;  %s37_s28 = int_to_ptr.vmem [resolvable:$true] %s36_s28 }
   0x6   :  { %s5816_s10 = smov 16   ;;  %s5817_s11 = smov [#allocation8]  }
   0x7   :  { %42 = dma.hbm_to_vmem [thread:$0]  %s35_s26, 24576, %s37_s28, [#allocation6], %s5815_s9, %s5815_s9, %s5816_s10  }
   0x8   :  { %s60_s12 = sshll.u32 %s5817_s11, 4  ;;  %s21_s15 = sshll.u32 %s6785_s0, 4  ;;  %s61_s12 = int_to_ptr.vmem [resolvable:$true] %s60_s12  ;;  %s22_s15 = int_to_ptr.hbm [resolvable:$true] %s21_s15 }
   0x9   :  { %66 = dma.hbm_to_vmem [thread:$0]  %s59_s8, 16384, %s61_s12, [#allocation9], %s5815_s9, %s5815_s9, %s5816_s10  }
   0xa   :  { %s5818_s1 = smov [#allocation2]   ;;  %s48_s3 = sshll.u32 %s6787_s2, 4  ;;  %s49_s3 = int_to_ptr.hbm [resolvable:$true] %s48_s3 }
   0xb   :  { %s23_s16 = sshll.u32 %s5818_s1, 4  ;;  %s5819_s19 = smov 768   ;;  %s24_s16 = int_to_ptr.vmem [resolvable:$true] %s23_s16 }
   0xc   :  { %s5820_s20 = smov 48   ;;  %s5821_s21 = smov [#allocation7]  }
   0xd   :  { %29 = dma.hbm_to_vmem [thread:$0]  %s22_s15, 1536, %s24_s16, [#allocation3], %s5819_s19, %s5819_s19, %s5820_s20  }
   0xe   :  { %s50_s22 = sshll.u32 %s5821_s21, 4  ;;  %s72_s0 = sshll.u32 %s6789_s4, 4  ;;  %s51_s22 = int_to_ptr.vmem [resolvable:$true] %s50_s22  ;;  %s73_s0 = int_to_ptr.hbm [resolvable:$true] %s72_s0 }
   0xf   :  { %53 = dma.hbm_to_vmem [thread:$0]  %s49_s3, 64, %s51_s22, [#allocation6]  }
  0x10   :  { %s82_s27 = sshll.u32 %s6790_s5, 4  ;;  %s5822_s28 = smov [#allocation10]   ;;  %s83_s27 = int_to_ptr.hbm [resolvable:$true] %s82_s27 }
  0x11   :  { %s74_s29 = sshll.u32 %s5822_s28, 4  ;;  %s5823_s2 = smov [#allocation11]   ;;  %s75_s29 = int_to_ptr.vmem [resolvable:$true] %s74_s29 }
  0x12   :  { %77 = dma.hbm_to_vmem [thread:$0]  %s73_s0, 64, %s75_s29, [#allocation9]  }
  0x13   :  { %s84_s30 = sshll.u32 %s5823_s2, 4  ;;  %s5824_s8 = smov 64   ;;  %s85_s30 = int_to_ptr.vmem [resolvable:$true] %s84_s30 }
  0x14   :  { %s5825_s9 = smov 4  }
  0x15   :  { %90 = dma.hbm_to_vmem [thread:$0]  %s83_s27, 4096, %s85_s30, [#allocation12], %s5824_s8, %s5824_s8, %s5825_s9  }
  0x16   :  { %5804 = dma.done.wait [#allocation3], 1536  }
  0x17   :  { %5805 = vsyncadd [#allocation3], 4294965760 }
  0x18   :  { %5806 = dma.done.wait [#allocation6], 24640  }
  0x19   :  { %5807 = vsyncadd [#allocation6], 4294942656 }
  0x1a   :  { %5808 = dma.done.wait [#allocation9], 16448  }
  0x1b   :  { %5809 = vsyncadd [#allocation9], 4294950848 }
  0x1c   :  { %5810 = dma.done.wait [#allocation12], 4096  }
  0x1d   :  { %5811 = vsyncadd [#allocation12], 4294963200  ;;  %v3923_v0 = vld [vmem:[#allocation5 + $0xe0] sm:$0xf]  ;;  %v5263_v1 = vld [vmem:[#allocation5 + $0xec] sm:$0xf0] }
  0x1e   :  { %v4051_v2 = vld [vmem:[#allocation5 + $0x1e0] sm:$0xf]  ;;  %v3924_v3 = vor.u32 %v5263_v1, %v3923_v0  ;;  %v5295_v4 = vld [vmem:[#allocation5 + $0x1ec] sm:$0xf0]  ;;  %s5826_s10 = smov [#allocation13]   ;;  %s3793_s14 = sshll.u32 %s6792_s7, 4  ;;  %s3794_s14 = int_to_ptr.hbm [resolvable:$true] %s3793_s14 }
  0x1f   :  { %v4179_v5 = vld [vmem:[#allocation5 + $0x2e0] sm:$0xf]  ;;  %v5327_v6 = vld [vmem:[#allocation5 + $0x2ec] sm:$0xf0]  ;;  %v4052_v7 = vor.u32 %v5295_v4, %v4051_v2  ;;  %s3791_s11 = sshll.u32 %s5826_s10, 4  ;;  %s3792_s11 = int_to_ptr.vmem [resolvable:$true] %s3791_s11 }
  0x20   :  { %v4180_v8 = vor.u32 %v5327_v6, %v4179_v5  ;;  %v4307_v9 = vld [vmem:[#allocation5 + $0x3e0] sm:$0xf]  ;;  %v5359_v10 = vld [vmem:[#allocation5 + $0x3ec] sm:$0xf0]  ;;  %1297 = vmatpush.bf16.msra.mxu0 %v3924_v3 }
  0x21   :  { %v3907_v11 = vld [vmem:[#allocation5 + $0xc0] sm:$0xf]  ;;  %v4308_v12 = vor.u32 %v5359_v10, %v4307_v9  ;;  %v5259_v13 = vld [vmem:[#allocation5 + $0xcc] sm:$0xf0]  ;;  %1311 = vmatpush.bf16.msra.mxu1 %v4052_v7 }
  0x22   :  { %v4035_v14 = vld [vmem:[#allocation5 + $0x1c0] sm:$0xf]  ;;  %v5291_v15 = vld [vmem:[#allocation5 + $0x1cc] sm:$0xf0]  ;;  %1325 = vmatpush.bf16.msra.mxu2 %v4180_v8  ;;  %v3908_v16 = vor.u32 %v5259_v13, %v3907_v11 }
  0x23   :  { %v4036_v17 = vor.u32 %v5291_v15, %v4035_v14  ;;  %v4163_v18 = vld [vmem:[#allocation5 + $0x2c0] sm:$0xf]  ;;  %v5323_v19 = vld [vmem:[#allocation5 + $0x2cc] sm:$0xf0]  ;;  %1339 = vmatpush.bf16.msra.mxu3 %v4308_v12 }
  0x24   :  { %v4291_v20 = vld [vmem:[#allocation5 + $0x3c0] sm:$0xf]  ;;  %v4164_v21 = vor.u32 %v5323_v19, %v4163_v18  ;;  %v5355_v22 = vld [vmem:[#allocation5 + $0x3cc] sm:$0xf0]  ;;  %1298 = vmatpush.bf16.msra.mxu0 %v3908_v16 }
  0x25   :  { %v3891_v23 = vld [vmem:[#allocation5 + $0xa0] sm:$0xf]  ;;  %v5255_v24 = vld [vmem:[#allocation5 + $0xac] sm:$0xf0]  ;;  %v4292_v25 = vor.u32 %v5355_v22, %v4291_v20  ;;  %1312 = vmatpush.bf16.msra.mxu1 %v4036_v17 }
  0x26   :  { %v4019_v26 = vld [vmem:[#allocation5 + $0x1a0] sm:$0xf]  ;;  %v5287_v27 = vld [vmem:[#allocation5 + $0x1ac] sm:$0xf0]  ;;  %v3892_v29 = vor.u32 %v5255_v24, %v3891_v23  ;;  %1326 = vmatpush.bf16.msra.mxu2 %v4164_v21 }
  0x27   :  { %v4147_v28 = vld [vmem:[#allocation5 + $0x2a0] sm:$0xf]  ;;  %v5319_v30 = vld [vmem:[#allocation5 + $0x2ac] sm:$0xf0]  ;;  %v4020_v33 = vor.u32 %v5287_v27, %v4019_v26  ;;  %1340 = vmatpush.bf16.msra.mxu3 %v4292_v25 }
  0x28   :  { %v4275_v31 = vld [vmem:[#allocation5 + $0x3a0] sm:$0xf]  ;;  %v5351_v32 = vld [vmem:[#allocation5 + $0x3ac] sm:$0xf0]  ;;  %v4148_v34 = vor.u32 %v5319_v30, %v4147_v28  ;;  %1299 = vmatpush.bf16.msra.mxu0 %v3892_v29 }
  0x29   :  { %v3875_v35 = vld [vmem:[#allocation5 + $0x80] sm:$0xf]  ;;  %v5251_v36 = vld [vmem:[#allocation5 + $0x8c] sm:$0xf0]  ;;  %v4276_v38 = vor.u32 %v5351_v32, %v4275_v31  ;;  %1313 = vmatpush.bf16.msra.mxu1 %v4020_v33  ;;  %v5261_v33 = vld [vmem:[#allocation5 + $0xe4] sm:$0xf] }
  0x2a   :  { %v4003_v37 = vld [vmem:[#allocation5 + $0x180] sm:$0xf]  ;;  %v5283_v39 = vld [vmem:[#allocation5 + $0x18c] sm:$0xf0]  ;;  %v3876_v44 = vor.u32 %v5251_v36, %v3875_v35  ;;  %1327 = vmatpush.bf16.msra.mxu2 %v4148_v34  ;;  %v3925_v34 = vld [vmem:[#allocation5 + $0xf0] sm:$0xf0] }
  0x2b   :  { %v4131_v40 = vld [vmem:[#allocation5 + $0x280] sm:$0xf]  ;;  %v5315_v41 = vld [vmem:[#allocation5 + $0x28c] sm:$0xf0]  ;;  %v4004_v45 = vor.u32 %v5283_v39, %v4003_v37  ;;  %1341 = vmatpush.bf16.msra.mxu3 %v4276_v38  ;;  %v5293_v37 = vld [vmem:[#allocation5 + $0x1e4] sm:$0xf] }
  0x2c   :  { %v4259_v42 = vld [vmem:[#allocation5 + $0x380] sm:$0xf]  ;;  %v5347_v43 = vld [vmem:[#allocation5 + $0x38c] sm:$0xf0]  ;;  %v4132_v46 = vor.u32 %v5315_v41, %v4131_v40  ;;  %1300 = vmatpush.bf16.msra.mxu0 %v3876_v44  ;;  %v4053_v38 = vld [vmem:[#allocation5 + $0x1f0] sm:$0xf0] }
  0x2d   :  { %v3859_v47 = vld [vmem:[#allocation5 + $0x60] sm:$0xf]  ;;  %v5247_v48 = vld [vmem:[#allocation5 + $0x6c] sm:$0xf0]  ;;  %v4260_v50 = vor.u32 %v5347_v43, %v4259_v42  ;;  %1314 = vmatpush.bf16.msra.mxu1 %v4004_v45  ;;  %v3928_v43 = vor.u32 %v5261_v33, %v3925_v34  ;;  %v3861_v33 = vld [vmem:[#allocation5 + $0x70] sm:$0xf0] }
  0x2e   :  { %v3987_v49 = vld [vmem:[#allocation5 + $0x160] sm:$0xf]  ;;  %v5279_v51 = vld [vmem:[#allocation5 + $0x16c] sm:$0xf0]  ;;  %v3860_v56 = vor.u32 %v5247_v48, %v3859_v47  ;;  %1328 = vmatpush.bf16.msra.mxu2 %v4132_v46  ;;  %v4056_v47 = vor.u32 %v5293_v37, %v4053_v38  ;;  %v5257_v48 = vld [vmem:[#allocation5 + $0xc4] sm:$0xf] }
  0x2f   :  { %v4115_v52 = vld [vmem:[#allocation5 + $0x260] sm:$0xf]  ;;  %v5311_v53 = vld [vmem:[#allocation5 + $0x26c] sm:$0xf0]  ;;  %v3988_v57 = vor.u32 %v5279_v51, %v3987_v49  ;;  %1342 = vmatpush.bf16.msra.mxu3 %v4260_v50  ;;  %v3909_v49 = vld [vmem:[#allocation5 + $0xd0] sm:$0xf0] }
  0x30   :  { %v4243_v54 = vld [vmem:[#allocation5 + $0x360] sm:$0xf]  ;;  %v5343_v55 = vld [vmem:[#allocation5 + $0x36c] sm:$0xf0]  ;;  %v4116_v58 = vor.u32 %v5311_v53, %v4115_v52  ;;  %1301 = vmatpush.bf16.msra.mxu0 %v3860_v56  ;;  %v5289_v50 = vld [vmem:[#allocation5 + $0x1c4] sm:$0xf] }
  0x31   :  { %v3843_v59 = vld [vmem:[#allocation5 + $0x40] sm:$0xf]  ;;  %v5243_v60 = vld [vmem:[#allocation5 + $0x4c] sm:$0xf0]  ;;  %v4244_v62 = vor.u32 %v5343_v55, %v4243_v54  ;;  %1315 = vmatpush.bf16.msra.mxu1 %v3988_v57  ;;  %v4037_v51 = vld [vmem:[#allocation5 + $0x1d0] sm:$0xf0] }
  0x32   :  { %v3971_v61 = vld [vmem:[#allocation5 + $0x140] sm:$0xf]  ;;  %v5275_v63 = vld [vmem:[#allocation5 + $0x14c] sm:$0xf0]  ;;  %v3844_v4 = vor.u32 %v5243_v60, %v3843_v59  ;;  %1329 = vmatpush.bf16.msra.mxu2 %v4116_v58  ;;  %v3912_v59 = vor.u32 %v5257_v48, %v3909_v49  ;;  %v5277_v34 = vld [vmem:[#allocation5 + $0x164] sm:$0xf] }
  0x33   :  { %v4099_v0 = vld [vmem:[#allocation5 + $0x240] sm:$0xf]  ;;  %v5307_v1 = vld [vmem:[#allocation5 + $0x24c] sm:$0xf0]  ;;  %v3972_v5 = vor.u32 %v5275_v63, %v3971_v61  ;;  %1343 = vmatpush.bf16.msra.mxu3 %v4244_v62  ;;  %v5253_v62 = vld [vmem:[#allocation5 + $0xa4] sm:$0xf]  ;;  %v4040_v63 = vor.u32 %v5289_v50, %v4037_v51 }
  0x34   :  { %v4227_v2 = vld [vmem:[#allocation5 + $0x340] sm:$0xf]  ;;  %v5339_v3 = vld [vmem:[#allocation5 + $0x34c] sm:$0xf0]  ;;  %v4100_v6 = vor.u32 %v5307_v1, %v4099_v0  ;;  %1302 = vmatpush.bf16.msra.mxu0 %v3844_v4  ;;  %v3893_v0 = vld [vmem:[#allocation5 + $0xb0] sm:$0xf0] }
  0x35   :  { %v3827_v7 = vld [vmem:[#allocation5 + $0x20] sm:$0xf]  ;;  %v5239_v8 = vld [vmem:[#allocation5 + $0x2c] sm:$0xf0]  ;;  %v4228_v10 = vor.u32 %v5339_v3, %v4227_v2  ;;  %1316 = vmatpush.bf16.msra.mxu1 %v3972_v5  ;;  %v118_v1 = vld [vmem:[#allocation2 + $0x8] sm:$0xff] }
  0x36   :  { %v3955_v9 = vld [vmem:[#allocation5 + $0x120] sm:$0xf]  ;;  %v5271_v11 = vld [vmem:[#allocation5 + $0x12c] sm:$0xf0]  ;;  %v3828_v16 = vor.u32 %v5239_v8, %v3827_v7  ;;  %1330 = vmatpush.bf16.msra.mxu2 %v4100_v6  ;;  %v124_v2 = vld [vmem:[#allocation2 + $0x38] sm:$0xff] }
  0x37   :  { %v4083_v12 = vld [vmem:[#allocation5 + $0x220] sm:$0xf]  ;;  %v5303_v13 = vld [vmem:[#allocation5 + $0x22c] sm:$0xf0]  ;;  %v3956_v19 = vor.u32 %v5271_v11, %v3955_v9  ;;  %1344 = vmatpush.bf16.msra.mxu3 %v4228_v10  ;;  %v5285_v3 = vld [vmem:[#allocation5 + $0x1a4] sm:$0xf]  ;;  %v5891_v6 = vpack.c.bf16 %v124_v2, %v118_v1 }
  0x38   :  { %v4211_v14 = vld [vmem:[#allocation5 + $0x320] sm:$0xf]  ;;  %v5335_v15 = vld [vmem:[#allocation5 + $0x32c] sm:$0xf0]  ;;  %v4084_v20 = vor.u32 %v5303_v13, %v4083_v12  ;;  %1303 = vmatpush.bf16.msra.mxu0 %v3828_v16  ;;  %v4021_v4 = vld [vmem:[#allocation5 + $0x1b0] sm:$0xf0]  ;;  %v3896_v12 = vor.u32 %v5253_v62, %v3893_v0 }
  0x39   :  { %v3811_v17 = vld [vmem:[#allocation5] sm:$0xf]  ;;  %v5235_v18 = vld [vmem:[#allocation5 + $0xc] sm:$0xf0]  ;;  %v4212_v24 = vor.u32 %v5335_v15, %v4211_v14  ;;  %1317 = vmatpush.bf16.msra.mxu1 %v3956_v19  ;;  %v5249_v13 = vld [vmem:[#allocation5 + $0x84] sm:$0xf]  ;;  %v4024_v16 = vor.u32 %v5285_v3, %v4021_v4 }
  0x3a   :  { %v3939_v21 = vld [vmem:[#allocation5 + $0x100] sm:$0xf]  ;;  %v5267_v22 = vld [vmem:[#allocation5 + $0x10c] sm:$0xf0]  ;;  %v3812_v31 = vor.u32 %v5235_v18, %v3811_v17  ;;  %1331 = vmatpush.bf16.msra.mxu2 %v4084_v20  ;;  %v3877_v14 = vld [vmem:[#allocation5 + $0x90] sm:$0xf0] }
  0x3b   :  { %v4067_v23 = vld [vmem:[#allocation5 + $0x200] sm:$0xf]  ;;  %v5299_v25 = vld [vmem:[#allocation5 + $0x20c] sm:$0xf0]  ;;  %v3940_v35 = vor.u32 %v5267_v22, %v3939_v21  ;;  %1345 = vmatpush.bf16.msra.mxu3 %v4212_v24  ;;  %v120_v18 = vld [vmem:[#allocation2 + $0x18] sm:$0xff] }
  0x3c   :  { %v4195_v26 = vld [vmem:[#allocation5 + $0x300] sm:$0xf]  ;;  %v5331_v27 = vld [vmem:[#allocation5 + $0x30c] sm:$0xf0]  ;;  %v4068_v36 = vor.u32 %v5299_v25, %v4067_v23  ;;  %1304 = vmatpush.bf16.msra.mxu0 %v3812_v31  ;;  %v126_v19 = vld [vmem:[#allocation2 + $0x48] sm:$0xff] }
  0x3d   :  { %v4435_v28 = vld [vmem:[#allocation5 + $0x4e0] sm:$0xf]  ;;  %v5391_v29 = vld [vmem:[#allocation5 + $0x4ec] sm:$0xf0]  ;;  %v4196_v39 = vor.u32 %v5331_v27, %v4195_v26  ;;  %1318 = vmatpush.bf16.msra.mxu1 %v3940_v35  ;;  %v5281_v20 = vld [vmem:[#allocation5 + $0x184] sm:$0xf]  ;;  %v5896_v23 = vpack.c.bf16 %v126_v19, %v120_v18  ;;  %v3880_v26 = vor.u32 %v5249_v13, %v3877_v14 }
  0x3e   :  { %v4563_v30 = vld [vmem:[#allocation5 + $0x5e0] sm:$0xf]  ;;  %v5423_v32 = vld [vmem:[#allocation5 + $0x5ec] sm:$0xf0]  ;;  %v4436_v40 = vor.u32 %v5391_v29, %v4435_v28  ;;  %1332 = vmatpush.bf16.msra.mxu2 %v4068_v36  ;;  %v4005_v21 = vld [vmem:[#allocation5 + $0x190] sm:$0xf0] }
  0x3f   :  { %v4419_v41 = vld [vmem:[#allocation5 + $0x4c0] sm:$0xf]  ;;  %v4564_v42 = vor.u32 %v5423_v32, %v4563_v30  ;;  %v5387_v44 = vld [vmem:[#allocation5 + $0x4cc] sm:$0xf0]  ;;  %1346 = vmatpush.bf16.msra.mxu3 %v4196_v39  ;;  %v4008_v30 = vor.u32 %v5281_v20, %v4005_v21  ;;  %v5245_v32 = vld [vmem:[#allocation5 + $0x64] sm:$0xf] }
  0x40   :  { %v4547_v45 = vld [vmem:[#allocation5 + $0x5c0] sm:$0xf]  ;;  %v5419_v46 = vld [vmem:[#allocation5 + $0x5cc] sm:$0xf0]  ;;  %1353 = vmatpush.bf16.msrb.mxu0 %v4436_v40  ;;  %v4420_v54 = vor.u32 %v5387_v44, %v4419_v41  ;;  %1319 = vmatmul.bf16.vlgmr.msra.gmra.mxu1 %v5891_v6  ;;  %v3989_v35 = vld [vmem:[#allocation5 + $0x170] sm:$0xf0]  ;;  %v3864_v38 = vor.u32 %v5245_v32, %v3861_v33 }
  0x41   :  { %v117_v52 = vld [vmem:[#allocation2] sm:$0xff]  ;;  %v123_v53 = vld [vmem:[#allocation2 + $0x30] sm:$0xff]  ;;  %1367 = vmatpush.bf16.msrb.mxu1 %v4564_v42  ;;  %v4548_v58 = vor.u32 %v5419_v46, %v4547_v45  ;;  %v3992_v42 = vor.u32 %v5277_v34, %v3989_v35 }
  0x42   :  { %v4403_v55 = vld [vmem:[#allocation5 + $0x4a0] sm:$0xf]  ;;  %v5383_v56 = vld [vmem:[#allocation5 + $0x4ac] sm:$0xf0]  ;;  %v5888_v57 = vpack.c.bf16 %v123_v53, %v117_v52  ;;  %1381 = vmatpush.bf16.msrb.mxu2 %v3928_v43  ;;  %1347 = vmatmul.bf16.vlgmr.msra.gmra.mxu3 %v5896_v23  ;;  %v5241_v44 = vld [vmem:[#allocation5 + $0x44] sm:$0xf] }
  0x43   :  { %v4531_v60 = vld [vmem:[#allocation5 + $0x5a0] sm:$0xf]  ;;  %v5415_v61 = vld [vmem:[#allocation5 + $0x5ac] sm:$0xf0]  ;;  %1395 = vmatpush.bf16.msrb.mxu3 %v4056_v47  ;;  %v4404_v7 = vor.u32 %v5383_v56, %v4403_v55  ;;  %v3845_v45 = vld [vmem:[#allocation5 + $0x50] sm:$0xf0] }
  0x44   :  { %1305 = vmatmul.bf16.vlgmr.msra.gmra.mxu0 %v5888_v57  ;;  %v4387_v5 = vld [vmem:[#allocation5 + $0x480] sm:$0xf]  ;;  %v5379_v8 = vld [vmem:[#allocation5 + $0x48c] sm:$0xf0]  ;;  %v4532_v11 = vor.u32 %v5415_v61, %v4531_v60  ;;  %v5273_v46 = vld [vmem:[#allocation5 + $0x144] sm:$0xf]  ;;  %v3848_v50 = vor.u32 %v5241_v44, %v3845_v45 }
  0x45   :  { %1354 = vmatpush.bf16.msrb.mxu0 %v4420_v54  ;;  %v4515_v9 = vld [vmem:[#allocation5 + $0x580] sm:$0xf]  ;;  %v5411_v10 = vld [vmem:[#allocation5 + $0x58c] sm:$0xf0]  ;;  %1368 = vmatpush.bf16.msrb.mxu1 %v4548_v58  ;;  %v4388_v24 = vor.u32 %v5379_v8, %v4387_v5  ;;  %v3973_v47 = vld [vmem:[#allocation5 + $0x150] sm:$0xf0] }
  0x46   :  { %1382 = vmatpush.bf16.msrb.mxu2 %v3912_v59  ;;  %v119_v15 = vld [vmem:[#allocation2 + $0x10] sm:$0xff]  ;;  %v125_v17 = vld [vmem:[#allocation2 + $0x40] sm:$0xff]  ;;  %v4516_v25 = vor.u32 %v5411_v10, %v4515_v9  ;;  %v3976_v54 = vor.u32 %v5273_v46, %v3973_v47 }
  0x47   :  { %1396 = vmatpush.bf16.msrb.mxu3 %v4040_v63  ;;  %v5894_v22 = vpack.c.bf16 %v125_v17, %v119_v15  ;;  %v4371_v27 = vld [vmem:[#allocation5 + $0x460] sm:$0xf]  ;;  %v5375_v28 = vld [vmem:[#allocation5 + $0x46c] sm:$0xf0]  ;;  %v5237_v56 = vld [vmem:[#allocation5 + $0x24] sm:$0xf] }
  0x48   :  { %v4499_v29 = vld [vmem:[#allocation5 + $0x560] sm:$0xf]  ;;  %v5407_v31 = vld [vmem:[#allocation5 + $0x56c] sm:$0xf0]  ;;  %v4372_v36 = vor.u32 %v5375_v28, %v4371_v27  ;;  %v3829_v58 = vld [vmem:[#allocation5 + $0x30] sm:$0xf0] }
  0x49   :  { %1355 = vmatpush.bf16.msrb.mxu0 %v4404_v7  ;;  %1369 = vmatpush.bf16.msrb.mxu1 %v4532_v11  ;;  %v4500_v37 = vor.u32 %v5407_v31, %v4499_v29  ;;  %v4355_v39 = vld [vmem:[#allocation5 + $0x440] sm:$0xf]  ;;  %v5371_v40 = vld [vmem:[#allocation5 + $0x44c] sm:$0xf0]  ;;  %v5269_v59 = vld [vmem:[#allocation5 + $0x124] sm:$0xf]  ;;  %v3832_v2 = vor.u32 %v5237_v56, %v3829_v58 }
  0x4a   :  { %1383 = vmatpush.bf16.msrb.mxu2 %v3896_v12  ;;  %v4483_v41 = vld [vmem:[#allocation5 + $0x540] sm:$0xf]  ;;  %v5403_v43 = vld [vmem:[#allocation5 + $0x54c] sm:$0xf0]  ;;  %v4356_v48 = vor.u32 %v5371_v40, %v4355_v39  ;;  %v3957_v60 = vld [vmem:[#allocation5 + $0x130] sm:$0xf0] }
  0x4b   :  { %1397 = vmatpush.bf16.msrb.mxu3 %v4024_v16  ;;  %1333 = vmatmul.bf16.vlgmr.msra.gmra.mxu2 %v5894_v22  ;;  %v4484_v49 = vor.u32 %v5403_v43, %v4483_v41  ;;  %v4339_v51 = vld [vmem:[#allocation5 + $0x420] sm:$0xf]  ;;  %v5367_v52 = vld [vmem:[#allocation5 + $0x42c] sm:$0xf0]  ;;  %v5233_v4 = vld [vmem:[#allocation5 + $0x4] sm:$0xf]  ;;  %v3960_v7 = vor.u32 %v5269_v59, %v3957_v60 }
  0x4c   :  { %v4467_v53 = vld [vmem:[#allocation5 + $0x520] sm:$0xf]  ;;  %v5399_v55 = vld [vmem:[#allocation5 + $0x52c] sm:$0xf0]  ;;  %v4340_v61 = vor.u32 %v5367_v52, %v4339_v51  ;;  %v3813_v5 = vld [vmem:[#allocation5 + $0x10] sm:$0xf0] }
  0x4d   :  { %1356 = vmatpush.bf16.msrb.mxu0 %v4388_v24  ;;  %1370 = vmatpush.bf16.msrb.mxu1 %v4516_v25  ;;  %v4323_v62 = vld [vmem:[#allocation5 + $0x400] sm:$0xf]  ;;  %v5363_v63 = vld [vmem:[#allocation5 + $0x40c] sm:$0xf0]  ;;  %v4468_v1 = vor.u32 %v5399_v55, %v4467_v53  ;;  %v5265_v8 = vld [vmem:[#allocation5 + $0x104] sm:$0xf]  ;;  %v3816_v19 = vor.u32 %v5233_v4, %v3813_v5 }
  0x4e   :  { %1384 = vmatpush.bf16.msrb.mxu2 %v3880_v26  ;;  %v4451_v0 = vld [vmem:[#allocation5 + $0x500] sm:$0xf]  ;;  %v5395_v3 = vld [vmem:[#allocation5 + $0x50c] sm:$0xf0]  ;;  %v3941_v9 = vld [vmem:[#allocation5 + $0x110] sm:$0xf0]  ;;  %v4324_v14 = vor.u32 %v5363_v63, %v4323_v62 }
  0x4f   :  { %1398 = vmatpush.bf16.msrb.mxu3 %v4008_v30  ;;  %v5325_v10 = vld [vmem:[#allocation5 + $0x2e4] sm:$0xf]  ;;  %v4181_v11 = vld [vmem:[#allocation5 + $0x2f0] sm:$0xf0]  ;;  %v4452_v18 = vor.u32 %v5395_v3, %v4451_v0  ;;  %v3944_v25 = vor.u32 %v5265_v8, %v3941_v9  ;;  %v122_v27 = vld [vmem:[#allocation2 + $0x28] sm:$0xff] }
  0x50   :  { %v5357_v12 = vld [vmem:[#allocation5 + $0x3e4] sm:$0xf]  ;;  %v4309_v13 = vld [vmem:[#allocation5 + $0x3f0] sm:$0xf0]  ;;  %v4184_v26 = vor.u32 %v5325_v10, %v4181_v11  ;;  %v128_v28 = vld [vmem:[#allocation2 + $0x58] sm:$0xff] }
  0x51   :  { %1357 = vmatpush.bf16.msrb.mxu0 %v4372_v36  ;;  %1371 = vmatpush.bf16.msrb.mxu1 %v4500_v37  ;;  %v5389_v15 = vld [vmem:[#allocation5 + $0x4e4] sm:$0xf]  ;;  %v4437_v16 = vld [vmem:[#allocation5 + $0x4f0] sm:$0xf0]  ;;  %v4312_v29 = vor.u32 %v5357_v12, %v4309_v13  ;;  %v5902_v39 = vpack.c.bf16 %v128_v28, %v122_v27 }
  0x52   :  { %1385 = vmatpush.bf16.msrb.mxu2 %v3864_v38  ;;  %v5421_v17 = vld [vmem:[#allocation5 + $0x5e4] sm:$0xf]  ;;  %v4565_v20 = vld [vmem:[#allocation5 + $0x5f0] sm:$0xf0]  ;;  %v4440_v30 = vor.u32 %v5389_v15, %v4437_v16 }
  0x53   :  { %1399 = vmatpush.bf16.msrb.mxu3 %v3992_v42  ;;  %v121_v21 = vld [vmem:[#allocation2 + $0x20] sm:$0xff]  ;;  %v127_v24 = vld [vmem:[#allocation2 + $0x50] sm:$0xff]  ;;  %v4568_v34 = vor.u32 %v5421_v17, %v4565_v20 }
  0x54   :  { %v5321_v31 = vld [vmem:[#allocation5 + $0x2c4] sm:$0xf]  ;;  %v4165_v32 = vld [vmem:[#allocation5 + $0x2d0] sm:$0xf0]  ;;  %v5900_v35 = vpack.c.bf16 %v127_v24, %v121_v21 }
  0x55   :  { %1358 = vmatpush.bf16.msrb.mxu0 %v4356_v48  ;;  %1372 = vmatpush.bf16.msrb.mxu1 %v4484_v49  ;;  %v5353_v33 = vld [vmem:[#allocation5 + $0x3c4] sm:$0xf]  ;;  %v4293_v36 = vld [vmem:[#allocation5 + $0x3d0] sm:$0xf0]  ;;  %v4168_v42 = vor.u32 %v5321_v31, %v4165_v32 }
  0x56   :  { %1386 = vmatpush.bf16.msrb.mxu2 %v3848_v50  ;;  %v5385_v37 = vld [vmem:[#allocation5 + $0x4c4] sm:$0xf]  ;;  %v4421_v38 = vld [vmem:[#allocation5 + $0x4d0] sm:$0xf0]  ;;  %v4296_v43 = vor.u32 %v5353_v33, %v4293_v36 }
  0x57   :  { %1400 = vmatpush.bf16.msrb.mxu3 %v3976_v54  ;;  %v5417_v40 = vld [vmem:[#allocation5 + $0x5c4] sm:$0xf]  ;;  %v4549_v41 = vld [vmem:[#allocation5 + $0x5d0] sm:$0xf0]  ;;  %v4424_v44 = vor.u32 %v5385_v37, %v4421_v38 }
  0x58   :  { %v5317_v45 = vld [vmem:[#allocation5 + $0x2a4] sm:$0xf]  ;;  %v4149_v46 = vld [vmem:[#allocation5 + $0x2b0] sm:$0xf0]  ;;  %v4552_v48 = vor.u32 %v5417_v40, %v4549_v41 }
  0x59   :  { %1359 = vmatpush.bf16.msrb.mxu0 %v4340_v61  ;;  %1373 = vmatpush.bf16.msrb.mxu1 %v4468_v1  ;;  %v5349_v47 = vld [vmem:[#allocation5 + $0x3a4] sm:$0xf]  ;;  %v4277_v49 = vld [vmem:[#allocation5 + $0x3b0] sm:$0xf0]  ;;  %v4152_v54 = vor.u32 %v5317_v45, %v4149_v46 }
  0x5a   :  { %1387 = vmatpush.bf16.msrb.mxu2 %v3832_v2  ;;  %v5381_v50 = vld [vmem:[#allocation5 + $0x4a4] sm:$0xf]  ;;  %v4405_v51 = vld [vmem:[#allocation5 + $0x4b0] sm:$0xf0]  ;;  %v4280_v55 = vor.u32 %v5349_v47, %v4277_v49 }
  0x5b   :  { %1401 = vmatpush.bf16.msrb.mxu3 %v3960_v7  ;;  %v5413_v52 = vld [vmem:[#allocation5 + $0x5a4] sm:$0xf]  ;;  %v4533_v53 = vld [vmem:[#allocation5 + $0x5b0] sm:$0xf0]  ;;  %v4408_v56 = vor.u32 %v5381_v50, %v4405_v51 }
  0x5c   :  { %v5313_v58 = vld [vmem:[#allocation5 + $0x284] sm:$0xf]  ;;  %v4133_v59 = vld [vmem:[#allocation5 + $0x290] sm:$0xf0]  ;;  %v4536_v61 = vor.u32 %v5413_v52, %v4533_v53 }
  0x5d   :  { %1360 = vmatpush.bf16.msrb.mxu0 %v4324_v14  ;;  %1374 = vmatpush.bf16.msrb.mxu1 %v4452_v18  ;;  %v5345_v60 = vld [vmem:[#allocation5 + $0x384] sm:$0xf]  ;;  %v4261_v62 = vld [vmem:[#allocation5 + $0x390] sm:$0xf0]  ;;  %v4136_v3 = vor.u32 %v5313_v58, %v4133_v59  ;;  %v5264_v58 = vld [vmem:[#allocation5 + $0xf4] sm:$0xf0] }
  0x5e   :  { %1388 = vmatpush.bf16.msrb.mxu2 %v3816_v19  ;;  %v5377_v63 = vld [vmem:[#allocation5 + $0x484] sm:$0xf]  ;;  %v4389_v0 = vld [vmem:[#allocation5 + $0x490] sm:$0xf0]  ;;  %v4264_v4 = vor.u32 %v5345_v60, %v4261_v62  ;;  %v4059_v59 = vld [vmem:[#allocation5 + $0x1e8] sm:$0xf] }
  0x5f   :  { %1402 = vmatpush.bf16.msrb.mxu3 %v3944_v25  ;;  %v5409_v1 = vld [vmem:[#allocation5 + $0x584] sm:$0xf]  ;;  %v4517_v2 = vld [vmem:[#allocation5 + $0x590] sm:$0xf0]  ;;  %v4392_v5 = vor.u32 %v5377_v63, %v4389_v0  ;;  %v4187_v62 = vld [vmem:[#allocation5 + $0x2e8] sm:$0xf] }
  0x60   :  { %1361 = vmatmul.bf16.vlgmr.msrb.gmra.mxu0 %v5900_v35  ;;  %1375 = vmatmul.bf16.vlgmr.msrb.gmra.mxu1 %v5902_v39  ;;  %v5309_v7 = vld [vmem:[#allocation5 + $0x264] sm:$0xf]  ;;  %v4117_v8 = vld [vmem:[#allocation5 + $0x270] sm:$0xf0]  ;;  %v4520_v10 = vor.u32 %v5409_v1, %v4517_v2  ;;  %v5328_v63 = vld [vmem:[#allocation5 + $0x2f4] sm:$0xf0] }
  0x61   :  { %1409 = vmatpush.bf16.msra.mxu0 %v4184_v26  ;;  %1423 = vmatpush.bf16.msra.mxu1 %v4312_v29  ;;  %v5341_v9 = vld [vmem:[#allocation5 + $0x364] sm:$0xf]  ;;  %v4245_v11 = vld [vmem:[#allocation5 + $0x370] sm:$0xf0]  ;;  %v4120_v16 = vor.u32 %v5309_v7, %v4117_v8  ;;  %v4315_v2 = vld [vmem:[#allocation5 + $0x3e8] sm:$0xf]  ;;  %v4188_v8 = vor.u32 %v5328_v63, %v4187_v62 }
  0x62   :  { %1437 = vmatpush.bf16.msra.mxu2 %v4440_v30  ;;  %1403 = vmatmul.bf16.vlgmr.msrb.gmra.mxu3 %v5891_v6  ;;  %v5373_v12 = vld [vmem:[#allocation5 + $0x464] sm:$0xf]  ;;  %v4373_v13 = vld [vmem:[#allocation5 + $0x470] sm:$0xf0]  ;;  %v4248_v17 = vor.u32 %v5341_v9, %v4245_v11  ;;  %v3915_v9 = vld [vmem:[#allocation5 + $0xc8] sm:$0xf] }
  0x63   :  { %1451 = vmatpush.bf16.msra.mxu3 %v4568_v34  ;;  %1389 = vmatmul.bf16.vlgmr.msrb.gmra.mxu2 %v5888_v57  ;;  %v5405_v14 = vld [vmem:[#allocation5 + $0x564] sm:$0xf]  ;;  %v4501_v15 = vld [vmem:[#allocation5 + $0x570] sm:$0xf0]  ;;  %v4376_v18 = vor.u32 %v5373_v12, %v4373_v13  ;;  %v4043_v11 = vld [vmem:[#allocation5 + $0x1c8] sm:$0xf] }
  0x64   :  { %v5305_v19 = vld [vmem:[#allocation5 + $0x244] sm:$0xf]  ;;  %v4101_v20 = vld [vmem:[#allocation5 + $0x250] sm:$0xf0]  ;;  %v4504_v24 = vor.u32 %v5405_v14, %v4501_v15  ;;  %v5292_v13 = vld [vmem:[#allocation5 + $0x1d4] sm:$0xf0] }
  0x65   :  { %1410 = vmatpush.bf16.msra.mxu0 %v4168_v42  ;;  %1424 = vmatpush.bf16.msra.mxu1 %v4296_v43  ;;  %v5337_v21 = vld [vmem:[#allocation5 + $0x344] sm:$0xf]  ;;  %v4229_v25 = vld [vmem:[#allocation5 + $0x350] sm:$0xf0]  ;;  %v4104_v30 = vor.u32 %v5305_v19, %v4101_v20  ;;  %v4171_v14 = vld [vmem:[#allocation5 + $0x2c8] sm:$0xf]  ;;  %v4044_v19 = vor.u32 %v5292_v13, %v4043_v11 }
  0x66   :  { %1438 = vmatpush.bf16.msra.mxu2 %v4424_v44  ;;  %v5369_v26 = vld [vmem:[#allocation5 + $0x444] sm:$0xf]  ;;  %v4357_v27 = vld [vmem:[#allocation5 + $0x450] sm:$0xf0]  ;;  %v4232_v31 = vor.u32 %v5337_v21, %v4229_v25  ;;  %v5324_v15 = vld [vmem:[#allocation5 + $0x2d4] sm:$0xf0] }
  0x67   :  { %1452 = vmatpush.bf16.msra.mxu3 %v4552_v48  ;;  %v5401_v28 = vld [vmem:[#allocation5 + $0x544] sm:$0xf]  ;;  %v4485_v29 = vld [vmem:[#allocation5 + $0x550] sm:$0xf0]  ;;  %v4360_v32 = vor.u32 %v5369_v26, %v4357_v27  ;;  %v4172_v20 = vor.u32 %v5324_v15, %v4171_v14  ;;  %v3899_v21 = vld [vmem:[#allocation5 + $0xa8] sm:$0xf] }
  0x68   :  { %v5301_v33 = vld [vmem:[#allocation5 + $0x224] sm:$0xf]  ;;  %v4085_v34 = vld [vmem:[#allocation5 + $0x230] sm:$0xf0]  ;;  %v4488_v37 = vor.u32 %v5401_v28, %v4485_v29  ;;  %v4027_v25 = vld [vmem:[#allocation5 + $0x1a8] sm:$0xf] }
  0x69   :  { %1411 = vmatpush.bf16.msra.mxu0 %v4152_v54  ;;  %1425 = vmatpush.bf16.msra.mxu1 %v4280_v55  ;;  %v5333_v36 = vld [vmem:[#allocation5 + $0x324] sm:$0xf]  ;;  %v4213_v38 = vld [vmem:[#allocation5 + $0x330] sm:$0xf0]  ;;  %v4088_v44 = vor.u32 %v5301_v33, %v4085_v34  ;;  %v5288_v27 = vld [vmem:[#allocation5 + $0x1b4] sm:$0xf0] }
  0x6a   :  { %1439 = vmatpush.bf16.msra.mxu2 %v4408_v56  ;;  %v5365_v40 = vld [vmem:[#allocation5 + $0x424] sm:$0xf]  ;;  %v4341_v41 = vld [vmem:[#allocation5 + $0x430] sm:$0xf0]  ;;  %v4216_v48 = vor.u32 %v5333_v36, %v4213_v38  ;;  %v3931_v56 = vld [vmem:[#allocation5 + $0xe8] sm:$0xf]  ;;  %v4028_v33 = vor.u32 %v5288_v27, %v4027_v25 }
  0x6b   :  { %1453 = vmatpush.bf16.msra.mxu3 %v4536_v61  ;;  %v5397_v42 = vld [vmem:[#allocation5 + $0x524] sm:$0xf]  ;;  %v4469_v43 = vld [vmem:[#allocation5 + $0x530] sm:$0xf0]  ;;  %v4344_v49 = vor.u32 %v5365_v40, %v4341_v41  ;;  %v5296_v61 = vld [vmem:[#allocation5 + $0x1f4] sm:$0xf0] }
  0x6c   :  { %v5297_v45 = vld [vmem:[#allocation5 + $0x204] sm:$0xf]  ;;  %v4069_v46 = vld [vmem:[#allocation5 + $0x210] sm:$0xf0]  ;;  %v4472_v53 = vor.u32 %v5397_v42, %v4469_v43  ;;  %v4060_v7 = vor.u32 %v5296_v61, %v4059_v59  ;;  %v4155_v28 = vld [vmem:[#allocation5 + $0x2a8] sm:$0xf] }
  0x6d   :  { %1412 = vmatpush.bf16.msra.mxu0 %v4136_v3  ;;  %1426 = vmatpush.bf16.msra.mxu1 %v4264_v4  ;;  %v5329_v47 = vld [vmem:[#allocation5 + $0x304] sm:$0xf]  ;;  %v4197_v50 = vld [vmem:[#allocation5 + $0x310] sm:$0xf0]  ;;  %v4072_v60 = vor.u32 %v5297_v45, %v4069_v46  ;;  %v5360_v3 = vld [vmem:[#allocation5 + $0x3f4] sm:$0xf0] }
  0x6e   :  { %1440 = vmatpush.bf16.msra.mxu2 %v4392_v5  ;;  %v5361_v51 = vld [vmem:[#allocation5 + $0x404] sm:$0xf]  ;;  %v4325_v52 = vld [vmem:[#allocation5 + $0x410] sm:$0xf0]  ;;  %v4200_v0 = vor.u32 %v5329_v47, %v4197_v50  ;;  %v3932_v5 = vor.u32 %v5264_v58, %v3931_v56  ;;  %v4316_v12 = vor.u32 %v5360_v3, %v4315_v2  ;;  %v5320_v29 = vld [vmem:[#allocation5 + $0x2b4] sm:$0xf0] }
  0x6f   :  { %1454 = vmatpush.bf16.msra.mxu3 %v4520_v10  ;;  %v5393_v54 = vld [vmem:[#allocation5 + $0x504] sm:$0xf]  ;;  %v4453_v55 = vld [vmem:[#allocation5 + $0x510] sm:$0xf0]  ;;  %v4328_v1 = vor.u32 %v5361_v51, %v4325_v52  ;;  %v5260_v10 = vld [vmem:[#allocation5 + $0xd4] sm:$0xf0]  ;;  %v4156_v34 = vor.u32 %v5320_v29, %v4155_v28 }
  0x70   :  { %v4456_v4 = vor.u32 %v5393_v54, %v4453_v55  ;;  %v3883_v36 = vld [vmem:[#allocation5 + $0x88] sm:$0xf]  ;;  %v5284_v41 = vld [vmem:[#allocation5 + $0x194] sm:$0xf0] }
  0x71   :  { %1413 = vmatpush.bf16.msra.mxu0 %v4120_v16  ;;  %1427 = vmatpush.bf16.msra.mxu1 %v4248_v17  ;;  %v4299_v16 = vld [vmem:[#allocation5 + $0x3c8] sm:$0xf]  ;;  %v5356_v17 = vld [vmem:[#allocation5 + $0x3d4] sm:$0xf0] }
  0x72   :  { %1441 = vmatpush.bf16.msra.mxu2 %v4376_v18  ;;  %v3916_v18 = vor.u32 %v5260_v10, %v3915_v9  ;;  %v4300_v26 = vor.u32 %v5356_v17, %v4299_v16  ;;  %v4011_v38 = vld [vmem:[#allocation5 + $0x188] sm:$0xf]  ;;  %v5316_v43 = vld [vmem:[#allocation5 + $0x294] sm:$0xf0] }
  0x73   :  { %1455 = vmatpush.bf16.msra.mxu3 %v4504_v24  ;;  %v5256_v24 = vld [vmem:[#allocation5 + $0xb4] sm:$0xf0]  ;;  %v4139_v42 = vld [vmem:[#allocation5 + $0x288] sm:$0xf]  ;;  %v4012_v47 = vor.u32 %v5284_v41, %v4011_v38  ;;  %v5262_v41 = vld [vmem:[#allocation5 + $0xec] sm:$0xf] }
  0x74   :  { %v5348_v45 = vld [vmem:[#allocation5 + $0x394] sm:$0xf0]  ;;  %v3995_v51 = vld [vmem:[#allocation5 + $0x168] sm:$0xf] }
  0x75   :  { %1414 = vmatpush.bf16.msra.mxu0 %v4104_v30  ;;  %1428 = vmatpush.bf16.msra.mxu1 %v4232_v31  ;;  %v4283_v30 = vld [vmem:[#allocation5 + $0x3a8] sm:$0xf]  ;;  %v5352_v31 = vld [vmem:[#allocation5 + $0x3b4] sm:$0xf0] }
  0x76   :  { %1442 = vmatpush.bf16.msra.mxu2 %v4360_v32  ;;  %v3900_v32 = vor.u32 %v5256_v24, %v3899_v21  ;;  %v4284_v40 = vor.u32 %v5352_v31, %v4283_v30  ;;  %v5248_v50 = vld [vmem:[#allocation5 + $0x74] sm:$0xf0]  ;;  %v4123_v54 = vld [vmem:[#allocation5 + $0x268] sm:$0xf] }
  0x77   :  { %1456 = vmatpush.bf16.msra.mxu3 %v4488_v37  ;;  %v5252_v37 = vld [vmem:[#allocation5 + $0x94] sm:$0xf0]  ;;  %v4251_v56 = vld [vmem:[#allocation5 + $0x368] sm:$0xf] }
  0x78   :  { %v3884_v46 = vor.u32 %v5252_v37, %v3883_v36  ;;  %v5312_v55 = vld [vmem:[#allocation5 + $0x274] sm:$0xf0]  ;;  %v3851_v62 = vld [vmem:[#allocation5 + $0x48] sm:$0xf] }
  0x79   :  { %1415 = vmatpush.bf16.msra.mxu0 %v4088_v44  ;;  %1429 = vmatpush.bf16.msra.mxu1 %v4216_v48  ;;  %v4267_v44 = vld [vmem:[#allocation5 + $0x388] sm:$0xf]  ;;  %v4140_v48 = vor.u32 %v5316_v43, %v4139_v42  ;;  %v5344_v58 = vld [vmem:[#allocation5 + $0x374] sm:$0xf0]  ;;  %v4124_v61 = vor.u32 %v5312_v55, %v4123_v54  ;;  %v3933_v42 = vld [vmem:[#allocation5 + $0xf8] sm:$0xf0] }
  0x7a   :  { %1443 = vmatpush.bf16.msra.mxu2 %v4344_v49  ;;  %v3867_v49 = vld [vmem:[#allocation5 + $0x68] sm:$0xf]  ;;  %v4268_v52 = vor.u32 %v5348_v45, %v4267_v44  ;;  %v5244_v63 = vld [vmem:[#allocation5 + $0x54] sm:$0xf0]  ;;  %v5294_v45 = vld [vmem:[#allocation5 + $0x1ec] sm:$0xf] }
  0x7b   :  { %1457 = vmatpush.bf16.msra.mxu3 %v4472_v53  ;;  %v5280_v53 = vld [vmem:[#allocation5 + $0x174] sm:$0xf0]  ;;  %v3868_v59 = vor.u32 %v5248_v50, %v3867_v49  ;;  %v4107_v3 = vld [vmem:[#allocation5 + $0x248] sm:$0xf]  ;;  %v3936_v50 = vor.u32 %v5262_v41, %v3933_v42 }
  0x7c   :  { %v5276_v2 = vld [vmem:[#allocation5 + $0x154] sm:$0xf0]  ;;  %v3835_v11 = vld [vmem:[#allocation5 + $0x28] sm:$0xf] }
  0x7d   :  { %1416 = vmatpush.bf16.msra.mxu0 %v4072_v60  ;;  %1430 = vmatpush.bf16.msra.mxu1 %v4200_v0  ;;  %v3996_v60 = vor.u32 %v5280_v53, %v3995_v51  ;;  %v3979_v0 = vld [vmem:[#allocation5 + $0x148] sm:$0xf]  ;;  %v5272_v15 = vld [vmem:[#allocation5 + $0x134] sm:$0xf0] }
  0x7e   :  { %1444 = vmatpush.bf16.msra.mxu2 %v4328_v1  ;;  %v4252_v1 = vor.u32 %v5344_v58, %v4251_v56  ;;  %v3980_v9 = vor.u32 %v5276_v2, %v3979_v0  ;;  %v3963_v13 = vld [vmem:[#allocation5 + $0x128] sm:$0xf]  ;;  %v5304_v17 = vld [vmem:[#allocation5 + $0x234] sm:$0xf0]  ;;  %v5258_v56 = vld [vmem:[#allocation5 + $0xcc] sm:$0xf] }
  0x7f   :  { %1458 = vmatpush.bf16.msra.mxu3 %v4456_v4  ;;  %v5308_v4 = vld [vmem:[#allocation5 + $0x254] sm:$0xf0]  ;;  %v4091_v16 = vld [vmem:[#allocation5 + $0x228] sm:$0xf]  ;;  %v3964_v25 = vor.u32 %v5272_v15, %v3963_v13  ;;  %v3917_v58 = vld [vmem:[#allocation5 + $0xd8] sm:$0xf0] }
  0x80   :  { %1417 = vmatmul.bf16.vlgmr.msra.gmra.mxu0 %v5894_v22  ;;  %1431 = vmatmul.bf16.vlgmr.msra.gmra.mxu1 %v5896_v23  ;;  %v4108_v10 = vor.u32 %v5308_v4, %v4107_v3  ;;  %v3819_v21 = vld [vmem:[#allocation5 + $0x8] sm:$0xf]  ;;  %v5236_v24 = vld [vmem:[#allocation5 + $0x14] sm:$0xf0] }
  0x81   :  { %1465 = vmatpush.bf16.msrb.mxu0 %v3932_v5  ;;  %1479 = vmatpush.bf16.msrb.mxu1 %v4060_v7  ;;  %v4235_v5 = vld [vmem:[#allocation5 + $0x348] sm:$0xf]  ;;  %v5340_v7 = vld [vmem:[#allocation5 + $0x354] sm:$0xf0]  ;;  %v3820_v38 = vor.u32 %v5236_v24, %v3819_v21  ;;  %v4013_v21 = vld [vmem:[#allocation5 + $0x198] sm:$0xf0] }
  0x82   :  { %1493 = vmatpush.bf16.msrb.mxu2 %v4188_v8  ;;  %1459 = vmatmul.bf16.vlgmr.msra.gmra.mxu3 %v5902_v39  ;;  %v3852_v8 = vor.u32 %v5244_v63, %v3851_v62  ;;  %v4236_v14 = vor.u32 %v5340_v7, %v4235_v5  ;;  %v3947_v27 = vld [vmem:[#allocation5 + $0x108] sm:$0xf]  ;;  %v5268_v28 = vld [vmem:[#allocation5 + $0x114] sm:$0xf0]  ;;  %v3920_v63 = vor.u32 %v5258_v56, %v3917_v58  ;;  %v5254_v5 = vld [vmem:[#allocation5 + $0xac] sm:$0xf] }
  0x83   :  { %1507 = vmatpush.bf16.msrb.mxu3 %v4316_v12  ;;  %1445 = vmatmul.bf16.vlgmr.msra.gmra.mxu2 %v5900_v35  ;;  %v5240_v12 = vld [vmem:[#allocation5 + $0x34] sm:$0xf0]  ;;  %v4075_v29 = vld [vmem:[#allocation5 + $0x208] sm:$0xf]  ;;  %v3948_v43 = vor.u32 %v5268_v28, %v3947_v27  ;;  %v3901_v7 = vld [vmem:[#allocation5 + $0xb8] sm:$0xf0] }
  0x84   :  { %v5300_v31 = vld [vmem:[#allocation5 + $0x214] sm:$0xf0]  ;;  %v4571_v37 = vld [vmem:[#allocation5 + $0x5e8] sm:$0xf] }
  0x85   :  { %1466 = vmatpush.bf16.msrb.mxu0 %v3916_v18  ;;  %1480 = vmatpush.bf16.msrb.mxu1 %v4044_v19  ;;  %v4219_v18 = vld [vmem:[#allocation5 + $0x328] sm:$0xf]  ;;  %v5336_v19 = vld [vmem:[#allocation5 + $0x334] sm:$0xf0]  ;;  %v4076_v44 = vor.u32 %v5300_v31, %v4075_v29 }
  0x86   :  { %1494 = vmatpush.bf16.msrb.mxu2 %v4172_v20  ;;  %v3836_v20 = vor.u32 %v5240_v12, %v3835_v11  ;;  %v4220_v30 = vor.u32 %v5336_v19, %v4219_v18  ;;  %v5392_v36 = vld [vmem:[#allocation5 + $0x4f4] sm:$0xf0]  ;;  %v4427_v51 = vld [vmem:[#allocation5 + $0x4c8] sm:$0xf]  ;;  %v3904_v12 = vor.u32 %v5254_v5, %v3901_v7  ;;  %v5250_v18 = vld [vmem:[#allocation5 + $0x8c] sm:$0xf] }
  0x87   :  { %1508 = vmatpush.bf16.msrb.mxu3 %v4300_v26  ;;  %v4092_v26 = vor.u32 %v5304_v17, %v4091_v16  ;;  %v4555_v53 = vld [vmem:[#allocation5 + $0x5c8] sm:$0xf]  ;;  %v5420_v55 = vld [vmem:[#allocation5 + $0x5d4] sm:$0xf0]  ;;  %v3885_v19 = vld [vmem:[#allocation5 + $0x98] sm:$0xf0] }
  0x88   :  { %v4556_v62 = vor.u32 %v5420_v55, %v4555_v53  ;;  %v4411_v0 = vld [vmem:[#allocation5 + $0x4a8] sm:$0xf]  ;;  %v5416_v4 = vld [vmem:[#allocation5 + $0x5b4] sm:$0xf0]  ;;  %v5234_v7 = vld [vmem:[#allocation5 + $0xc] sm:$0xf] }
  0x89   :  { %1467 = vmatpush.bf16.msrb.mxu0 %v3900_v32  ;;  %1481 = vmatpush.bf16.msrb.mxu1 %v4028_v33  ;;  %v4203_v32 = vld [vmem:[#allocation5 + $0x308] sm:$0xf]  ;;  %v5332_v33 = vld [vmem:[#allocation5 + $0x314] sm:$0xf0] }
  0x8a   :  { %1495 = vmatpush.bf16.msrb.mxu2 %v4156_v34  ;;  %v4443_v34 = vld [vmem:[#allocation5 + $0x4e8] sm:$0xf]  ;;  %v5412_v17 = vld [vmem:[#allocation5 + $0x594] sm:$0xf0] }
  0x8b   :  { %1509 = vmatpush.bf16.msrb.mxu3 %v4284_v40  ;;  %v5424_v40 = vld [vmem:[#allocation5 + $0x5f4] sm:$0xf0]  ;;  %v4539_v2 = vld [vmem:[#allocation5 + $0x5a8] sm:$0xf] }
  0x8c   :  { %v4572_v49 = vor.u32 %v5424_v40, %v4571_v37  ;;  %v4540_v11 = vor.u32 %v5416_v4, %v4539_v2  ;;  %v4395_v13 = vld [vmem:[#allocation5 + $0x488] sm:$0xf]  ;;  %v5376_v28 = vld [vmem:[#allocation5 + $0x474] sm:$0xf0] }
  0x8d   :  { %1468 = vmatpush.bf16.msrb.mxu0 %v3884_v46  ;;  %1482 = vmatpush.bf16.msrb.mxu1 %v4012_v47  ;;  %v4061_v46 = vld [vmem:[#allocation5 + $0x1f8] sm:$0xf0]  ;;  %v4204_v47 = vor.u32 %v5332_v33, %v4203_v32  ;;  %v4523_v15 = vld [vmem:[#allocation5 + $0x588] sm:$0xf]  ;;  %v5408_v31 = vld [vmem:[#allocation5 + $0x574] sm:$0xf0] }
  0x8e   :  { %1496 = vmatpush.bf16.msrb.mxu2 %v4140_v48  ;;  %v4444_v48 = vor.u32 %v5392_v36, %v4443_v34  ;;  %v4064_v54 = vor.u32 %v5294_v45, %v4061_v46  ;;  %v4379_v27 = vld [vmem:[#allocation5 + $0x468] sm:$0xf]  ;;  %v5246_v32 = vld [vmem:[#allocation5 + $0x6c] sm:$0xf]  ;;  %v3869_v33 = vld [vmem:[#allocation5 + $0x78] sm:$0xf0] }
  0x8f   :  { %1510 = vmatpush.bf16.msrb.mxu3 %v4268_v52  ;;  %v5388_v52 = vld [vmem:[#allocation5 + $0x4d4] sm:$0xf0]  ;;  %v4507_v29 = vld [vmem:[#allocation5 + $0x568] sm:$0xf]  ;;  %v5278_v34 = vld [vmem:[#allocation5 + $0x16c] sm:$0xf]  ;;  %v4380_v37 = vor.u32 %v5376_v28, %v4379_v27  ;;  %v3872_v40 = vor.u32 %v5246_v32, %v3869_v33 }
  0x90   :  { %v3997_v36 = vld [vmem:[#allocation5 + $0x178] sm:$0xf0]  ;;  %v4363_v41 = vld [vmem:[#allocation5 + $0x448] sm:$0xf]  ;;  %v5372_v42 = vld [vmem:[#allocation5 + $0x454] sm:$0xf0] }
  0x91   :  { %1469 = vmatpush.bf16.msrb.mxu0 %v3868_v59  ;;  %1483 = vmatpush.bf16.msrb.mxu1 %v3996_v60  ;;  %v5290_v59 = vld [vmem:[#allocation5 + $0x1cc] sm:$0xf]  ;;  %v4045_v60 = vld [vmem:[#allocation5 + $0x1d8] sm:$0xf0]  ;;  %v5404_v45 = vld [vmem:[#allocation5 + $0x554] sm:$0xf0] }
  0x92   :  { %1497 = vmatpush.bf16.msrb.mxu2 %v4124_v61  ;;  %v4428_v61 = vor.u32 %v5388_v52, %v4427_v51  ;;  %v4048_v3 = vor.u32 %v5290_v59, %v4045_v60  ;;  %v5242_v46 = vld [vmem:[#allocation5 + $0x4c] sm:$0xf]  ;;  %v4347_v53 = vld [vmem:[#allocation5 + $0x428] sm:$0xf]  ;;  %v5400_v58 = vld [vmem:[#allocation5 + $0x534] sm:$0xf0] }
  0x93   :  { %1511 = vmatpush.bf16.msrb.mxu3 %v4252_v1  ;;  %v5384_v1 = vld [vmem:[#allocation5 + $0x4b4] sm:$0xf0]  ;;  %v4475_v55 = vld [vmem:[#allocation5 + $0x528] sm:$0xf]  ;;  %v5238_v59 = vld [vmem:[#allocation5 + $0x2c] sm:$0xf] }
  0x94   :  { %v3837_v60 = vld [vmem:[#allocation5 + $0x38] sm:$0xf0]  ;;  %v4476_v2 = vor.u32 %v5400_v58, %v4475_v55  ;;  %v4459_v4 = vld [vmem:[#allocation5 + $0x508] sm:$0xf]  ;;  %v5396_v5 = vld [vmem:[#allocation5 + $0x514] sm:$0xf0] }
  0x95   :  { %1470 = vmatpush.bf16.msrb.mxu0 %v3852_v8  ;;  %1484 = vmatpush.bf16.msrb.mxu1 %v3980_v9  ;;  %v5286_v8 = vld [vmem:[#allocation5 + $0x1ac] sm:$0xf]  ;;  %v4029_v9 = vld [vmem:[#allocation5 + $0x1b8] sm:$0xf0] }
  0x96   :  { %1498 = vmatpush.bf16.msrb.mxu2 %v4108_v10  ;;  %v4412_v10 = vor.u32 %v5384_v1, %v4411_v0  ;;  %v4032_v16 = vor.u32 %v5286_v8, %v4029_v9  ;;  %v4331_v0 = vld [vmem:[#allocation5 + $0x408] sm:$0xf]  ;;  %v5364_v1 = vld [vmem:[#allocation5 + $0x414] sm:$0xf0]  ;;  %v3821_v9 = vld [vmem:[#allocation5 + $0x18] sm:$0xf0] }
  0x97   :  { %1512 = vmatpush.bf16.msrb.mxu3 %v4236_v14  ;;  %v5380_v14 = vld [vmem:[#allocation5 + $0x494] sm:$0xf0]  ;;  %v4301_v33 = vld [vmem:[#allocation5 + $0x3d8] sm:$0xf0]  ;;  %v5314_v55 = vld [vmem:[#allocation5 + $0x28c] sm:$0xf] }
  0x98   :  { %v4396_v24 = vor.u32 %v5380_v14, %v4395_v13  ;;  %v4189_v13 = vld [vmem:[#allocation5 + $0x2f8] sm:$0xf0]  ;;  %v5358_v14 = vld [vmem:[#allocation5 + $0x3ec] sm:$0xf] }
  0x99   :  { %1471 = vmatpush.bf16.msrb.mxu0 %v3836_v20  ;;  %1485 = vmatpush.bf16.msrb.mxu1 %v3964_v25  ;;  %v5282_v20 = vld [vmem:[#allocation5 + $0x18c] sm:$0xf]  ;;  %v4524_v25 = vor.u32 %v5412_v17, %v4523_v15  ;;  %v4332_v15 = vor.u32 %v5364_v1, %v4331_v0 }
  0x9a   :  { %1499 = vmatpush.bf16.msrb.mxu2 %v4092_v26  ;;  %v3888_v26 = vor.u32 %v5250_v18, %v3885_v19  ;;  %v5390_v17 = vld [vmem:[#allocation5 + $0x4ec] sm:$0xf]  ;;  %v4445_v18 = vld [vmem:[#allocation5 + $0x4f8] sm:$0xf0]  ;;  %v4460_v19 = vor.u32 %v5396_v5, %v4459_v4 }
  0x9b   :  { %1513 = vmatpush.bf16.msrb.mxu3 %v4220_v30  ;;  %v4016_v30 = vor.u32 %v5282_v20, %v4013_v21  ;;  %v3824_v20 = vor.u32 %v5234_v7, %v3821_v9  ;;  %v5422_v21 = vld [vmem:[#allocation5 + $0x5ec] sm:$0xf]  ;;  %v4448_v28 = vor.u32 %v5390_v17, %v4445_v18  ;;  %v4253_v7 = vld [vmem:[#allocation5 + $0x378] sm:$0xf0] }
  0x9c   :  { %v5346_v58 = vld [vmem:[#allocation5 + $0x38c] sm:$0xf]  ;;  %v4381_v9 = vld [vmem:[#allocation5 + $0x478] sm:$0xf0] }
  0x9d   :  { %1472 = vmatpush.bf16.msrb.mxu0 %v3820_v38  ;;  %1486 = vmatpush.bf16.msrb.mxu1 %v3948_v43  ;;  %v4508_v38 = vor.u32 %v5408_v31, %v4507_v29  ;;  %v4491_v43 = vld [vmem:[#allocation5 + $0x548] sm:$0xf]  ;;  %v5322_v29 = vld [vmem:[#allocation5 + $0x2cc] sm:$0xf] }
  0x9e   :  { %1500 = vmatpush.bf16.msrb.mxu2 %v4076_v44  ;;  %v4000_v44 = vor.u32 %v5278_v34, %v3997_v36  ;;  %v4492_v51 = vor.u32 %v5404_v45, %v4491_v43  ;;  %v5354_v31 = vld [vmem:[#allocation5 + $0x3cc] sm:$0xf]  ;;  %v4429_v36 = vld [vmem:[#allocation5 + $0x4d8] sm:$0xf0] }
  0x9f   :  { %1514 = vmatpush.bf16.msrb.mxu3 %v4204_v47  ;;  %v3853_v47 = vld [vmem:[#allocation5 + $0x58] sm:$0xf0]  ;;  %v5386_v34 = vld [vmem:[#allocation5 + $0x4cc] sm:$0xf] }
  0xa0   :  { %1473 = vmatmul.bf16.vlgmr.msrb.gmra.mxu0 %v5888_v57  ;;  %1487 = vmatmul.bf16.vlgmr.msrb.gmra.mxu1 %v5891_v6  ;;  %v3856_v52 = vor.u32 %v5242_v46, %v3853_v47  ;;  %v5318_v43 = vld [vmem:[#allocation5 + $0x2ac] sm:$0xf]  ;;  %v4285_v47 = vld [vmem:[#allocation5 + $0x3b8] sm:$0xf0] }
  0xa1   :  { %1521 = vmatpush.bf16.msra.mxu0 %v4444_v48  ;;  %1535 = vmatpush.bf16.msra.mxu1 %v4572_v49  ;;  %v5274_v48 = vld [vmem:[#allocation5 + $0x14c] sm:$0xf]  ;;  %v3981_v49 = vld [vmem:[#allocation5 + $0x158] sm:$0xf0] }
  0xa2   :  { %1549 = vmatpush.bf16.msra.mxu2 %v3936_v50  ;;  %1515 = vmatmul.bf16.vlgmr.msrb.gmra.mxu3 %v5896_v23  ;;  %v4364_v50 = vor.u32 %v5372_v42, %v4363_v41  ;;  %v3984_v56 = vor.u32 %v5274_v48, %v3981_v49  ;;  %v4304_v41 = vor.u32 %v5354_v31, %v4301_v33  ;;  %v5350_v45 = vld [vmem:[#allocation5 + $0x3ac] sm:$0xf]  ;;  %v4413_v49 = vld [vmem:[#allocation5 + $0x4b8] sm:$0xf0] }
  0xa3   :  { %1563 = vmatpush.bf16.msra.mxu3 %v4064_v54  ;;  %1501 = vmatmul.bf16.vlgmr.msrb.gmra.mxu2 %v5894_v22  ;;  %v5368_v54 = vld [vmem:[#allocation5 + $0x434] sm:$0xf0]  ;;  %v4432_v42 = vor.u32 %v5386_v34, %v4429_v36  ;;  %v5382_v48 = vld [vmem:[#allocation5 + $0x4ac] sm:$0xf]  ;;  %v4221_v33 = vld [vmem:[#allocation5 + $0x338] sm:$0xf0] }
  0xa4   :  { %v5342_v4 = vld [vmem:[#allocation5 + $0x36c] sm:$0xf]  ;;  %v4349_v36 = vld [vmem:[#allocation5 + $0x438] sm:$0xf0] }
  0xa5   :  { %1522 = vmatpush.bf16.msra.mxu0 %v4428_v61  ;;  %1536 = vmatpush.bf16.msra.mxu1 %v4556_v62  ;;  %v5270_v61 = vld [vmem:[#allocation5 + $0x12c] sm:$0xf]  ;;  %v3965_v62 = vld [vmem:[#allocation5 + $0x138] sm:$0xf0] }
  0xa6   :  { %1550 = vmatpush.bf16.msra.mxu2 %v3920_v63  ;;  %v4348_v63 = vor.u32 %v5368_v54, %v4347_v53  ;;  %v3968_v8 = vor.u32 %v5270_v61, %v3965_v62  ;;  %v4288_v53 = vor.u32 %v5350_v45, %v4285_v47  ;;  %v4416_v54 = vor.u32 %v5382_v48, %v4413_v49  ;;  %v5378_v61 = vld [vmem:[#allocation5 + $0x48c] sm:$0xf]  ;;  %v4397_v62 = vld [vmem:[#allocation5 + $0x498] sm:$0xf0] }
  0xa7   :  { %1564 = vmatpush.bf16.msra.mxu3 %v4048_v3  ;;  %v3840_v3 = vor.u32 %v5238_v59, %v3837_v60  ;;  %v4269_v60 = vld [vmem:[#allocation5 + $0x398] sm:$0xf0]  ;;  %v5338_v17 = vld [vmem:[#allocation5 + $0x34c] sm:$0xf] }
  0xa8   :  { %v4272_v1 = vor.u32 %v5346_v58, %v4269_v60  ;;  %v5334_v31 = vld [vmem:[#allocation5 + $0x32c] sm:$0xf]  ;;  %v4205_v47 = vld [vmem:[#allocation5 + $0x318] sm:$0xf0] }
  0xa9   :  { %1523 = vmatpush.bf16.msra.mxu0 %v4412_v10  ;;  %1537 = vmatpush.bf16.msra.mxu1 %v4540_v11  ;;  %v5266_v10 = vld [vmem:[#allocation5 + $0x10c] sm:$0xf]  ;;  %v3949_v11 = vld [vmem:[#allocation5 + $0x118] sm:$0xf0] }
  0xaa   :  { %1551 = vmatpush.bf16.msra.mxu2 %v3904_v12  ;;  %v5326_v12 = vld [vmem:[#allocation5 + $0x2ec] sm:$0xf]  ;;  %v4333_v49 = vld [vmem:[#allocation5 + $0x418] sm:$0xf0] }
  0xab   :  { %1565 = vmatpush.bf16.msra.mxu3 %v4032_v16  ;;  %v4317_v16 = vld [vmem:[#allocation5 + $0x3f8] sm:$0xf0]  ;;  %v5366_v34 = vld [vmem:[#allocation5 + $0x42c] sm:$0xf] }
  0xac   :  { %v4320_v27 = vor.u32 %v5358_v14, %v4317_v16  ;;  %v4109_v16 = vld [vmem:[#allocation5 + $0x258] sm:$0xf0]  ;;  %v5330_v45 = vld [vmem:[#allocation5 + $0x30c] sm:$0xf] }
  0xad   :  { %1524 = vmatpush.bf16.msra.mxu0 %v4396_v24  ;;  %1538 = vmatpush.bf16.msra.mxu1 %v4524_v25  ;;  %v4573_v24 = vld [vmem:[#allocation5 + $0x5f8] sm:$0xf0]  ;;  %v3952_v25 = vor.u32 %v5266_v10, %v3949_v11  ;;  %v5406_v10 = vld [vmem:[#allocation5 + $0x56c] sm:$0xf] }
  0xae   :  { %1552 = vmatpush.bf16.msra.mxu2 %v3888_v26  ;;  %v4192_v26 = vor.u32 %v5326_v12, %v4189_v13  ;;  %v4576_v32 = vor.u32 %v5422_v21, %v4573_v24  ;;  %v4509_v11 = vld [vmem:[#allocation5 + $0x578] sm:$0xf0]  ;;  %v4256_v13 = vor.u32 %v5342_v4, %v4253_v7  ;;  %v5402_v24 = vld [vmem:[#allocation5 + $0x54c] sm:$0xf] }
  0xaf   :  { %1566 = vmatpush.bf16.msra.mxu3 %v4016_v30  ;;  %v4173_v30 = vld [vmem:[#allocation5 + $0x2d8] sm:$0xf0]  ;;  %v4512_v18 = vor.u32 %v5406_v10, %v4509_v11  ;;  %v5362_v48 = vld [vmem:[#allocation5 + $0x40c] sm:$0xf] }
  0xb0   :  { %v4365_v21 = vld [vmem:[#allocation5 + $0x458] sm:$0xf0] }
  0xb1   :  { %1525 = vmatpush.bf16.msra.mxu0 %v4380_v37  ;;  %1539 = vmatpush.bf16.msra.mxu1 %v4508_v38  ;;  %v5418_v37 = vld [vmem:[#allocation5 + $0x5cc] sm:$0xf]  ;;  %v4557_v38 = vld [vmem:[#allocation5 + $0x5d8] sm:$0xf0] }
  0xb2   :  { %1553 = vmatpush.bf16.msra.mxu2 %v3872_v40  ;;  %v4176_v40 = vor.u32 %v5322_v29, %v4173_v30  ;;  %v4560_v46 = vor.u32 %v5418_v37, %v4557_v38  ;;  %v5302_v29 = vld [vmem:[#allocation5 + $0x22c] sm:$0xf]  ;;  %v4093_v30 = vld [vmem:[#allocation5 + $0x238] sm:$0xf0] }
  0xb3   :  { %1567 = vmatpush.bf16.msra.mxu3 %v4000_v44  ;;  %v4157_v44 = vld [vmem:[#allocation5 + $0x2b8] sm:$0xf0]  ;;  %v5398_v37 = vld [vmem:[#allocation5 + $0x52c] sm:$0xf] }
  0xb4   :  { %v4477_v38 = vld [vmem:[#allocation5 + $0x538] sm:$0xf0] }
  0xb5   :  { %1526 = vmatpush.bf16.msra.mxu0 %v4364_v50  ;;  %1540 = vmatpush.bf16.msra.mxu1 %v4492_v51  ;;  %v5414_v50 = vld [vmem:[#allocation5 + $0x5ac] sm:$0xf]  ;;  %v4541_v51 = vld [vmem:[#allocation5 + $0x5b8] sm:$0xf0] }
  0xb6   :  { %1554 = vmatpush.bf16.msra.mxu2 %v3856_v52  ;;  %v4160_v52 = vor.u32 %v5318_v43, %v4157_v44  ;;  %v4544_v59 = vor.u32 %v5414_v50, %v4541_v51  ;;  %v5298_v43 = vld [vmem:[#allocation5 + $0x20c] sm:$0xf]  ;;  %v4077_v44 = vld [vmem:[#allocation5 + $0x218] sm:$0xf0] }
  0xb7   :  { %1568 = vmatpush.bf16.msra.mxu3 %v3984_v56  ;;  %v4141_v56 = vld [vmem:[#allocation5 + $0x298] sm:$0xf0]  ;;  %v5394_v50 = vld [vmem:[#allocation5 + $0x50c] sm:$0xf] }
  0xb8   :  { %v4144_v0 = vor.u32 %v5314_v55, %v4141_v56  ;;  %v4461_v51 = vld [vmem:[#allocation5 + $0x518] sm:$0xf0] }
  0xb9   :  { %1527 = vmatpush.bf16.msra.mxu0 %v4348_v63  ;;  %1541 = vmatpush.bf16.msra.mxu1 %v4476_v2  ;;  %v5410_v63 = vld [vmem:[#allocation5 + $0x58c] sm:$0xf]  ;;  %v4464_v55 = vor.u32 %v5394_v50, %v4461_v51 }
  0xba   :  { %1555 = vmatpush.bf16.msra.mxu2 %v3840_v3  ;;  %v5310_v2 = vld [vmem:[#allocation5 + $0x26c] sm:$0xf]  ;;  %v4125_v3 = vld [vmem:[#allocation5 + $0x278] sm:$0xf0] }
  0xbb   :  { %1569 = vmatpush.bf16.msra.mxu3 %v3968_v8  ;;  %v5374_v8 = vld [vmem:[#allocation5 + $0x46c] sm:$0xf]  ;;  %v4128_v12 = vor.u32 %v5310_v2, %v4125_v3 }
  0xbc   :  { %v4384_v14 = vor.u32 %v5374_v8, %v4381_v9 }
  0xbd   :  { %1528 = vmatpush.bf16.msra.mxu0 %v4332_v15  ;;  %1542 = vmatpush.bf16.msra.mxu1 %v4460_v19  ;;  %v5306_v15 = vld [vmem:[#allocation5 + $0x24c] sm:$0xf]  ;;  %v4237_v19 = vld [vmem:[#allocation5 + $0x358] sm:$0xf0]  ;;  %v1320_v58 = vpop.f32.mrf.mxu1 }
  0xbe   :  { %1556 = vmatpush.bf16.msra.mxu2 %v3824_v20  ;;  %v5370_v20 = vld [vmem:[#allocation5 + $0x44c] sm:$0xf] }
  0xbf   :  { %1570 = vmatpush.bf16.msra.mxu3 %v3952_v25  ;;  %v4493_v25 = vld [vmem:[#allocation5 + $0x558] sm:$0xf0] }
  0xc0   :  { %1529 = vmatmul.bf16.vlgmr.msra.gmra.mxu0 %v5900_v35  ;;  %1543 = vmatmul.bf16.vlgmr.msra.gmra.mxu1 %v5902_v39 }
  0xc1   :  { %1577 = vmatpush.bf16.msrb.mxu0 %v4192_v26  ;;  %1591 = vmatpush.bf16.msrb.mxu1 %v4320_v27  ;;  %v4112_v26 = vor.u32 %v5306_v15, %v4109_v16  ;;  %v4240_v27 = vor.u32 %v5338_v17, %v4237_v19  ;;  %v1306_v56 = vpop.f32.mrf.mxu0 }
  0xc2   :  { %1605 = vmatpush.bf16.msrb.mxu2 %v4448_v28  ;;  %1571 = vmatmul.bf16.vlgmr.msra.gmra.mxu3 %v5891_v6  ;;  %v4400_v6 = vor.u32 %v5378_v61, %v4397_v62  ;;  %v4368_v28 = vor.u32 %v5370_v20, %v4365_v21 }
  0xc3   :  { %1619 = vmatpush.bf16.msrb.mxu3 %v4576_v32  ;;  %1557 = vmatmul.bf16.vlgmr.msra.gmra.mxu2 %v5888_v57  ;;  %v4525_v57 = vld [vmem:[#allocation5 + $0x598] sm:$0xf0]  ;;  %v4496_v32 = vor.u32 %v5402_v24, %v4493_v25 }
  0xc4   :  { %v4528_v5 = vor.u32 %v5410_v63, %v4525_v57 }
  0xc5   :  { %1578 = vmatpush.bf16.msrb.mxu0 %v4176_v40  ;;  %1592 = vmatpush.bf16.msrb.mxu1 %v4304_v41  ;;  %v4096_v40 = vor.u32 %v5302_v29, %v4093_v30  ;;  %v4224_v41 = vor.u32 %v5334_v31, %v4221_v33  ;;  %v1348_v60 = vpop.f32.mrf.mxu3  ;;  %v1322_v62 = vpop.f32.mrf.mxu1  ;;  %v5487_v33 = vld [vmem:[#allocation8 + $0x1ec] sm:$0xf0] }
  0xc6   :  { %1606 = vmatpush.bf16.msrb.mxu2 %v4432_v42  ;;  %v4352_v42 = vor.u32 %v5366_v34, %v4349_v36 }
  0xc7   :  { %1620 = vmatpush.bf16.msrb.mxu3 %v4560_v46  ;;  %v4480_v46 = vor.u32 %v5398_v37, %v4477_v38 }
  0xc9   :  { %1579 = vmatpush.bf16.msrb.mxu0 %v4160_v52  ;;  %1593 = vmatpush.bf16.msrb.mxu1 %v4288_v53  ;;  %v4080_v52 = vor.u32 %v5298_v43, %v4077_v44  ;;  %v4208_v53 = vor.u32 %v5330_v45, %v4205_v47  ;;  %v1308_v61 = vpop.f32.mrf.mxu0  ;;  %v4811_v43 = vld [vmem:[#allocation8 + $0x1c0] sm:$0xf]  ;;  %v5483_v47 = vld [vmem:[#allocation8 + $0x1cc] sm:$0xf0] }
  0xca   :  { %1607 = vmatpush.bf16.msrb.mxu2 %v4416_v54  ;;  %v4336_v54 = vor.u32 %v5362_v48, %v4333_v49  ;;  %v4812_v48 = vor.u32 %v5483_v47, %v4811_v43 }
  0xcb   :  { %1621 = vmatpush.bf16.msrb.mxu3 %v4544_v59 }
  0xcd   :  { %1580 = vmatpush.bf16.msrb.mxu0 %v4144_v0  ;;  %1594 = vmatpush.bf16.msrb.mxu1 %v4272_v1  ;;  %v1350_v57 = vpop.f32.mrf.mxu3  ;;  %v5924_v1 = vld [vmem:[#allocation7] sm:$0xf] }
  0xce   :  { %1608 = vmatpush.bf16.msrb.mxu2 %v4400_v6  ;;  %v1334_v59 = vpop.f32.mrf.mxu2  ;;  %v329_v2 = vperm.slane %v5924_v1, 0 }
  0xcf   :  { %1622 = vmatpush.bf16.msrb.mxu3 %v4528_v5 }
  0xd0   :  { %v1307_v4 = vadd.f32 %v1306_v56, %v329_v2  ;;  %v4795_v56 = vld [vmem:[#allocation8 + $0x1a0] sm:$0xf] }
  0xd1   :  { %1581 = vmatpush.bf16.msrb.mxu0 %v4128_v12  ;;  %1595 = vmatpush.bf16.msrb.mxu1 %v4256_v13  ;;  %v1309_v12 = vadd.f32 %v1308_v61, %v329_v2  ;;  %v5479_v61 = vld [vmem:[#allocation8 + $0x1ac] sm:$0xf0] }
  0xd2   :  { %1609 = vmatpush.bf16.msrb.mxu2 %v4384_v14 }
  0xd3   :  { %1623 = vmatpush.bf16.msrb.mxu3 %v4512_v18  ;;  %v1323_v17 = vadd.f32 %v1322_v62, %v1309_v12 }
  0xd5   :  { %1582 = vmatpush.bf16.msrb.mxu0 %v4112_v26  ;;  %1596 = vmatpush.bf16.msrb.mxu1 %v4240_v27  ;;  %v4699_v26 = vld [vmem:[#allocation8 + $0xe0] sm:$0xf]  ;;  %v5455_v27 = vld [vmem:[#allocation8 + $0xec] sm:$0xf0] }
  0xd6   :  { %1610 = vmatpush.bf16.msrb.mxu2 %v4368_v28  ;;  %v1336_v63 = vpop.f32.mrf.mxu2  ;;  %v4827_v28 = vld [vmem:[#allocation8 + $0x1e0] sm:$0xf] }
  0xd7   :  { %1624 = vmatpush.bf16.msrb.mxu3 %v4496_v32  ;;  %v1337_v21 = vadd.f32 %v1336_v63, %v1323_v17  ;;  %v4700_v32 = vor.u32 %v5455_v27, %v4699_v26  ;;  %v4828_v34 = vor.u32 %v5487_v33, %v4827_v28 }
  0xd9   :  { %1583 = vmatpush.bf16.msrb.mxu0 %v4096_v40  ;;  %1597 = vmatpush.bf16.msrb.mxu1 %v4224_v41  ;;  %v1351_v38 = vadd.f32 %v1350_v57, %v1337_v21  ;;  %v4683_v41 = vld [vmem:[#allocation8 + $0xc0] sm:$0xf]  ;;  %v4796_v57 = vor.u32 %v5479_v61, %v4795_v56 }
  0xda   :  { %1611 = vmatpush.bf16.msrb.mxu2 %v4352_v42  ;;  %v5451_v42 = vld [vmem:[#allocation8 + $0xcc] sm:$0xf0] }
  0xdb   :  { %1625 = vmatpush.bf16.msrb.mxu3 %v4480_v46  ;;  %v4684_v46 = vor.u32 %v5451_v42, %v4683_v41  ;;  %v4747_v41 = vld [vmem:[#allocation8 + $0x140] sm:$0xf]  ;;  %v5467_v42 = vld [vmem:[#allocation8 + $0x14c] sm:$0xf0] }
  0xdd   :  { %1584 = vmatpush.bf16.msrb.mxu0 %v4080_v52  ;;  %1598 = vmatpush.bf16.msrb.mxu1 %v4208_v53  ;;  %v1362_v0 = vpop.f32.mrf.mxu0  ;;  %v1376_v6 = vpop.f32.mrf.mxu1 }
  0xde   :  { %1612 = vmatpush.bf16.msrb.mxu2 %v4336_v54  ;;  %v4667_v54 = vld [vmem:[#allocation8 + $0xa0] sm:$0xf] }
  0xdf   :  { %1626 = vmatpush.bf16.msrb.mxu3 %v4464_v55  ;;  %v5447_v55 = vld [vmem:[#allocation8 + $0xac] sm:$0xf0] }
  0xe0   :  { %1585 = vmatmul.bf16.vlgmr.msrb.gmra.mxu0 %v5894_v22  ;;  %1599 = vmatmul.bf16.vlgmr.msrb.gmra.mxu1 %v5896_v23  ;;  %v330_v23 = vperm.slane %v5924_v1, 1  ;;  %v4668_v63 = vor.u32 %v5447_v55, %v4667_v54  ;;  %v5431_v54 = vld [vmem:[#allocation8 + $0x2c] sm:$0xf0]  ;;  %v4731_v55 = vld [vmem:[#allocation8 + $0x120] sm:$0xf] }
  0xe1   :  { %1613 = vmatmul.bf16.vlgmr.msrb.gmra.mxu2 %v5900_v35  ;;  %2827 = vmatpush.bf16.msra.mxu0 %v4700_v32 }
  0xe2   :  { %1627 = vmatmul.bf16.vlgmr.msrb.gmra.mxu3 %v5902_v39  ;;  %v1321_v39 = vadd.f32 %v1320_v58, %v1307_v4  ;;  %2841 = vmatpush.bf16.msra.mxu1 %v4828_v34 }
  0xe4   :  { %v1335_v10 = vadd.f32 %v1334_v59, %v1321_v39 }
  0xe5   :  { %v1404_v22 = vpop.f32.mrf.mxu3  ;;  %v1364_v35 = vpop.f32.mrf.mxu0  ;;  %2828 = vmatpush.bf16.msra.mxu0 %v4684_v46 }
  0xe6   :  { %v1390_v3 = vpop.f32.mrf.mxu2  ;;  %v1378_v7 = vpop.f32.mrf.mxu1  ;;  %v1349_v15 = vadd.f32 %v1348_v60, %v1335_v10  ;;  %v1365_v51 = vadd.f32 %v1364_v35, %v1351_v38  ;;  %2842 = vmatpush.bf16.msra.mxu1 %v4812_v48 }
  0xe7   :  { %v1391_v5 = vadd.f32 %v1390_v3, %v330_v23  ;;  %v4651_v3 = vld [vmem:[#allocation8 + $0x80] sm:$0xf] }
  0xe8   :  { %v1363_v20 = vadd.f32 %v1362_v0, %v1349_v15  ;;  %v4763_v15 = vld [vmem:[#allocation8 + $0x160] sm:$0xf] }
  0xe9   :  { %v1405_v8 = vadd.f32 %v1404_v22, %v1391_v5  ;;  %2829 = vmatpush.bf16.msra.mxu0 %v4668_v63  ;;  %v5443_v22 = vld [vmem:[#allocation8 + $0x8c] sm:$0xf0] }
  0xea   :  { %v1377_v36 = vadd.f32 %v1376_v6, %v1363_v20  ;;  %v1379_v6 = vadd.f32 %v1378_v7, %v1365_v51  ;;  %2843 = vmatpush.bf16.msra.mxu1 %v4796_v57  ;;  %v5475_v5 = vld [vmem:[#allocation8 + $0x18c] sm:$0xf0] }
  0xeb   :  { %v5463_v57 = vld [vmem:[#allocation8 + $0x12c] sm:$0xf0] }
  0xed   :  { %v1406_v11 = vpop.f32.mrf.mxu3 }
  0xee   :  { %v1392_v9 = vpop.f32.mrf.mxu2 }
  0xef   :  { %v1393_v18 = vadd.f32 %v1392_v9, %v330_v23  ;;  %v4779_v23 = vld [vmem:[#allocation8 + $0x180] sm:$0xf] }
  0xf0   :  { %v4780_v9 = vor.u32 %v5475_v5, %v4779_v23 }
  0xf1   :  { %v1407_v24 = vadd.f32 %v1406_v11, %v1393_v18 }
  0xf2   :  { %2844 = vmatpush.bf16.msra.mxu1 %v4780_v9 }
  0xfd   :  { %v1418_v13 = vpop.f32.mrf.mxu0  ;;  %v1432_v16 = vpop.f32.mrf.mxu1 }
  0xfe   :  { %v1419_v14 = vadd.f32 %v1418_v13, %v1405_v8  ;;  %v4652_v8 = vor.u32 %v5443_v22, %v4651_v3  ;;  %v4635_v13 = vld [vmem:[#allocation8 + $0x60] sm:$0xf]  ;;  %v4732_v3 = vor.u32 %v5463_v57, %v4731_v55  ;;  %v5459_v55 = vld [vmem:[#allocation8 + $0x10c] sm:$0xf0] }
 0x100   :  { %v1433_v19 = vadd.f32 %v1432_v16, %v1419_v14  ;;  %2830 = vmatpush.bf16.msra.mxu0 %v4652_v8  ;;  %v5439_v14 = vld [vmem:[#allocation8 + $0x6c] sm:$0xf0] }
 0x101   :  { %v4636_v18 = vor.u32 %v5439_v14, %v4635_v13 }
 0x104   :  { %2831 = vmatpush.bf16.msra.mxu0 %v4636_v18 }
 0x105   :  { %v1420_v30 = vpop.f32.mrf.mxu0  ;;  %v1460_v31 = vpop.f32.mrf.mxu3 }
 0x106   :  { %v1446_v25 = vpop.f32.mrf.mxu2  ;;  %v1421_v40 = vadd.f32 %v1420_v30, %v1407_v24  ;;  %v1434_v45 = vpop.f32.mrf.mxu1  ;;  %v4619_v30 = vld [vmem:[#allocation8 + $0x40] sm:$0xf] }
 0x107   :  { %v1447_v29 = vadd.f32 %v1446_v25, %v1433_v19  ;;  %v5471_v19 = vld [vmem:[#allocation8 + $0x16c] sm:$0xf0] }
 0x108   :  { %v1435_v52 = vadd.f32 %v1434_v45, %v1421_v40  ;;  %v4764_v27 = vor.u32 %v5471_v19, %v4763_v15  ;;  %v4587_v19 = vld [vmem:[#allocation8] sm:$0xf] }
 0x109   :  { %v1461_v37 = vadd.f32 %v1460_v31, %v1447_v29  ;;  %v5435_v31 = vld [vmem:[#allocation8 + $0x4c] sm:$0xf0] }
 0x10a   :  { %2845 = vmatpush.bf16.msra.mxu1 %v4764_v27 }
 0x10b   :  { %v5928_v44 = vpack.c.bf16 %v1461_v37, %v1377_v36  ;;  %v4620_v36 = vor.u32 %v5435_v31, %v4619_v30 }
 0x10d   :  { %v1637_v49 = vunpack.c.l.bf16 %v5928_v44  ;;  %v1638_v50 = vunpack.c.h.bf16 %v5928_v44  ;;  %v1462_v60 = vpop.f32.mrf.mxu3  ;;  %2832 = vmatpush.bf16.msra.mxu0 %v4620_v36 }
 0x10e   :  { %v1448_v53 = vpop.f32.mrf.mxu2 }
 0x10f   :  { %v1657_v58 = vmul.f32 0.70703125, %v1637_v49  ;;  %v1658_v59 = vmul.f32 0.70703125, %v1638_v50  ;;  %v1449_v62 = vadd.f32 %v1448_v53, %v1435_v52  ;;  %v4748_v52 = vor.u32 %v5467_v42, %v4747_v41  ;;  %v4603_v53 = vld [vmem:[#allocation8 + $0x20] sm:$0xf] }
 0x111   :  { %v1665_v0 = vpack.c.bf16 %v1658_v59, %v1657_v58  ;;  %v1463_v2 = vadd.f32 %v1462_v60, %v1449_v62  ;;  %v4604_v60 = vor.u32 %v5431_v54, %v4603_v53  ;;  %2846 = vmatpush.bf16.msra.mxu1 %v4748_v52  ;;  %v4715_v54 = vld [vmem:[#allocation8 + $0x100] sm:$0xf] }
 0x113   :  { %v5936_v4 = vunpack.c.l.bf16 %v1665_v0  ;;  %v5938_v35 = vunpack.c.h.bf16 %v1665_v0  ;;  %v5940_v39 = vpack.c.bf16 %v1463_v2, %v1379_v6  ;;  %2833 = vmatpush.bf16.msra.mxu0 %v4604_v60  ;;  %v5453_v60 = vld [vmem:[#allocation8 + $0xe4] sm:$0xf] }
 0x115   :  { %v1677_v10 = vmul.f32 %v5936_v4, %v5936_v4  ;;  %v1717_v7 = vmul.f32 %v5938_v35, %v5938_v35  ;;  %v1641_v11 = vunpack.c.l.bf16 %v5940_v39  ;;  %v1642_v12 = vunpack.c.h.bf16 %v5940_v39  ;;  %2847 = vmatpush.bf16.msra.mxu1 %v4732_v3 }
 0x117   :  { %v5948_v16 = vmin.f32 %v1677_v10, 16.0  ;;  %v5950_v17 = vmin.f32 %v1717_v7, 16.0  ;;  %v1661_v20 = vmul.f32 0.70703125, %v1641_v11  ;;  %v1662_v21 = vmul.f32 0.70703125, %v1642_v12 }
 0x119   :  { %v1679_v24 = vmul.f32 2.1237322e-06, %v5948_v16  ;;  %v1690_v25 = vmul.f32 3.8918573e-05, %v5948_v16  ;;  %v1719_v26 = vmul.f32 2.1237322e-06, %v5950_v17  ;;  %v1667_v29 = vpack.c.bf16 %v1662_v21, %v1661_v20 }
 0x11a   :  { %v1730_v28 = vmul.f32 3.8918573e-05, %v5950_v17  ;;  %v5427_v20 = vld [vmem:[#allocation8 + $0xc] sm:$0xf0] }
 0x11b   :  { %v1680_v32 = vadd.f32 0.00028619796, %v1679_v24  ;;  %v1691_v33 = vadd.f32 0.001143296, %v1690_v25  ;;  %v1720_v34 = vadd.f32 0.00028619796, %v1719_v26  ;;  %v5960_v38 = vunpack.c.l.bf16 %v1667_v29 }
 0x11c   :  { %v1731_v37 = vadd.f32 0.001143296, %v1730_v28  ;;  %v5962_v40 = vunpack.c.h.bf16 %v1667_v29  ;;  %v4588_v31 = vor.u32 %v5427_v20, %v4587_v19 }
 0x11d   :  { %v1681_v43 = vmul.f32 %v1680_v32, %v5948_v16  ;;  %v1692_v45 = vmul.f32 %v1691_v33, %v5948_v16  ;;  %v1721_v46 = vmul.f32 %v1720_v34, %v5950_v17  ;;  %v1837_v48 = vmul.f32 %v5960_v38, %v5960_v38 }
 0x11e   :  { %v1732_v47 = vmul.f32 %v1731_v37, %v5950_v17  ;;  %v1877_v51 = vmul.f32 %v5962_v40, %v5962_v40  ;;  %2834 = vmatpush.bf16.msra.mxu0 %v4588_v31 }
 0x11f   :  { %v1682_v56 = vadd.f32 0.0036580483, %v1681_v43  ;;  %v1693_v58 = vadd.f32 0.014752088, %v1692_v45  ;;  %v1722_v59 = vadd.f32 0.0036580483, %v1721_v46 }
 0x120   :  { %v1733_v61 = vadd.f32 0.014752088, %v1732_v47  ;;  %v5972_v62 = vmin.f32 %v1837_v48, 16.0  ;;  %v5974_v63 = vmin.f32 %v1877_v51, 16.0 }
 0x121   :  { %v1683_v0 = vmul.f32 %v1682_v56, %v5948_v16  ;;  %v1694_v6 = vmul.f32 %v1693_v58, %v5948_v16  ;;  %v1723_v2 = vmul.f32 %v1722_v59, %v5950_v17 }
 0x122   :  { %v1734_v22 = vmul.f32 %v1733_v61, %v5950_v17  ;;  %v1839_v23 = vmul.f32 2.1237322e-06, %v5972_v62  ;;  %v1850_v5 = vmul.f32 3.8918573e-05, %v5972_v62  ;;  %v1879_v10 = vmul.f32 2.1237322e-06, %v5974_v63 }
 0x123   :  { %v1684_v8 = vadd.f32 0.05243302, %v1683_v0  ;;  %v1695_v9 = vadd.f32 0.112945676, %v1694_v6  ;;  %v1724_v18 = vadd.f32 0.05243302, %v1723_v2 }
 0x124   :  { %v1735_v7 = vadd.f32 0.112945676, %v1734_v22  ;;  %v1840_v13 = vadd.f32 0.00028619796, %v1839_v23  ;;  %v1851_v14 = vadd.f32 0.001143296, %v1850_v5  ;;  %v6006_v22 = vpop.f32.mrf.mxu0  ;;  %v4716_v23 = vor.u32 %v5459_v55, %v4715_v54 }
 0x125   :  { %v1696_v15 = vmul.f32 %v1695_v9, %v5948_v16  ;;  %v1890_v26 = vmul.f32 3.8918573e-05, %v5974_v63  ;;  %v1685_v28 = vmul.f32 %v1684_v8, %v5948_v16  ;;  %v1725_v33 = vmul.f32 %v1724_v18, %v5950_v17  ;;  %v4701_v61 = vld [vmem:[#allocation8 + $0xf0] sm:$0xf0]  ;;  %v5469_v54 = vld [vmem:[#allocation8 + $0x164] sm:$0xf] }
 0x126   :  { %v1736_v21 = vmul.f32 %v1735_v7, %v5950_v17  ;;  %v1841_v24 = vmul.f32 %v1840_v13, %v5972_v62  ;;  %v1852_v25 = vmul.f32 %v1851_v14, %v5972_v62  ;;  %v1880_v34 = vadd.f32 0.00028619796, %v1879_v10  ;;  %2848 = vmatpush.bf16.msra.mxu1 %v4716_v23  ;;  %v4765_v55 = vld [vmem:[#allocation8 + $0x170] sm:$0xf0] }
 0x127   :  { %v1697_v27 = vadd.f32 0.4994258, %v1696_v15  ;;  %v1891_v42 = vadd.f32 0.001143296, %v1890_v26  ;;  %v1686_v45 = vadd.f32 0.18741608, %v1685_v28  ;;  %v4704_v8 = vor.u32 %v5453_v60, %v4701_v61 }
 0x128   :  { %v1737_v29 = vadd.f32 0.4994258, %v1736_v21  ;;  %v1853_v30 = vadd.f32 0.014752088, %v1852_v25  ;;  %v1842_v37 = vadd.f32 0.0036580483, %v1841_v24  ;;  %v1881_v52 = vmul.f32 %v1880_v34, %v5974_v63  ;;  %v6016_v21 = vpop.f32.mrf.mxu1 }
 0x129   :  { %v1698_v32 = vmul.f32 %v1697_v27, %v5948_v16  ;;  %v1892_v48 = vmul.f32 %v1891_v42, %v5974_v63  ;;  %v1726_v51 = vadd.f32 0.18741608, %v1725_v33  ;;  %v1687_v56 = vmul.f32 %v1686_v45, %v5948_v16  ;;  %2883 = vmatpush.bf16.msrb.mxu0 %v4704_v8  ;;  %v5485_v24 = vld [vmem:[#allocation8 + $0x1e4] sm:$0xf]  ;;  %v4685_v33 = vld [vmem:[#allocation8 + $0xd0] sm:$0xf0] }
 0x12a   :  { %v1738_v36 = vmul.f32 %v1737_v29, %v5950_v17  ;;  %v1854_v41 = vmul.f32 %v1853_v30, %v5972_v62  ;;  %v1843_v53 = vmul.f32 %v1842_v37, %v5972_v62  ;;  %v1882_v0 = vadd.f32 0.0036580483, %v1881_v52  ;;  %v4829_v29 = vld [vmem:[#allocation8 + $0x1f0] sm:$0xf0]  ;;  %v5481_v42 = vld [vmem:[#allocation8 + $0x1c4] sm:$0xf] }
 0x12b   :  { %v5993_v43 = vadd.f32 1.0, %v1698_v32  ;;  %v1893_v59 = vadd.f32 0.014752088, %v1892_v48  ;;  %v1727_v57 = vmul.f32 %v1726_v51, %v5950_v17  ;;  %v1688_v10 = vadd.f32 1.1283791, %v1687_v56  ;;  %v6026_v51 = vpop.f32.mrf.mxu3 }
 0x12c   :  { %v5995_v46 = vadd.f32 1.0, %v1738_v36  ;;  %v1855_v47 = vadd.f32 0.112945676, %v1854_v41  ;;  %v1844_v6 = vadd.f32 0.05243302, %v1843_v53  ;;  %v1883_v14 = vmul.f32 %v1882_v0, %v5974_v63  ;;  %v6024_v41 = vpop.f32.mrf.mxu2  ;;  %v6044_v61 = vpop.f32.mrf.mxu0 }
 0x12d   :  { %5604 = vrcp.f32 %v5993_v43  ;;  %v1894_v3 = vmul.f32 %v1893_v59, %v5974_v63  ;;  %v1728_v13 = vadd.f32 1.1283791, %v1727_v57  ;;  %vm1705_vm0 = vweird.f32 %v5993_v43  ;;  %v5449_v32 = vld [vmem:[#allocation8 + $0xc4] sm:$0xf]  ;;  %v4813_v53 = vld [vmem:[#allocation8 + $0x1d0] sm:$0xf0] }
 0x12e   :  { %5606 = vrcp.f32 %v5995_v46  ;;  %v1856_v58 = vmul.f32 %v1855_v47, %v5972_v62  ;;  %v1845_v19 = vmul.f32 %v1844_v6, %v5972_v62  ;;  %v1709_v25 = vand.u32 2147483647, %v5993_v43 }
 0x12f   :  { %v1895_v15 = vadd.f32 0.112945676, %v1894_v3  ;;  %v1711_v26 = vand.u32 2147483648, %v5993_v43  ;;  %v1751_v31 = vand.u32 2147483648, %v5995_v46  ;;  %v1749_v36 = vand.u32 2147483647, %v5995_v46 }
 0x130   :  { %v1857_v2 = vadd.f32 0.4994258, %v1856_v58  ;;  %v1846_v47 = vadd.f32 0.18741608, %v1845_v19  ;;  %v1884_v48 = vadd.f32 0.05243302, %v1883_v14  ;;  %v4832_v52 = vor.u32 %v5485_v24, %v4829_v29  ;;  %v6059_v19 = vpop.f32.mrf.mxu1 }
 0x131   :  { %v1896_v28 = vmul.f32 %v1895_v15, %v5974_v63  ;;  %vm6035_vm4 = vcmp.eq.f32.partialorder %v1709_v25, 8.507059e+37  ;;  %vm1745_vm5 = vweird.f32 %v5995_v46  ;;  %v1712_v60 = vor.u32 1.1754944e-38, %v1711_v26  ;;  %v5477_v15 = vld [vmem:[#allocation8 + $0x1a4] sm:$0xf]  ;;  %v4653_v24 = vld [vmem:[#allocation8 + $0x90] sm:$0xf0] }
 0x132   :  { %v1858_v7 = vmul.f32 %v1857_v2, %v5972_v62  ;;  %2897 = vmatpush.bf16.msrb.mxu1 %v4832_v52  ;;  %v4688_v57 = vor.u32 %v5449_v32, %v4685_v33  ;;  %vm1750_vm7 = vcmp.eq.f32.partialorder %v1749_v36, 8.507059e+37  ;;  %v4816_v2 = vor.u32 %v5481_v42, %v4813_v53  ;;  %v5473_v29 = vld [vmem:[#allocation8 + $0x184] sm:$0xf] }
 0x133   :  { %v5605_v5 = vpop.eup %5604  ;;  %v1897_v37 = vadd.f32 0.4994258, %v1896_v28  ;;  %v1885_v8 = vmul.f32 %v1884_v48, %v5974_v63  ;;  %v6067_v36 = vpop.f32.mrf.mxu3  ;;  %v5437_v42 = vld [vmem:[#allocation8 + $0x64] sm:$0xf] }
 0x134   :  { %v5607_v9 = vpop.eup %5606  ;;  %v1701_v16 = vmul.f32 %v5605_v5, %v5993_v43  ;;  %v6014_v20 = vadd.f32 1.0, %v1858_v7  ;;  %vm1706_vm1 = vweird.f32 %v5605_v5  ;;  %v1752_v43 = vor.u32 1.1754944e-38, %v1751_v31  ;;  %2884 = vmatpush.bf16.msrb.mxu0 %v4688_v57  ;;  %v4669_v7 = vld [vmem:[#allocation8 + $0xb0] sm:$0xf0]  ;;  %v6064_v32 = vpop.f32.mrf.mxu2 }
 0x135   :  { %v1741_v17 = vmul.f32 %v5607_v9, %v5995_v46  ;;  %vm1746_vm2 = vweird.f32 %v5607_v9  ;;  %vm6031_vm3 = vmor %vm1705_vm0, %vm1706_vm1  ;;  %v1898_v58 = vmul.f32 %v1897_v37, %v5974_v63 }
 0x136   :  { %v1702_v18 = vsub.f32 1.0, %v1701_v16  ;;  %5608 = vrcp.f32 %v6014_v20  ;;  %vm1747_vm6 = vmor %vm1745_vm5, %vm1746_vm2  ;;  %v5445_v16 = vld [vmem:[#allocation8 + $0xa4] sm:$0xf]  ;;  %2898 = vmatpush.bf16.msrb.mxu1 %v4816_v2  ;;  %v1871_v31 = vand.u32 2147483648, %v6014_v20  ;;  %vm1865_vm9 = vweird.f32 %v6014_v20 }
 0x137   :  { %v1742_v27 = vsub.f32 1.0, %v1741_v17  ;;  %v6046_v6 = vadd.f32 1.0, %v1898_v58  ;;  %v1689_v17 = vmul.f32 %v1688_v10, %v5936_v4  ;;  %v4672_v28 = vor.u32 %v5445_v16, %v4669_v7  ;;  %v4781_v4 = vld [vmem:[#allocation8 + $0x190] sm:$0xf0] }
 0x138   :  { %v1703_v30 = vmul.f32 %v5605_v5, %v1702_v18  ;;  %v4797_v18 = vld [vmem:[#allocation8 + $0x1b0] sm:$0xf0]  ;;  %v4784_v37 = vor.u32 %v5473_v29, %v4781_v4  ;;  %v1872_v57 = vor.u32 1.1754944e-38, %v1871_v31 }
 0x139   :  { %v1743_v34 = vmul.f32 %v5607_v9, %v1742_v27  ;;  %5610 = vrcp.f32 %v6046_v6  ;;  %2885 = vmatpush.bf16.msrb.mxu0 %v4672_v28  ;;  %v1911_v7 = vand.u32 2147483648, %v6046_v6  ;;  %vm1905_vm13 = vweird.f32 %v6046_v6 }
 0x13a   :  { %v1704_v45 = vadd.f32 %v5605_v5, %v1703_v30 }
 0x13b   :  { %v1744_v56 = vadd.f32 %v5607_v9, %v1743_v34  ;;  %v1869_v34 = vand.u32 2147483647, %v6014_v20  ;;  %v1912_v28 = vor.u32 1.1754944e-38, %v1911_v7 }
 0x13c   :  { %v1708_v59 = vsel %vm6031_vm3, %v5605_v5, %v1704_v45  ;;  %v6048_v3 = vpop.eup %5608  ;;  %v1847_v5 = vmul.f32 %v1846_v47, %v5972_v62  ;;  %v5441_v62 = vld [vmem:[#allocation8 + $0x84] sm:$0xf]  ;;  %v4637_v45 = vld [vmem:[#allocation8 + $0x70] sm:$0xf0] }
 0x13d   :  { %v1748_v0 = vsel %vm1747_vm6, %v5607_v9, %v1744_v56  ;;  %v1713_v46 = vsel %vm6035_vm4, %v1712_v60, %v1708_v59  ;;  %v1729_v9 = vmul.f32 %v1728_v13, %v5938_v35  ;;  %v1861_v14 = vmul.f32 %v6048_v3, %v6014_v20  ;;  %v6079_v60 = vpop.f32.mrf.mxu0  ;;  %v5457_v56 = vld [vmem:[#allocation8 + $0x104] sm:$0xf] }
 0x13e   :  { %v1753_v23 = vsel %vm1750_vm7, %v1752_v43, %v1748_v0  ;;  %v1714_v25 = vmul.f32 %v1713_v46, %v1689_v17  ;;  %v1848_v10 = vadd.f32 1.1283791, %v1847_v5  ;;  %v1886_v35 = vadd.f32 0.18741608, %v1885_v8  ;;  %v4621_v5 = vld [vmem:[#allocation8 + $0x50] sm:$0xf0] }
 0x13f   :  { %v1754_v26 = vmul.f32 %v1753_v23, %v1729_v9  ;;  %v1862_v27 = vsub.f32 1.0, %v1861_v14  ;;  %v4800_v13 = vor.u32 %v5477_v15, %v4797_v18  ;;  %vm1866_vm8 = vweird.f32 %v6048_v3  ;;  %v5611_v47 = vpop.eup %5610  ;;  %v5433_v23 = vld [vmem:[#allocation8 + $0x44] sm:$0xf]  ;;  %v4749_v9 = vld [vmem:[#allocation8 + $0x150] sm:$0xf0]  ;;  %v6088_v18 = vpop.f32.mrf.mxu1 }
 0x140   :  { %v4656_v33 = vor.u32 %v5441_v62, %v4653_v24  ;;  %v4577_v48 = vclamps-f32 %v1714_v25, 1.0  ;;  %vm6073_vm10 = vmor %vm1865_vm9, %vm1866_vm8  ;;  %v1887_v58 = vmul.f32 %v1886_v35, %v5974_v63  ;;  %v1901_v59 = vmul.f32 %v5611_v47, %v6046_v6  ;;  %v5465_v17 = vld [vmem:[#allocation8 + $0x144] sm:$0xf]  ;;  %v4733_v35 = vld [vmem:[#allocation8 + $0x130] sm:$0xf0] }
 0x141   :  { %v1863_v30 = vmul.f32 %v6048_v3, %v1862_v27  ;;  %2899 = vmatpush.bf16.msrb.mxu1 %v4800_v13  ;;  %v4578_v52 = vclamps-f32 %v1754_v26, 1.0  ;;  %v331_v20 = vperm.slane %v5924_v1, 2  ;;  %v4640_v0 = vor.u32 %v5437_v42, %v4637_v45  ;;  %v5429_v26 = vld [vmem:[#allocation8 + $0x24] sm:$0xf]  ;;  %v4605_v27 = vld [vmem:[#allocation8 + $0x30] sm:$0xf0] }
 0x142   :  { %2886 = vmatpush.bf16.msrb.mxu0 %v4656_v33  ;;  %vm1870_vm11 = vcmp.eq.f32.partialorder %v1869_v34, 8.507059e+37  ;;  %v1902_v2 = vsub.f32 1.0, %v1901_v59  ;;  %v4768_v46 = vor.u32 %v5469_v54, %v4765_v55  ;;  %v1849_v8 = vmul.f32 %v1848_v10, %v5960_v38  ;;  %v5461_v10 = vld [vmem:[#allocation8 + $0x124] sm:$0xf]  ;;  %v4589_v54 = vld [vmem:[#allocation8 + $0x10] sm:$0xf0] }
 0x143   :  { %v1864_v53 = vadd.f32 %v6048_v3, %v1863_v30  ;;  %v1997_v63 = vpack.c.bf16 %v4578_v52, %v4577_v48  ;;  %vm1906_vm12 = vweird.f32 %v5611_v47  ;;  %v1909_v15 = vand.u32 2147483647, %v6046_v6 }
 0x144   :  { %v1903_v14 = vmul.f32 %v5611_v47, %v1902_v2  ;;  %v4624_v62 = vor.u32 %v5433_v23, %v4621_v5  ;;  %v4752_v38 = vor.u32 %v5465_v17, %v4749_v9  ;;  %vm1907_vm14 = vmor %vm1905_vm13, %vm1906_vm12  ;;  %v1475_v29 = vadd.f32 %v6006_v22, %v331_v20 }
 0x145   :  { %v1868_v43 = vsel %vm6073_vm10, %v6048_v3, %v1864_v53  ;;  %2900 = vmatpush.bf16.msrb.mxu1 %v4784_v37  ;;  %v1888_v3 = vadd.f32 1.1283791, %v1887_v58  ;;  %v2001_v13 = vunpack.c.l.bf16 %v1997_v63  ;;  %v2002_v30 = vunpack.c.h.bf16 %v1997_v63  ;;  %v1572_v6 = vpop.f32.mrf.mxu3  ;;  %v6095_v48 = vpop.f32.mrf.mxu0  ;;  %v5425_v53 = vld [vmem:[#allocation8 + $0x4] sm:$0xf] }
 0x146   :  { %v1873_v16 = vsel %vm1870_vm11, %v1872_v57, %v1868_v43  ;;  %2887 = vmatpush.bf16.msrb.mxu0 %v4640_v0  ;;  %v1904_v25 = vadd.f32 %v5611_v47, %v1903_v14  ;;  %v1558_v4 = vpop.f32.mrf.mxu2  ;;  %vm1910_vm15 = vcmp.eq.f32.partialorder %v1909_v15, 8.507059e+37  ;;  %v4608_v37 = vor.u32 %v5429_v26, %v4605_v27 }
 0x147   :  { %v1874_v24 = vmul.f32 %v1873_v16, %v1849_v8  ;;  %v1889_v31 = vmul.f32 %v1888_v3, %v5962_v40  ;;  %v332_v52 = vperm.slane %v5924_v1, 3  ;;  %v4736_v22 = vor.u32 %v5461_v10, %v4733_v35  ;;  %v4717_v40 = vld [vmem:[#allocation8 + $0x110] sm:$0xf0]  ;;  %v6107_v23 = vpop.f32.mrf.mxu1  ;;  %v5456_v10 = vld [vmem:[#allocation8 + $0xf4] sm:$0xf0] }
 0x148   :  { %v1908_v33 = vsel %vm1907_vm14, %v5611_v47, %v1904_v25  ;;  %v1489_v55 = vadd.f32 %v6016_v21, %v1475_v29  ;;  %v2009_v47 = vadd.f32 1.0, %v2001_v13  ;;  %v2010_v58 = vadd.f32 1.0, %v2002_v30  ;;  %v4835_v35 = vld [vmem:[#allocation8 + $0x1e8] sm:$0xf]  ;;  %v5488_v13 = vld [vmem:[#allocation8 + $0x1f4] sm:$0xf0] }
 0x149   :  { %2901 = vmatpush.bf16.msrb.mxu1 %v4768_v46  ;;  %v1913_v34 = vsel %vm1910_vm15, %v1912_v28, %v1908_v33  ;;  %v4581_v42 = vclamps-f32 %v1874_v24, 1.0  ;;  %v1645_v43 = vmul.f32 0.5, %v1637_v49  ;;  %v1646_v57 = vmul.f32 0.5, %v1638_v50 }
 0x14a   :  { %2888 = vmatpush.bf16.msrb.mxu0 %v4624_v62  ;;  %v1914_v45 = vmul.f32 %v1913_v34, %v1889_v31  ;;  %v1649_v0 = vmul.f32 0.5, %v1641_v11  ;;  %v4592_v2 = vor.u32 %v5425_v53, %v4589_v54  ;;  %v1650_v46 = vmul.f32 0.5, %v1642_v12  ;;  %v4819_v54 = vld [vmem:[#allocation8 + $0x1c8] sm:$0xf] }
 0x14b   :  { %v1559_v5 = vadd.f32 %v1558_v4, %v332_v52  ;;  %v4720_v63 = vor.u32 %v5457_v56, %v4717_v40  ;;  %v1477_v49 = vadd.f32 %v6044_v61, %v331_v20  ;;  %v1503_v44 = vadd.f32 %v6024_v41, %v1489_v55  ;;  %v4955_v56 = vld [vmem:[#allocation8 + $0x2e0] sm:$0xf]  ;;  %v5519_v40 = vld [vmem:[#allocation8 + $0x2ec] sm:$0xf0] }
 0x14c   :  { %v4582_v59 = vclamps-f32 %v1914_v45, 1.0  ;;  %v2017_v50 = vpack.c.bf16 %v2010_v58, %v2009_v47  ;;  %v1653_v16 = vpack.c.bf16 %v1646_v57, %v1645_v43  ;;  %v1655_v39 = vpack.c.bf16 %v1650_v46, %v1649_v0  ;;  %v5452_v45 = vld [vmem:[#allocation8 + $0xd4] sm:$0xf0]  ;;  %v5083_v43 = vld [vmem:[#allocation8 + $0x3e0] sm:$0xf] }
 0x14d   :  { %2902 = vmatpush.bf16.msrb.mxu1 %v4752_v38  ;;  %v1573_v12 = vadd.f32 %v1572_v6, %v1559_v5  ;;  %v1574_v17 = vpop.f32.mrf.mxu3  ;;  %v1491_v15 = vadd.f32 %v6059_v19, %v1477_v49  ;;  %v1517_v1 = vadd.f32 %v6026_v51, %v1503_v44  ;;  %v4707_v38 = vld [vmem:[#allocation8 + $0xe8] sm:$0xf]  ;;  %v4836_v53 = vor.u32 %v5488_v13, %v4835_v35  ;;  %v5551_v57 = vld [vmem:[#allocation8 + $0x3ec] sm:$0xf0]  ;;  %v5448_v44 = vld [vmem:[#allocation8 + $0xb4] sm:$0xf0] }
 0x14e   :  { %2889 = vmatpush.bf16.msrb.mxu0 %v4608_v37  ;;  %v1999_v21 = vpack.c.bf16 %v4582_v59, %v4581_v42  ;;  %v1560_v7 = vpop.f32.mrf.mxu2  ;;  %v2029_v61 = vunpack.c.l.bf16 %v2017_v50  ;;  %v2030_v62 = vunpack.c.h.bf16 %v2017_v50  ;;  %v2021_v24 = vunpack.c.l.bf16 %v1653_v16  ;;  %v4691_v42 = vld [vmem:[#allocation8 + $0xc8] sm:$0xf]  ;;  %v5543_v35 = vld [vmem:[#allocation8 + $0x3ac] sm:$0xf0] }
 0x14f   :  { %v2022_v25 = vunpack.c.h.bf16 %v1653_v16  ;;  %v2025_v26 = vunpack.c.l.bf16 %v1655_v39  ;;  %v2026_v27 = vunpack.c.h.bf16 %v1655_v39  ;;  %v1531_v30 = vadd.f32 %v6079_v60, %v1517_v1  ;;  %v5484_v60 = vld [vmem:[#allocation8 + $0x1d4] sm:$0xf0]  ;;  %v4675_v49 = vld [vmem:[#allocation8 + $0xa8] sm:$0xf]  ;;  %v4939_v16 = vld [vmem:[#allocation8 + $0x2c0] sm:$0xf] }
 0x150   :  { %v2005_v8 = vunpack.c.l.bf16 %v1999_v21  ;;  %v2006_v11 = vunpack.c.h.bf16 %v1999_v21  ;;  %v1505_v19 = vadd.f32 %v6064_v32, %v1491_v15  ;;  %v1561_v51 = vadd.f32 %v1560_v7, %v332_v52  ;;  %v5515_v7 = vld [vmem:[#allocation8 + $0x2cc] sm:$0xf0]  ;;  %v5067_v39 = vld [vmem:[#allocation8 + $0x3c0] sm:$0xf] }
 0x151   :  { %2903 = vmatpush.bf16.msrb.mxu1 %v4736_v22  ;;  %v2037_v31 = vmul.f32 %v2029_v61, %v2021_v24  ;;  %v2038_v34 = vmul.f32 %v2030_v62, %v2022_v25  ;;  %v4708_v22 = vor.u32 %v5456_v10, %v4707_v38  ;;  %v5084_v46 = vor.u32 %v5551_v57, %v5083_v43  ;;  %v4787_v62 = vld [vmem:[#allocation8 + $0x188] sm:$0xf]  ;;  %v5476_v10 = vld [vmem:[#allocation8 + $0x194] sm:$0xf0] }
 0x152   :  { %2890 = vmatpush.bf16.msrb.mxu0 %v4592_v2  ;;  %v2013_v3 = vadd.f32 1.0, %v2005_v8  ;;  %v2014_v14 = vadd.f32 1.0, %v2006_v11  ;;  %v1575_v0 = vadd.f32 %v1574_v17, %v1561_v51  ;;  %v4956_v2 = vor.u32 %v5519_v40, %v4955_v56  ;;  %v5480_v17 = vld [vmem:[#allocation8 + $0x1b4] sm:$0xf0]  ;;  %v4771_v40 = vld [vmem:[#allocation8 + $0x168] sm:$0xf] }
 0x153   :  { %v1545_v21 = vadd.f32 %v6088_v18, %v1531_v30  ;;  %v1519_v5 = vadd.f32 %v6067_v36, %v1505_v19  ;;  %v4692_v50 = vor.u32 %v5452_v45, %v4691_v42  ;;  %v4820_v8 = vor.u32 %v5484_v60, %v4819_v54  ;;  %v4803_v18 = vld [vmem:[#allocation8 + $0x1a8] sm:$0xf]  ;;  %2869 = vmatpush.bf16.msra.mxu3 %v5084_v46  ;;  %v5035_v54 = vld [vmem:[#allocation8 + $0x380] sm:$0xf]  ;;  %v5472_v60 = vld [vmem:[#allocation8 + $0x174] sm:$0xf0] }
 0x154   :  { %v2019_v41 = vpack.c.bf16 %v2014_v14, %v2013_v3  ;;  %2855 = vmatpush.bf16.msra.mxu2 %v4956_v2  ;;  %v4940_v36 = vor.u32 %v5515_v7, %v4939_v16  ;;  %v4676_v25 = vor.u32 %v5448_v44, %v4675_v49  ;;  %v4804_v38 = vor.u32 %v5480_v17, %v4803_v18  ;;  %v4755_v46 = vld [vmem:[#allocation8 + $0x148] sm:$0xf]  ;;  %v4891_v16 = vld [vmem:[#allocation8 + $0x260] sm:$0xf]  ;;  %v5503_v7 = vld [vmem:[#allocation8 + $0x26c] sm:$0xf0] }
 0x155   :  { %2904 = vmatpush.bf16.msrb.mxu1 %v4720_v63  ;;  %v1533_v14 = vadd.f32 %v6095_v48, %v1519_v5  ;;  %v4788_v42 = vor.u32 %v5476_v10, %v4787_v62  ;;  %v6149_v5 = vld [vmem:[#allocation8 + $0x28] sm:$0xf]  ;;  %v6171_v62 = vld [vmem:[#allocation8 + $0x14] sm:$0xf0] }
 0x156   :  { %v2033_v29 = vunpack.c.l.bf16 %v2019_v41  ;;  %v2034_v4 = vunpack.c.h.bf16 %v2019_v41  ;;  %v5444_v41 = vld [vmem:[#allocation8 + $0x94] sm:$0xf0] }
 0x157   :  { %v1547_v51 = vadd.f32 %v6107_v23, %v1533_v14  ;;  %v5539_v23 = vld [vmem:[#allocation8 + $0x38c] sm:$0xf0]  ;;  %v6183_v10 = vld [vmem:[#allocation8 + $0x114] sm:$0xf0] }
 0x158   :  { %v2041_v6 = vmul.f32 %v2033_v29, %v2025_v26  ;;  %v2042_v37 = vmul.f32 %v2034_v4, %v2026_v27  ;;  %v4923_v27 = vld [vmem:[#allocation8 + $0x2a0] sm:$0xf]  ;;  %2856 = vmatpush.bf16.msra.mxu2 %v4940_v36  ;;  %v5036_v57 = vor.u32 %v5539_v23, %v5035_v54  ;;  %v6161_v36 = vld [vmem:[#allocation8 + $0x134] sm:$0xf0] }
 0x159   :  { %v5051_v29 = vld [vmem:[#allocation8 + $0x3a0] sm:$0xf] }
 0x15a   :  { %v6117_v47 = vpack.c.bf16 %v2041_v6, %v2037_v31  ;;  %v6119_v58 = vpack.c.bf16 %v2042_v37, %v2038_v34  ;;  %v5052_v19 = vor.u32 %v5543_v35, %v5051_v29  ;;  %v4643_v6 = vld [vmem:[#allocation8 + $0x68] sm:$0xf]  ;;  %v5440_v34 = vld [vmem:[#allocation8 + $0x74] sm:$0xf0]  ;;  %v5003_v54 = vld [vmem:[#allocation8 + $0x340] sm:$0xf] }
 0x15c   :  { %2835 = vmatmul.bf16.vlgmr.msra.gmra.mxu0 %v6117_v47  ;;  %2849 = vmatmul.bf16.vlgmr.msra.gmra.mxu1 %v6119_v58 }
 0x15d   :  { %v1586_v9 = vpop.f32.mrf.mxu0  ;;  %v1600_v28 = vpop.f32.mrf.mxu1  ;;  %2939 = vmatpush.bf16.msra.mxu0 %v4708_v22  ;;  %2953 = vmatpush.bf16.msra.mxu1 %v4836_v53  ;;  %v4907_v22 = vld [vmem:[#allocation8 + $0x280] sm:$0xf]  ;;  %v5507_v53 = vld [vmem:[#allocation8 + $0x28c] sm:$0xf0] }
 0x15e   :  { %v1587_v20 = vadd.f32 %v1586_v9, %v1573_v12  ;;  %v5547_v9 = vld [vmem:[#allocation8 + $0x3cc] sm:$0xf0]  ;;  %v4908_v43 = vor.u32 %v5507_v53, %v4907_v22 }
 0x15f   :  { %v5068_v3 = vor.u32 %v5547_v9, %v5067_v39  ;;  %v5019_v39 = vld [vmem:[#allocation8 + $0x360] sm:$0xf]  ;;  %v4892_v9 = vor.u32 %v5503_v7, %v4891_v16 }
 0x160   :  { %v1601_v33 = vadd.f32 %v1600_v28, %v1587_v20  ;;  %v4659_v20 = vld [vmem:[#allocation8 + $0x88] sm:$0xf]  ;;  %v5511_v28 = vld [vmem:[#allocation8 + $0x2ac] sm:$0xf0] }
 0x161   :  { %2940 = vmatpush.bf16.msra.mxu0 %v4692_v50  ;;  %2954 = vmatpush.bf16.msra.mxu1 %v4820_v8  ;;  %v4924_v30 = vor.u32 %v5511_v28, %v4923_v27  ;;  %v4660_v37 = vor.u32 %v5444_v41, %v4659_v20  ;;  %v4644_v50 = vor.u32 %v5440_v34, %v4643_v6  ;;  %v6169_v41 = vld [vmem:[#allocation8 + $0x8] sm:$0xf]  ;;  %v4875_v34 = vld [vmem:[#allocation8 + $0x240] sm:$0xf] }
 0x162   :  { %2870 = vmatpush.bf16.msra.mxu3 %v5068_v3  ;;  %v4772_v8 = vor.u32 %v5472_v60, %v4771_v40  ;;  %v5535_v3 = vld [vmem:[#allocation8 + $0x36c] sm:$0xf0]  ;;  %v4596_v6 = vor.u32 %v6171_v62, %v6169_v41  ;;  %v5450_v62 = vld [vmem:[#allocation8 + $0xcc] sm:$0xf] }
 0x163   :  { %2857 = vmatpush.bf16.msra.mxu2 %v4924_v30  ;;  %v5531_v40 = vld [vmem:[#allocation8 + $0x34c] sm:$0xf0] }
 0x164   :  { %v1614_v55 = vpop.f32.mrf.mxu2 }
 0x165   :  { %v1615_v32 = vadd.f32 %v1614_v55, %v1601_v33  ;;  %v1628_v52 = vpop.f32.mrf.mxu3  ;;  %v1588_v59 = vpop.f32.mrf.mxu0  ;;  %2941 = vmatpush.bf16.msra.mxu0 %v4676_v25  ;;  %2955 = vmatpush.bf16.msra.mxu1 %v4804_v38 }
 0x166   :  { %v1589_v11 = vadd.f32 %v1588_v59, %v1575_v0  ;;  %v1602_v61 = vpop.f32.mrf.mxu1  ;;  %2871 = vmatpush.bf16.msra.mxu3 %v5052_v19  ;;  %v6143_v59 = vld [vmem:[#allocation8 + $0x54] sm:$0xf0] }
 0x167   :  { %v1629_v63 = vadd.f32 %v1628_v52, %v1615_v32  ;;  %v6141_v52 = vld [vmem:[#allocation8 + $0x48] sm:$0xf]  ;;  %2858 = vmatpush.bf16.msra.mxu2 %v4908_v43  ;;  %v4709_v43 = vld [vmem:[#allocation8 + $0xf8] sm:$0xf0] }
 0x168   :  { %v1603_v24 = vadd.f32 %v1602_v61, %v1589_v11  ;;  %v6155_v11 = vld [vmem:[#allocation8 + $0x128] sm:$0xf]  ;;  %v4628_v20 = vor.u32 %v6143_v59, %v6141_v52  ;;  %v5454_v59 = vld [vmem:[#allocation8 + $0xec] sm:$0xf] }
 0x169   :  { %v6125_v12 = vpack.c.bf16 %v1629_v63, %v1545_v21  ;;  %v5468_v21 = vld [vmem:[#allocation8 + $0x154] sm:$0xf0]  ;;  %2942 = vmatpush.bf16.msra.mxu0 %v4660_v37  ;;  %2956 = vmatpush.bf16.msra.mxu1 %v4788_v42  ;;  %v4740_v19 = vor.u32 %v6161_v36, %v6155_v11  ;;  %v5499_v37 = vld [vmem:[#allocation8 + $0x24c] sm:$0xf0]  ;;  %v5004_v11 = vor.u32 %v5531_v40, %v5003_v54 }
 0x16a   :  { %v6151_v63 = vld [vmem:[#allocation8 + $0x34] sm:$0xf0]  ;;  %2872 = vmatpush.bf16.msra.mxu3 %v5036_v57  ;;  %v4756_v29 = vor.u32 %v5468_v21, %v4755_v46  ;;  %v5486_v57 = vld [vmem:[#allocation8 + $0x1ec] sm:$0xf]  ;;  %v4876_v21 = vor.u32 %v5499_v37, %v4875_v34  ;;  %v4712_v36 = vor.u32 %v5454_v59, %v4709_v43  ;;  %v4987_v34 = vld [vmem:[#allocation8 + $0x320] sm:$0xf] }
 0x16b   :  { %v1639_v15 = vunpack.c.l.bf16 %v6125_v12  ;;  %v1640_v1 = vunpack.c.h.bf16 %v6125_v12  ;;  %2859 = vmatpush.bf16.msra.mxu2 %v4892_v9  ;;  %v4859_v9 = vld [vmem:[#allocation8 + $0x220] sm:$0xf]  ;;  %v5478_v59 = vld [vmem:[#allocation8 + $0x1ac] sm:$0xf] }
 0x16c   :  { %v1616_v26 = vpop.f32.mrf.mxu2  ;;  %2891 = vmatmul.bf16.vlgmr.msrb.gmra.mxu0 %v6117_v47  ;;  %2905 = vmatmul.bf16.vlgmr.msrb.gmra.mxu1 %v6119_v58 }
 0x16d   :  { %v1659_v48 = vmul.f32 0.70703125, %v1639_v15  ;;  %v1660_v4 = vmul.f32 0.70703125, %v1640_v1  ;;  %v1617_v13 = vadd.f32 %v1616_v26, %v1603_v24  ;;  %v1630_v33 = vpop.f32.mrf.mxu3  ;;  %v5020_v26 = vor.u32 %v5535_v3, %v5019_v39  ;;  %2943 = vmatpush.bf16.msra.mxu0 %v4644_v50  ;;  %2957 = vmatpush.bf16.msra.mxu1 %v4772_v8  ;;  %v4837_v8 = vld [vmem:[#allocation8 + $0x1f8] sm:$0xf0]  ;;  %v5495_v3 = vld [vmem:[#allocation8 + $0x22c] sm:$0xf0] }
 0x16f   :  { %v1666_v31 = vpack.c.bf16 %v1660_v4, %v1659_v48  ;;  %v1631_v45 = vadd.f32 %v1630_v33, %v1617_v13  ;;  %v4612_v48 = vor.u32 %v6151_v63, %v6149_v5  ;;  %v6181_v4 = vld [vmem:[#allocation8 + $0x108] sm:$0xf]  ;;  %2873 = vmatpush.bf16.msra.mxu3 %v5020_v26  ;;  %2860 = vmatpush.bf16.msra.mxu2 %v4876_v21 }
 0x170   :  { %v4724_v53 = vor.u32 %v6183_v10, %v6181_v4 }
 0x171   :  { %v6135_v55 = vunpack.c.l.bf16 %v1666_v31  ;;  %v6137_v56 = vunpack.c.h.bf16 %v1666_v31  ;;  %v6139_v32 = vpack.c.bf16 %v1631_v45, %v1547_v51  ;;  %2944 = vmatpush.bf16.msra.mxu0 %v4628_v20  ;;  %2958 = vmatpush.bf16.msra.mxu1 %v4756_v29  ;;  %v4840_v29 = vor.u32 %v5486_v57, %v4837_v8 }
 0x173   :  { %v1757_v0 = vmul.f32 %v6135_v55, %v6135_v55  ;;  %v1797_v2 = vmul.f32 %v6137_v56, %v6137_v56  ;;  %v1643_v49 = vunpack.c.l.bf16 %v6139_v32  ;;  %v1644_v44 = vunpack.c.h.bf16 %v6139_v32  ;;  %2874 = vmatpush.bf16.msra.mxu3 %v5004_v11 }
 0x175   :  { %v6157_v18 = vmin.f32 %v1757_v0, 16.0  ;;  %v6159_v17 = vmin.f32 %v1797_v2, 16.0  ;;  %v1663_v14 = vmul.f32 0.70703125, %v1643_v49  ;;  %v1664_v61 = vmul.f32 0.70703125, %v1644_v44  ;;  %2945 = vmatpush.bf16.msra.mxu0 %v4612_v48  ;;  %2959 = vmatpush.bf16.msra.mxu1 %v4740_v19  ;;  %v5527_v48 = vld [vmem:[#allocation8 + $0x32c] sm:$0xf0] }
 0x177   :  { %v1759_v24 = vmul.f32 2.1237322e-06, %v6157_v18  ;;  %v1770_v25 = vmul.f32 3.8918573e-05, %v6157_v18  ;;  %v1799_v38 = vmul.f32 2.1237322e-06, %v6159_v17  ;;  %v1668_v28 = vpack.c.bf16 %v1664_v61, %v1663_v14 }
 0x178   :  { %v1810_v27 = vmul.f32 3.8918573e-05, %v6159_v17 }
 0x179   :  { %v1760_v35 = vadd.f32 0.00028619796, %v1759_v24  ;;  %v1771_v13 = vadd.f32 0.001143296, %v1770_v25  ;;  %v1800_v30 = vadd.f32 0.00028619796, %v1799_v38  ;;  %v6187_v31 = vunpack.c.l.bf16 %v1668_v28  ;;  %2946 = vmatpush.bf16.msra.mxu0 %v4596_v6  ;;  %2960 = vmatpush.bf16.msra.mxu1 %v4724_v53 }
 0x17a   :  { %v1811_v51 = vadd.f32 0.001143296, %v1810_v27  ;;  %v6189_v33 = vunpack.c.h.bf16 %v1668_v28  ;;  %v4693_v24 = vld [vmem:[#allocation8 + $0xd8] sm:$0xf0]  ;;  %v5482_v25 = vld [vmem:[#allocation8 + $0x1cc] sm:$0xf] }
 0x17b   :  { %v1761_v42 = vmul.f32 %v1760_v35, %v6157_v18  ;;  %v1772_v45 = vmul.f32 %v1771_v13, %v6157_v18  ;;  %v1801_v22 = vmul.f32 %v1800_v30, %v6159_v17  ;;  %v1917_v23 = vmul.f32 %v6187_v31, %v6187_v31  ;;  %v4821_v38 = vld [vmem:[#allocation8 + $0x1d8] sm:$0xf0] }
 0x17c   :  { %v1812_v60 = vmul.f32 %v1811_v51, %v6159_v17  ;;  %v1957_v52 = vmul.f32 %v6189_v33, %v6189_v33  ;;  %v4860_v13 = vor.u32 %v5495_v3, %v4859_v9  ;;  %2947 = vmatmul.bf16.vlgmr.msra.gmra.mxu0 %v6117_v47  ;;  %2961 = vmatmul.bf16.vlgmr.msra.gmra.mxu1 %v6119_v58 }
 0x17d   :  { %v1762_v0 = vadd.f32 0.0036580483, %v1761_v42  ;;  %v1773_v2 = vadd.f32 0.014752088, %v1772_v45  ;;  %v1802_v46 = vadd.f32 0.0036580483, %v1801_v22  ;;  %2995 = vmatpush.bf16.msrb.mxu0 %v4712_v36  ;;  %3009 = vmatpush.bf16.msrb.mxu1 %v4840_v29 }
 0x17e   :  { %v1813_v5 = vadd.f32 0.014752088, %v1812_v60  ;;  %v6203_v63 = vmin.f32 %v1917_v23, 16.0  ;;  %v6205_v50 = vmin.f32 %v1957_v52, 16.0  ;;  %v5446_v22 = vld [vmem:[#allocation8 + $0xac] sm:$0xf]  ;;  %v4696_v60 = vor.u32 %v5450_v62, %v4693_v24  ;;  %2861 = vmatpush.bf16.msra.mxu2 %v4860_v13 }
 0x17f   :  { %v1763_v16 = vmul.f32 %v1762_v0, %v6157_v18  ;;  %v1774_v7 = vmul.f32 %v1773_v2, %v6157_v18  ;;  %v1803_v39 = vmul.f32 %v1802_v46, %v6159_v17  ;;  %v4824_v23 = vor.u32 %v5482_v25, %v4821_v38  ;;  %v4677_v52 = vld [vmem:[#allocation8 + $0xb8] sm:$0xf0]  ;;  %v6232_v25 = vld [vmem:[#allocation8 + $0x6c] sm:$0xf] }
 0x180   :  { %v1814_v14 = vmul.f32 %v1813_v5, %v6159_v17  ;;  %v1919_v61 = vmul.f32 2.1237322e-06, %v6203_v63  ;;  %v1930_v20 = vmul.f32 3.8918573e-05, %v6203_v63  ;;  %v1959_v41 = vmul.f32 2.1237322e-06, %v6205_v50 }
 0x181   :  { %v1764_v26 = vadd.f32 0.05243302, %v1763_v16  ;;  %v1775_v27 = vadd.f32 0.112945676, %v1774_v7  ;;  %v1804_v28 = vadd.f32 0.05243302, %v1803_v39  ;;  %v4988_v46 = vor.u32 %v5527_v48, %v4987_v34  ;;  %2996 = vmatpush.bf16.msrb.mxu0 %v4696_v60  ;;  %3010 = vmatpush.bf16.msrb.mxu1 %v4824_v23 }
 0x182   :  { %v1815_v4 = vadd.f32 0.112945676, %v1814_v14  ;;  %v1920_v10 = vadd.f32 0.00028619796, %v1919_v61  ;;  %v1931_v35 = vadd.f32 0.001143296, %v1930_v20  ;;  %v4680_v3 = vor.u32 %v5446_v22, %v4677_v52 }
 0x183   :  { %v1765_v30 = vmul.f32 %v1764_v26, %v6157_v18  ;;  %v1776_v51 = vmul.f32 %v1775_v27, %v6157_v18  ;;  %v1960_v42 = vadd.f32 0.00028619796, %v1959_v41  ;;  %v1970_v45 = vmul.f32 3.8918573e-05, %v6205_v50  ;;  %v4805_v2 = vld [vmem:[#allocation8 + $0x1b8] sm:$0xf0]  ;;  %2875 = vmatpush.bf16.msra.mxu3 %v4988_v46 }
 0x184   :  { %v1816_v19 = vmul.f32 %v1815_v4, %v6159_v17  ;;  %v1932_v37 = vmul.f32 %v1931_v35, %v6203_v63  ;;  %v1805_v40 = vmul.f32 %v1804_v28, %v6159_v17  ;;  %v1921_v57 = vmul.f32 %v1920_v10, %v6203_v63  ;;  %v5442_v16 = vld [vmem:[#allocation8 + $0x8c] sm:$0xf]  ;;  %v4661_v7 = vld [vmem:[#allocation8 + $0x98] sm:$0xf0]  ;;  %v4843_v34 = vld [vmem:[#allocation8 + $0x200] sm:$0xf] }
 0x185   :  { %v1777_v54 = vadd.f32 0.4994258, %v1776_v51  ;;  %v1766_v21 = vadd.f32 0.18741608, %v1765_v30  ;;  %v1961_v8 = vmul.f32 %v1960_v42, %v6205_v50  ;;  %v1971_v11 = vadd.f32 0.001143296, %v1970_v45  ;;  %2997 = vmatpush.bf16.msrb.mxu0 %v4680_v3 }
 0x186   :  { %v1817_v43 = vadd.f32 0.4994258, %v1816_v19  ;;  %v1933_v0 = vadd.f32 0.014752088, %v1932_v37  ;;  %v5474_v39 = vld [vmem:[#allocation8 + $0x18c] sm:$0xf]  ;;  %v4808_v14 = vor.u32 %v5478_v59, %v4805_v2  ;;  %v4664_v30 = vor.u32 %v5442_v16, %v4661_v7 }
 0x187   :  { %v1778_v6 = vmul.f32 %v1777_v54, %v6157_v18  ;;  %v1806_v9 = vadd.f32 0.18741608, %v1805_v40  ;;  %v4789_v61 = vld [vmem:[#allocation8 + $0x198] sm:$0xf0]  ;;  %v1922_v41 = vadd.f32 0.0036580483, %v1921_v57  ;;  %v1972_v24 = vmul.f32 %v1971_v11, %v6205_v50 }
 0x188   :  { %v1818_v53 = vmul.f32 %v1817_v43, %v6159_v17  ;;  %v1934_v5 = vmul.f32 %v1933_v0, %v6203_v63  ;;  %v6234_v38 = vld [vmem:[#allocation8 + $0x78] sm:$0xf0]  ;;  %v1767_v26 = vmul.f32 %v1766_v21, %v6157_v18  ;;  %v5470_v27 = vld [vmem:[#allocation8 + $0x16c] sm:$0xf]  ;;  %v1962_v4 = vadd.f32 0.0036580483, %v1961_v8  ;;  %3011 = vmatpush.bf16.msrb.mxu1 %v4808_v14 }
 0x189   :  { %v6227_v36 = vadd.f32 1.0, %v1778_v6  ;;  %v4773_v28 = vld [vmem:[#allocation8 + $0x178] sm:$0xf0]  ;;  %v6238_v29 = vld [vmem:[#allocation8 + $0x4c] sm:$0xf]  ;;  %v1807_v13 = vmul.f32 %v1806_v9, %v6159_v17  ;;  %v4792_v51 = vor.u32 %v5474_v39, %v4789_v61  ;;  %v1923_v19 = vmul.f32 %v1922_v41, %v6203_v63  ;;  %2998 = vmatpush.bf16.msrb.mxu0 %v4664_v30 }
 0x18a   :  { %v6229_v20 = vadd.f32 1.0, %v1818_v53  ;;  %v1935_v62 = vadd.f32 0.112945676, %v1934_v5  ;;  %v6241_v10 = vld [vmem:[#allocation8 + $0x58] sm:$0xf0]  ;;  %v4648_v40 = vor.u32 %v6232_v25, %v6234_v38  ;;  %v4776_v17 = vor.u32 %v5470_v27, %v4773_v28 }
 0x18b   :  { %5612 = vrcp.f32 %v6227_v36  ;;  %v6243_v35 = vld [vmem:[#allocation8 + $0x14c] sm:$0xf]  ;;  %v6246_v18 = vld [vmem:[#allocation8 + $0x158] sm:$0xf0]  ;;  %v5491_v48 = vld [vmem:[#allocation8 + $0x20c] sm:$0xf0]  ;;  %v4632_v60 = vor.u32 %v6238_v29, %v6241_v10  ;;  %v1963_v59 = vmul.f32 %v1962_v4, %v6205_v50  ;;  %vm1785_vm0 = vweird.f32 %v6227_v36 }
 0x18c   :  { %5614 = vrcp.f32 %v6229_v20  ;;  %v1936_v37 = vmul.f32 %v1935_v62, %v6203_v63  ;;  %v1973_v42 = vadd.f32 0.014752088, %v1972_v24  ;;  %v4971_v45 = vld [vmem:[#allocation8 + $0x300] sm:$0xf]  ;;  %v5523_v22 = vld [vmem:[#allocation8 + $0x30c] sm:$0xf0]  ;;  %3012 = vmatpush.bf16.msrb.mxu1 %v4792_v51  ;;  %v4760_v2 = vor.u32 %v6243_v35, %v6246_v18 }
 0x18d   :  { %v1768_v54 = vadd.f32 1.1283791, %v1767_v26  ;;  %v1789_v23 = vand.u32 2147483647, %v6227_v36  ;;  %v6259_v0 = vadd.f32 1.1283791, %v1807_v13  ;;  %v4844_v46 = vor.u32 %v5491_v48, %v4843_v34  ;;  %2999 = vmatpush.bf16.msrb.mxu0 %v4648_v40 }
 0x18e   :  { %v1937_v52 = vadd.f32 0.4994258, %v1936_v37  ;;  %v1974_v43 = vmul.f32 %v1973_v42, %v6205_v50  ;;  %v4972_v21 = vor.u32 %v5523_v22, %v4971_v45  ;;  %v1791_v5 = vand.u32 2147483648, %v6227_v36  ;;  %v6269_v16 = vld [vmem:[#allocation8 + $0x2c] sm:$0xf] }
 0x18f   :  { %v1924_v8 = vadd.f32 0.05243302, %v1923_v19  ;;  %v6271_v7 = vld [vmem:[#allocation8 + $0x38] sm:$0xf0]  ;;  %v6274_v39 = vmul.f32 %v1768_v54, %v6135_v55  ;;  %v1829_v3 = vand.u32 2147483647, %v6229_v20  ;;  %2862 = vmatpush.bf16.msra.mxu2 %v4844_v46  ;;  %vm1825_vm2 = vweird.f32 %v6229_v20 }
 0x190   :  { %v1938_v11 = vmul.f32 %v1937_v52, %v6203_v63  ;;  %v1975_v14 = vadd.f32 0.112945676, %v1974_v43  ;;  %2876 = vmatpush.bf16.msra.mxu3 %v4972_v21  ;;  %v5517_v61 = vld [vmem:[#allocation8 + $0x2e4] sm:$0xf]  ;;  %vm6280_vm1 = vcmp.eq.f32.partialorder %v1789_v23, 8.507059e+37  ;;  %v1831_v27 = vand.u32 2147483648, %v6229_v20  ;;  %3013 = vmatpush.bf16.msrb.mxu1 %v4776_v17 }
 0x191   :  { %v6257_v57 = vpop.eup %5612  ;;  %v1964_v55 = vadd.f32 0.05243302, %v1963_v59  ;;  %v6286_v25 = vld [vmem:[#allocation8 + $0x12c] sm:$0xf]  ;;  %v4957_v38 = vld [vmem:[#allocation8 + $0x2f0] sm:$0xf0]  ;;  %v1925_v30 = vmul.f32 %v1924_v8, %v6203_v63  ;;  %v4616_v37 = vor.u32 %v6269_v16, %v6271_v7  ;;  %3000 = vmatpush.bf16.msrb.mxu0 %v4632_v60  ;;  %v1809_v7 = vmul.f32 %v6259_v0, %v6137_v56 }
 0x192   :  { %v6263_v6 = vpop.eup %5614  ;;  %v1781_v53 = vmul.f32 %v6257_v57, %v6227_v36  ;;  %v6284_v24 = vadd.f32 1.0, %v1938_v11  ;;  %v1976_v28 = vmul.f32 %v1975_v14, %v6205_v50  ;;  %v5549_v4 = vld [vmem:[#allocation8 + $0x3e4] sm:$0xf]  ;;  %v5085_v35 = vld [vmem:[#allocation8 + $0x3f0] sm:$0xf0]  ;;  %vm1786_vm3 = vweird.f32 %v6257_v57 }
 0x193   :  { %v1821_v9 = vmul.f32 %v6263_v6, %v6229_v20  ;;  %v4741_v51 = vld [vmem:[#allocation8 + $0x138] sm:$0xf0]  ;;  %v5513_v18 = vld [vmem:[#allocation8 + $0x2c4] sm:$0xf]  ;;  %v4941_v34 = vld [vmem:[#allocation8 + $0x2d0] sm:$0xf0]  ;;  %vm1826_vm4 = vweird.f32 %v6263_v6  ;;  %v1965_v54 = vmul.f32 %v1964_v55, %v6205_v50  ;;  %v4960_v23 = vor.u32 %v5517_v61, %v4957_v38 }
 0x194   :  { %v1782_v41 = vsub.f32 1.0, %v1781_v53  ;;  %5616 = vrcp.f32 %v6284_v24  ;;  %v1977_v19 = vadd.f32 0.4994258, %v1976_v28  ;;  %v5545_v42 = vld [vmem:[#allocation8 + $0x3c4] sm:$0xf]  ;;  %v5088_v52 = vor.u32 %v5549_v4, %v5085_v35  ;;  %vm6305_vm5 = vmor %vm1785_vm0, %vm1786_vm3  ;;  %3014 = vmatpush.bf16.msrb.mxu1 %v4760_v2 }
 0x195   :  { %v1822_v26 = vsub.f32 1.0, %v1821_v9  ;;  %v5069_v45 = vld [vmem:[#allocation8 + $0x3d0] sm:$0xf0]  ;;  %v5426_v40 = vld [vmem:[#allocation8 + $0xc] sm:$0xf]  ;;  %v1792_v43 = vor.u32 1.1754944e-38, %v1791_v5  ;;  %v4744_v53 = vor.u32 %v6286_v25, %v4741_v51  ;;  %vm6322_vm6 = vmor %vm1825_vm2, %vm1826_vm4  ;;  %2911 = vmatpush.bf16.msrb.mxu2 %v4960_v23  ;;  %v4944_v29 = vor.u32 %v5513_v18, %v4941_v34  ;;  %3001 = vmatpush.bf16.msrb.mxu0 %v4616_v37 }
 0x196   :  { %v1783_v13 = vmul.f32 %v6257_v57, %v1782_v41  ;;  %v4597_v17 = vld [vmem:[#allocation8 + $0x18] sm:$0xf0]  ;;  %v1978_v21 = vmul.f32 %v1977_v19, %v6205_v50  ;;  %v5458_v8 = vld [vmem:[#allocation8 + $0x10c] sm:$0xf]  ;;  %v1926_v16 = vadd.f32 0.18741608, %v1925_v30  ;;  %2925 = vmatpush.bf16.msrb.mxu3 %v5088_v52  ;;  %v5072_v10 = vor.u32 %v5545_v42, %v5069_v45 }
 0x197   :  { %v1823_v48 = vmul.f32 %v6263_v6, %v1822_v26  ;;  %v4725_v11 = vld [vmem:[#allocation8 + $0x118] sm:$0xf0]  ;;  %v5509_v60 = vld [vmem:[#allocation8 + $0x2a4] sm:$0xf]  ;;  %v4925_v2 = vld [vmem:[#allocation8 + $0x2b0] sm:$0xf0]  ;;  %v4600_v38 = vor.u32 %v5426_v40, %v4597_v17  ;;  %vm1945_vm9 = vweird.f32 %v6284_v24 }
 0x198   :  { %v1784_v22 = vadd.f32 %v6257_v57, %v1783_v13  ;;  %v1832_v9 = vor.u32 1.1754944e-38, %v1831_v27  ;;  %v6331_v14 = vadd.f32 1.0, %v1978_v21  ;;  %v5541_v61 = vld [vmem:[#allocation8 + $0x3a4] sm:$0xf]  ;;  %v5053_v41 = vld [vmem:[#allocation8 + $0x3b0] sm:$0xf0]  ;;  %v4728_v26 = vor.u32 %v5458_v8, %v4725_v11  ;;  %3015 = vmatpush.bf16.msrb.mxu1 %v4744_v53 }
 0x199   :  { %v1824_v46 = vadd.f32 %v6263_v6, %v1823_v48  ;;  %vm1830_vm7 = vcmp.eq.f32.partialorder %v1829_v3, 8.507059e+37  ;;  %v1966_v25 = vadd.f32 0.18741608, %v1965_v54  ;;  %2912 = vmatpush.bf16.msrb.mxu2 %v4944_v29  ;;  %v4928_v27 = vor.u32 %v5509_v60, %v4925_v2  ;;  %v5505_v3 = vld [vmem:[#allocation8 + $0x284] sm:$0xf]  ;;  %3002 = vmatpush.bf16.msrb.mxu0 %v4600_v38 }
 0x19a   :  { %v1788_v36 = vsel %vm6305_vm5, %v6257_v57, %v1784_v22  ;;  %v5617_v55 = vpop.eup %5616  ;;  %5618 = vrcp.f32 %v6331_v14  ;;  %2926 = vmatpush.bf16.msrb.mxu3 %v5072_v10  ;;  %v5056_v20 = vor.u32 %v5541_v61, %v5053_v41  ;;  %v4909_v4 = vld [vmem:[#allocation8 + $0x290] sm:$0xf0]  ;;  %v5537_v13 = vld [vmem:[#allocation8 + $0x384] sm:$0xf]  ;;  %v1951_v34 = vand.u32 2147483648, %v6284_v24 }
 0x19b   :  { %v1828_v57 = vsel %vm6322_vm6, %v6263_v6, %v1824_v46  ;;  %v1793_v28 = vsel %vm6280_vm1, %v1792_v43, %v1788_v36  ;;  %v1941_v0 = vmul.f32 %v5617_v55, %v6284_v24  ;;  %v1927_v6 = vmul.f32 %v1926_v16, %v6203_v63  ;;  %v5037_v30 = vld [vmem:[#allocation8 + $0x390] sm:$0xf0]  ;;  %v5501_v45 = vld [vmem:[#allocation8 + $0x264] sm:$0xf] }
 0x19c   :  { %v1833_v56 = vsel %vm1830_vm7, %v1832_v9, %v1828_v57  ;;  %v1794_v62 = vmul.f32 %v1793_v28, %v6274_v39  ;;  %vm1946_vm8 = vweird.f32 %v5617_v55  ;;  %v1967_v48 = vmul.f32 %v1966_v25, %v6205_v50  ;;  %3016 = vmatpush.bf16.msrb.mxu1 %v4728_v26  ;;  %v4893_v39 = vld [vmem:[#allocation8 + $0x270] sm:$0xf0]  ;;  %v5533_v40 = vld [vmem:[#allocation8 + $0x364] sm:$0xf]  ;;  %3003 = vmatmul.bf16.vlgmr.msrb.gmra.mxu0 %v6117_v47 }
 0x19d   :  { %v1942_v35 = vsub.f32 1.0, %v1941_v0  ;;  %v1834_v51 = vmul.f32 %v1833_v56, %v1809_v7  ;;  %v1928_v63 = vadd.f32 1.1283791, %v1927_v6  ;;  %v1949_v19 = vand.u32 2147483647, %v6284_v24  ;;  %2913 = vmatpush.bf16.msrb.mxu2 %v4928_v27  ;;  %vm6346_vm10 = vmor %vm1945_vm9, %vm1946_vm8 }
 0x19e   :  { %2927 = vmatpush.bf16.msrb.mxu3 %v5056_v20  ;;  %v4912_v37 = vor.u32 %v5505_v3, %v4909_v4  ;;  %v5040_v42 = vor.u32 %v5537_v13, %v5037_v30  ;;  %v5021_v17 = vld [vmem:[#allocation8 + $0x370] sm:$0xf0]  ;;  %v4579_v23 = vclamps-f32 %v1794_v62, 1.0  ;;  %v1952_v24 = vor.u32 1.1754944e-38, %v1951_v34  ;;  %v5497_v11 = vld [vmem:[#allocation8 + $0x244] sm:$0xf] }
 0x19f   :  { %v1943_v18 = vmul.f32 %v5617_v55, %v1942_v35  ;;  %v4580_v52 = vclamps-f32 %v1834_v51, 1.0  ;;  %3017 = vmatmul.bf16.vlgmr.msrb.gmra.mxu1 %v6119_v58  ;;  %v1968_v46 = vadd.f32 1.1283791, %v1967_v48  ;;  %vm1950_vm11 = vcmp.eq.f32.partialorder %v1949_v19, 8.507059e+37  ;;  %v4877_v36 = vld [vmem:[#allocation8 + $0x250] sm:$0xf0] }
 0x1a0   :  { %v5619_v22 = vpop.eup %5618  ;;  %v4896_v53 = vor.u32 %v5501_v45, %v4893_v39  ;;  %v5024_v8 = vor.u32 %v5533_v40, %v5021_v17  ;;  %v1929_v5 = vmul.f32 %v1928_v63, %v6187_v31  ;;  %v1991_v47 = vand.u32 2147483648, %v6331_v14  ;;  %v5529_v29 = vld [vmem:[#allocation8 + $0x344] sm:$0xf]  ;;  %v5005_v58 = vld [vmem:[#allocation8 + $0x350] sm:$0xf0] }
 0x1a1   :  { %v1944_v54 = vadd.f32 %v5617_v55, %v1943_v18  ;;  %v1981_v59 = vmul.f32 %v5619_v22, %v6331_v14  ;;  %2914 = vmatpush.bf16.msrb.mxu2 %v4912_v37  ;;  %v1998_v10 = vpack.c.bf16 %v4580_v52, %v4579_v23  ;;  %vm1986_vm12 = vweird.f32 %v5619_v22  ;;  %v5493_v41 = vld [vmem:[#allocation8 + $0x224] sm:$0xf]  ;;  %v4861_v31 = vld [vmem:[#allocation8 + $0x230] sm:$0xf0] }
 0x1a2   :  { %2928 = vmatpush.bf16.msrb.mxu3 %v5040_v42  ;;  %v1989_v2 = vand.u32 2147483647, %v6331_v14  ;;  %v4880_v7 = vor.u32 %v5497_v11, %v4877_v36  ;;  %vm1985_vm13 = vweird.f32 %v6331_v14  ;;  %v5008_v61 = vor.u32 %v5529_v29, %v5005_v58  ;;  %v5525_v38 = vld [vmem:[#allocation8 + $0x324] sm:$0xf]  ;;  %v4989_v26 = vld [vmem:[#allocation8 + $0x330] sm:$0xf0] }
 0x1a3   :  { %v1948_v43 = vsel %vm6346_vm10, %v5617_v55, %v1944_v54  ;;  %v1982_v21 = vsub.f32 1.0, %v1981_v59  ;;  %v1969_v55 = vmul.f32 %v1968_v46, %v6189_v33  ;;  %vm1987_vm14 = vmor %vm1985_vm13, %vm1986_vm12  ;;  %v1992_v25 = vor.u32 1.1754944e-38, %v1991_v47  ;;  %v5489_v4 = vld [vmem:[#allocation8 + $0x204] sm:$0xf]  ;;  %v4845_v35 = vld [vmem:[#allocation8 + $0x210] sm:$0xf0] }
 0x1a4   :  { %v1953_v16 = vsel %vm1950_vm11, %v1952_v24, %v1948_v43  ;;  %vm1990_vm15 = vcmp.eq.f32.partialorder %v1989_v2, 8.507059e+37  ;;  %v2003_v56 = vunpack.c.l.bf16 %v1998_v10  ;;  %v2004_v0 = vunpack.c.h.bf16 %v1998_v10  ;;  %v5521_v13 = vld [vmem:[#allocation8 + $0x304] sm:$0xf]  ;;  %v4973_v30 = vld [vmem:[#allocation8 + $0x310] sm:$0xf0] }
 0x1a5   :  { %v1983_v60 = vmul.f32 %v5619_v22, %v1982_v21  ;;  %v1954_v57 = vmul.f32 %v1953_v16, %v1929_v5  ;;  %2915 = vmatpush.bf16.msrb.mxu2 %v4896_v53  ;;  %v4864_v14 = vor.u32 %v5493_v41, %v4861_v31  ;;  %v4992_v3 = vor.u32 %v5525_v38, %v4989_v26  ;;  %v5520_v24 = vld [vmem:[#allocation8 + $0x2f4] sm:$0xf0]  ;;  %v5091_v46 = vld [vmem:[#allocation8 + $0x3e8] sm:$0xf] }
 0x1a6   :  { %2929 = vmatpush.bf16.msrb.mxu3 %v5024_v8  ;;  %v2011_v62 = vadd.f32 1.0, %v2003_v56  ;;  %v2012_v51 = vadd.f32 1.0, %v2004_v0  ;;  %v1647_v18 = vmul.f32 0.5, %v1639_v15  ;;  %v1648_v34 = vmul.f32 0.5, %v1640_v1  ;;  %v5552_v21 = vld [vmem:[#allocation8 + $0x3f4] sm:$0xf0] }
 0x1a7   :  { %v1984_v9 = vadd.f32 %v5619_v22, %v1983_v60  ;;  %v4583_v27 = vclamps-f32 %v1954_v57, 1.0  ;;  %v1651_v48 = vmul.f32 0.5, %v1643_v49  ;;  %v1652_v63 = vmul.f32 0.5, %v1644_v44  ;;  %v4963_v44 = vld [vmem:[#allocation8 + $0x2e8] sm:$0xf] }
 0x1a8   :  { %v4848_v37 = vor.u32 %v5489_v4, %v4845_v35  ;;  %v4976_v42 = vor.u32 %v5521_v13, %v4973_v30  ;;  %v2018_v54 = vpack.c.bf16 %v2012_v51, %v2011_v62  ;;  %v1654_v39 = vpack.c.bf16 %v1648_v34, %v1647_v18  ;;  %v4947_v47 = vld [vmem:[#allocation8 + $0x2c8] sm:$0xf]  ;;  %v5516_v10 = vld [vmem:[#allocation8 + $0x2d4] sm:$0xf0] }
 0x1a9   :  { %v1988_v28 = vsel %vm1987_vm14, %v5619_v22, %v1984_v9  ;;  %2916 = vmatpush.bf16.msrb.mxu2 %v4880_v7  ;;  %v1656_v40 = vpack.c.bf16 %v1652_v63, %v1651_v48  ;;  %v4964_v5 = vor.u32 %v5520_v24, %v4963_v44  ;;  %v5092_v16 = vor.u32 %v5552_v21, %v5091_v46  ;;  %v5075_v60 = vld [vmem:[#allocation8 + $0x3c8] sm:$0xf]  ;;  %v5548_v2 = vld [vmem:[#allocation8 + $0x3d4] sm:$0xf0]  ;;  %v5514_v44 = vld [vmem:[#allocation8 + $0x2cc] sm:$0xf] }
 0x1aa   :  { %v1993_v6 = vsel %vm1990_vm15, %v1992_v25, %v1988_v28  ;;  %2930 = vmatpush.bf16.msrb.mxu3 %v5008_v61  ;;  %v2031_v17 = vunpack.c.l.bf16 %v2018_v54  ;;  %v2032_v49 = vunpack.c.h.bf16 %v2018_v54  ;;  %v2023_v23 = vunpack.c.l.bf16 %v1654_v39  ;;  %v4931_v9 = vld [vmem:[#allocation8 + $0x2a8] sm:$0xf]  ;;  %v5512_v61 = vld [vmem:[#allocation8 + $0x2b4] sm:$0xf0]  ;;  %v5510_v46 = vld [vmem:[#allocation8 + $0x2ac] sm:$0xf] }
 0x1ab   :  { %v1994_v20 = vmul.f32 %v1993_v6, %v1969_v55  ;;  %v2024_v32 = vunpack.c.h.bf16 %v1654_v39  ;;  %v2027_v52 = vunpack.c.l.bf16 %v1656_v40  ;;  %v2028_v50 = vunpack.c.h.bf16 %v1656_v40  ;;  %v5059_v41 = vld [vmem:[#allocation8 + $0x3a8] sm:$0xf]  ;;  %v5544_v31 = vld [vmem:[#allocation8 + $0x3b4] sm:$0xf0]  ;;  %v5518_v40 = vld [vmem:[#allocation8 + $0x2ec] sm:$0xf] }
 0x1ac   :  { %v2039_v53 = vmul.f32 %v2031_v17, %v2023_v23  ;;  %v4948_v7 = vor.u32 %v5516_v10, %v4947_v47  ;;  %v5076_v57 = vor.u32 %v5548_v2, %v5075_v60  ;;  %v4932_v55 = vor.u32 %v5512_v61, %v4931_v9  ;;  %v4915_v38 = vld [vmem:[#allocation8 + $0x288] sm:$0xf]  ;;  %v5508_v26 = vld [vmem:[#allocation8 + $0x294] sm:$0xf0]  ;;  %v4933_v21 = vld [vmem:[#allocation8 + $0x2b8] sm:$0xf0] }
 0x1ad   :  { %v4584_v33 = vclamps-f32 %v1994_v20, 1.0  ;;  %2917 = vmatpush.bf16.msrb.mxu2 %v4864_v14  ;;  %v2040_v11 = vmul.f32 %v2032_v49, %v2024_v32  ;;  %v5060_v25 = vor.u32 %v5544_v31, %v5059_v41  ;;  %v5043_v28 = vld [vmem:[#allocation8 + $0x388] sm:$0xf]  ;;  %v5540_v56 = vld [vmem:[#allocation8 + $0x394] sm:$0xf0]  ;;  %v4916_v0 = vor.u32 %v5508_v26, %v4915_v38 }
 0x1ae   :  { %2931 = vmatpush.bf16.msrb.mxu3 %v4992_v3  ;;  %v5044_v6 = vor.u32 %v5540_v56, %v5043_v28  ;;  %v5504_v20 = vld [vmem:[#allocation8 + $0x274] sm:$0xf0]  ;;  %v5027_v14 = vld [vmem:[#allocation8 + $0x368] sm:$0xf]  ;;  %v5538_v47 = vld [vmem:[#allocation8 + $0x38c] sm:$0xf] }
 0x1af   :  { %v2000_v19 = vpack.c.bf16 %v4584_v33, %v4583_v27  ;;  %v4899_v27 = vld [vmem:[#allocation8 + $0x268] sm:$0xf]  ;;  %v5536_v3 = vld [vmem:[#allocation8 + $0x374] sm:$0xf0]  ;;  %v5045_v10 = vld [vmem:[#allocation8 + $0x398] sm:$0xf0] }
 0x1b0   :  { %v4900_v4 = vor.u32 %v5504_v20, %v4899_v27  ;;  %v5028_v35 = vor.u32 %v5536_v3, %v5027_v14  ;;  %v4883_v13 = vld [vmem:[#allocation8 + $0x248] sm:$0xf]  ;;  %v5500_v30 = vld [vmem:[#allocation8 + $0x254] sm:$0xf0]  ;;  %v5048_v2 = vor.u32 %v5538_v47, %v5045_v10  ;;  %v5534_v9 = vld [vmem:[#allocation8 + $0x36c] sm:$0xf] }
 0x1b1   :  { %v2007_v45 = vunpack.c.l.bf16 %v2000_v19  ;;  %v2008_v22 = vunpack.c.h.bf16 %v2000_v19  ;;  %2918 = vmatpush.bf16.msrb.mxu2 %v4848_v37  ;;  %v5011_v33 = vld [vmem:[#allocation8 + $0x348] sm:$0xf]  ;;  %v5532_v62 = vld [vmem:[#allocation8 + $0x354] sm:$0xf0]  ;;  %v4884_v51 = vor.u32 %v5500_v30, %v4883_v13  ;;  %v5029_v61 = vld [vmem:[#allocation8 + $0x378] sm:$0xf0] }
 0x1b2   :  { %2932 = vmatpush.bf16.msrb.mxu3 %v4976_v42  ;;  %v5012_v18 = vor.u32 %v5532_v62, %v5011_v33  ;;  %v4867_v34 = vld [vmem:[#allocation8 + $0x228] sm:$0xf]  ;;  %v5496_v48 = vld [vmem:[#allocation8 + $0x234] sm:$0xf0]  ;;  %v5032_v31 = vor.u32 %v5534_v9, %v5029_v61  ;;  %v5530_v38 = vld [vmem:[#allocation8 + $0x34c] sm:$0xf] }
 0x1b3   :  { %v2015_v12 = vadd.f32 1.0, %v2007_v45  ;;  %v2016_v15 = vadd.f32 1.0, %v2008_v22  ;;  %v4995_v63 = vld [vmem:[#allocation8 + $0x328] sm:$0xf]  ;;  %v5528_v19 = vld [vmem:[#allocation8 + $0x334] sm:$0xf0]  ;;  %v4868_v37 = vor.u32 %v5496_v48, %v4867_v34 }
 0x1b4   :  { %v4996_v42 = vor.u32 %v5528_v19, %v4995_v63  ;;  %v4851_v45 = vld [vmem:[#allocation8 + $0x208] sm:$0xf]  ;;  %v5492_v22 = vld [vmem:[#allocation8 + $0x214] sm:$0xf0]  ;;  %v5013_v26 = vld [vmem:[#allocation8 + $0x358] sm:$0xf0] }
 0x1b5   :  { %v2020_v1 = vpack.c.bf16 %v2016_v15, %v2015_v12  ;;  %v4979_v54 = vld [vmem:[#allocation8 + $0x308] sm:$0xf]  ;;  %v5524_v39 = vld [vmem:[#allocation8 + $0x314] sm:$0xf0]  ;;  %v4965_v12 = vld [vmem:[#allocation8 + $0x2f8] sm:$0xf0]  ;;  %v4852_v17 = vor.u32 %v5492_v22, %v4851_v45  ;;  %v5016_v56 = vor.u32 %v5530_v38, %v5013_v26 }
 0x1b6   :  { %v5550_v15 = vld [vmem:[#allocation8 + $0x3ec] sm:$0xf]  ;;  %v4980_v49 = vor.u32 %v5524_v39, %v4979_v54  ;;  %v4968_v23 = vor.u32 %v5518_v40, %v4965_v12  ;;  %v4997_v20 = vld [vmem:[#allocation8 + $0x338] sm:$0xf0]  ;;  %v6380_v19 = vld [vmem:[#allocation10] sm:$0xf] }
 0x1b7   :  { %v2035_v59 = vunpack.c.l.bf16 %v2020_v1  ;;  %v2036_v43 = vunpack.c.h.bf16 %v2020_v1  ;;  %v5093_v1 = vld [vmem:[#allocation8 + $0x3f8] sm:$0xf0]  ;;  %v5526_v27 = vld [vmem:[#allocation8 + $0x32c] sm:$0xf]  ;;  %v2180_v22 = vperm.slane %v6380_v19, 1 }
 0x1b8   :  { %v5096_v32 = vor.u32 %v5550_v15, %v5093_v1  ;;  %v5000_v3 = vor.u32 %v5526_v27, %v4997_v20  ;;  %v5522_v13 = vld [vmem:[#allocation8 + $0x30c] sm:$0xf]  ;;  %v4981_v30 = vld [vmem:[#allocation8 + $0x318] sm:$0xf0] }
 0x1b9   :  { %v2043_v8 = vmul.f32 %v2035_v59, %v2027_v52  ;;  %v2044_v36 = vmul.f32 %v2036_v43, %v2028_v50  ;;  %v4949_v52 = vld [vmem:[#allocation8 + $0x2d8] sm:$0xf0]  ;;  %v5546_v50 = vld [vmem:[#allocation8 + $0x3cc] sm:$0xf]  ;;  %v4984_v62 = vor.u32 %v5522_v13, %v4981_v30 }
 0x1ba   :  { %v5077_v59 = vld [vmem:[#allocation8 + $0x3d8] sm:$0xf0]  ;;  %v4952_v43 = vor.u32 %v5514_v44, %v4949_v52 }
 0x1bb   :  { %v6368_v29 = vpack.c.bf16 %v2043_v8, %v2039_v53  ;;  %v6370_v58 = vpack.c.bf16 %v2044_v36, %v2040_v11  ;;  %v5080_v24 = vor.u32 %v5546_v50, %v5077_v59  ;;  %v5542_v53 = vld [vmem:[#allocation8 + $0x3ac] sm:$0xf]  ;;  %v5061_v8 = vld [vmem:[#allocation8 + $0x3b8] sm:$0xf0]  ;;  %v4936_v11 = vor.u32 %v5510_v46, %v4933_v21 }
 0x1bc   :  { %v5064_v36 = vor.u32 %v5542_v53, %v5061_v8 }
 0x1bd   :  { %2863 = vmatmul.bf16.vlgmr.msra.gmra.mxu2 %v6368_v29  ;;  %2877 = vmatmul.bf16.vlgmr.msra.gmra.mxu3 %v6370_v58 }
 0x1be   :  { %2967 = vmatpush.bf16.msra.mxu2 %v4964_v5  ;;  %2981 = vmatpush.bf16.msra.mxu3 %v5092_v16  ;;  %v5506_v5 = vld [vmem:[#allocation8 + $0x28c] sm:$0xf]  ;;  %v4917_v16 = vld [vmem:[#allocation8 + $0x298] sm:$0xf0] }
 0x1bf   :  { %v4920_v60 = vor.u32 %v5506_v5, %v4917_v16 }
 0x1c2   :  { %2968 = vmatpush.bf16.msra.mxu2 %v4948_v7  ;;  %2982 = vmatpush.bf16.msra.mxu3 %v5076_v57  ;;  %v5502_v7 = vld [vmem:[#allocation8 + $0x26c] sm:$0xf]  ;;  %v4901_v57 = vld [vmem:[#allocation8 + $0x278] sm:$0xf0] }
 0x1c3   :  { %v4904_v41 = vor.u32 %v5502_v7, %v4901_v57 }
 0x1c6   :  { %2969 = vmatpush.bf16.msra.mxu2 %v4932_v55  ;;  %2983 = vmatpush.bf16.msra.mxu3 %v5060_v25  ;;  %v5498_v55 = vld [vmem:[#allocation8 + $0x24c] sm:$0xf]  ;;  %v4885_v25 = vld [vmem:[#allocation8 + $0x258] sm:$0xf0] }
 0x1c7   :  { %v4888_v28 = vor.u32 %v5498_v55, %v4885_v25 }
 0x1ca   :  { %2970 = vmatpush.bf16.msra.mxu2 %v4916_v0  ;;  %2984 = vmatpush.bf16.msra.mxu3 %v5044_v6  ;;  %v5494_v0 = vld [vmem:[#allocation8 + $0x22c] sm:$0xf]  ;;  %v4869_v6 = vld [vmem:[#allocation8 + $0x238] sm:$0xf0] }
 0x1cb   :  { %v4872_v14 = vor.u32 %v5494_v0, %v4869_v6 }
 0x1cd   :  { %2919 = vmatmul.bf16.vlgmr.msrb.gmra.mxu2 %v6368_v29  ;;  %2933 = vmatmul.bf16.vlgmr.msrb.gmra.mxu3 %v6370_v58 }
 0x1ce   :  { %2971 = vmatpush.bf16.msra.mxu2 %v4900_v4  ;;  %2985 = vmatpush.bf16.msra.mxu3 %v5028_v35  ;;  %v5490_v4 = vld [vmem:[#allocation8 + $0x20c] sm:$0xf]  ;;  %v4853_v35 = vld [vmem:[#allocation8 + $0x218] sm:$0xf0] }
 0x1cf   :  { %v4856_v33 = vor.u32 %v5490_v4, %v4853_v35 }
 0x1d2   :  { %2972 = vmatpush.bf16.msra.mxu2 %v4884_v51  ;;  %2986 = vmatpush.bf16.msra.mxu3 %v5012_v18 }
 0x1d6   :  { %2973 = vmatpush.bf16.msra.mxu2 %v4868_v37  ;;  %2987 = vmatpush.bf16.msra.mxu3 %v4996_v42  ;;  %v2179_v42 = vperm.slane %v6380_v19, 0 }
 0x1d9   :  { %v2836_v51 = vpop.f32.mrf.mxu0  ;;  %v2850_v18 = vpop.f32.mrf.mxu1 }
 0x1da   :  { %2974 = vmatpush.bf16.msra.mxu2 %v4852_v17  ;;  %2988 = vmatpush.bf16.msra.mxu3 %v4980_v49  ;;  %v2837_v40 = vadd.f32 %v2836_v51, %v2179_v42 }
 0x1dc   :  { %v2851_v15 = vadd.f32 %v2850_v18, %v2837_v40 }
 0x1dd   :  { %2975 = vmatmul.bf16.vlgmr.msra.gmra.mxu2 %v6368_v29  ;;  %2989 = vmatmul.bf16.vlgmr.msra.gmra.mxu3 %v6370_v58 }
 0x1de   :  { %3023 = vmatpush.bf16.msrb.mxu2 %v4968_v23  ;;  %3037 = vmatpush.bf16.msrb.mxu3 %v5096_v32 }
 0x1e1   :  { %v2838_v34 = vpop.f32.mrf.mxu0  ;;  %v2852_v37 = vpop.f32.mrf.mxu1 }
 0x1e2   :  { %3024 = vmatpush.bf16.msrb.mxu2 %v4952_v43  ;;  %3038 = vmatpush.bf16.msrb.mxu3 %v5080_v24  ;;  %v2839_v44 = vadd.f32 %v2838_v34, %v2179_v42 }
 0x1e4   :  { %v2853_v24 = vadd.f32 %v2852_v37, %v2839_v44 }
 0x1e6   :  { %3025 = vmatpush.bf16.msrb.mxu2 %v4936_v11  ;;  %3039 = vmatpush.bf16.msrb.mxu3 %v5064_v36 }
 0x1e9   :  { %v2892_v45 = vpop.f32.mrf.mxu0 }
 0x1ea   :  { %3026 = vmatpush.bf16.msrb.mxu2 %v4920_v60  ;;  %3040 = vmatpush.bf16.msrb.mxu3 %v5048_v2  ;;  %v2893_v12 = vadd.f32 %v2892_v45, %v2180_v22 }
 0x1ee   :  { %3027 = vmatpush.bf16.msrb.mxu2 %v4904_v41  ;;  %3041 = vmatpush.bf16.msrb.mxu3 %v5032_v31 }
 0x1f1   :  { %v2894_v17 = vpop.f32.mrf.mxu0 }
 0x1f2   :  { %3028 = vmatpush.bf16.msrb.mxu2 %v4888_v28  ;;  %3042 = vmatpush.bf16.msrb.mxu3 %v5016_v56  ;;  %v2895_v59 = vadd.f32 %v2894_v17, %v2180_v22 }
 0x1f6   :  { %3029 = vmatpush.bf16.msrb.mxu2 %v4872_v14  ;;  %3043 = vmatpush.bf16.msrb.mxu3 %v5000_v3 }
 0x1f9   :  { %v6392_v47 = vpop.f32.mrf.mxu0 }
 0x1fa   :  { %3030 = vmatpush.bf16.msrb.mxu2 %v4856_v33  ;;  %3044 = vmatpush.bf16.msrb.mxu3 %v4984_v62 }
 0x1fd   :  { %3031 = vmatmul.bf16.vlgmr.msrb.gmra.mxu2 %v6368_v29  ;;  %3045 = vmatmul.bf16.vlgmr.msrb.gmra.mxu3 %v6370_v58  ;;  %v2906_v29 = vpop.f32.mrf.mxu1 }
 0x1fe   :  { %v2907_v58 = vadd.f32 %v2906_v29, %v2893_v12 }
 0x201   :  { %v6419_v3 = vpop.f32.mrf.mxu0 }
 0x205   :  { %v2908_v46 = vpop.f32.mrf.mxu1 }
 0x206   :  { %v2909_v8 = vadd.f32 %v2908_v46, %v2895_v59 }
 0x20d   :  { %v6404_v25 = vpop.f32.mrf.mxu1 }
 0x240   :  { %v2864_v48 = vpop.f32.mrf.mxu2  ;;  %v2878_v63 = vpop.f32.mrf.mxu3 }
 0x241   :  { %v2865_v1 = vadd.f32 %v2864_v48, %v2851_v15 }
 0x243   :  { %v2879_v52 = vadd.f32 %v2878_v63, %v2865_v1 }
 0x248   :  { %v2866_v54 = vpop.f32.mrf.mxu2  ;;  %v2880_v39 = vpop.f32.mrf.mxu3 }
 0x249   :  { %v2867_v11 = vadd.f32 %v2866_v54, %v2853_v24 }
 0x24b   :  { %v2881_v7 = vadd.f32 %v2880_v39, %v2867_v11  ;;  %v6434_v39 = vpop.f32.mrf.mxu1 }
 0x250   :  { %v2920_v49 = vpop.f32.mrf.mxu2  ;;  %v2934_v32 = vpop.f32.mrf.mxu3 }
 0x251   :  { %v2921_v23 = vadd.f32 %v2920_v49, %v2907_v58  ;;  %v3004_v49 = vpop.f32.mrf.mxu0 }
 0x253   :  { %v2935_v50 = vadd.f32 %v2934_v32, %v2921_v23 }
 0x255   :  { %v6384_v43 = vpack.c.bf16 %v2935_v50, %v2879_v52 }
 0x257   :  { %v3055_v21 = vunpack.c.l.bf16 %v6384_v43  ;;  %v3056_v53 = vunpack.c.h.bf16 %v6384_v43 }
 0x258   :  { %v2922_v36 = vpop.f32.mrf.mxu2  ;;  %v2936_v2 = vpop.f32.mrf.mxu3 }
 0x259   :  { %v3075_v5 = vmul.f32 0.70703125, %v3055_v21  ;;  %v3076_v16 = vmul.f32 0.70703125, %v3056_v53  ;;  %v2923_v10 = vadd.f32 %v2922_v36, %v2909_v8 }
 0x25b   :  { %v3083_v60 = vpack.c.bf16 %v3076_v16, %v3075_v5  ;;  %v2937_v57 = vadd.f32 %v2936_v2, %v2923_v10  ;;  %v5560_v16 = vld [vmem:[#allocation11 + $0x38] sm:$0xff] }
 0x25c   :  { %v5568_v10 = vld [vmem:[#allocation11 + $0x78] sm:$0xff]  ;;  %3727 = vmatpush.bf16.msra.mxu0 %v5560_v16  ;;  %v5566_v16 = vld [vmem:[#allocation11 + $0x68] sm:$0xff] }
 0x25d   :  { %v6394_v9 = vunpack.c.l.bf16 %v3083_v60  ;;  %v6396_v61 = vunpack.c.h.bf16 %v3083_v60  ;;  %v6398_v41 = vpack.c.bf16 %v2937_v57, %v2881_v7  ;;  %3741 = vmatpush.bf16.msra.mxu1 %v5568_v10 }
 0x25f   :  { %v3095_v31 = vmul.f32 %v6394_v9, %v6394_v9  ;;  %v3135_v55 = vmul.f32 %v6396_v61, %v6396_v61  ;;  %v3059_v38 = vunpack.c.l.bf16 %v6398_v41  ;;  %v3060_v26 = vunpack.c.h.bf16 %v6398_v41 }
 0x260   :  { %v6442_v17 = vpop.f32.mrf.mxu2 }
 0x261   :  { %v6408_v28 = vmin.f32 %v3095_v31, 16.0  ;;  %v6410_v56 = vmin.f32 %v3135_v55, 16.0  ;;  %v3079_v0 = vmul.f32 0.70703125, %v3059_v38  ;;  %v3080_v6 = vmul.f32 0.70703125, %v3060_v26  ;;  %v6454_v31 = vpop.f32.mrf.mxu3 }
 0x263   :  { %v3097_v27 = vmul.f32 2.1237322e-06, %v6408_v28  ;;  %v3108_v20 = vmul.f32 3.8918573e-05, %v6408_v28  ;;  %v3137_v14 = vmul.f32 2.1237322e-06, %v6410_v56  ;;  %v3085_v35 = vpack.c.bf16 %v3080_v6, %v3079_v0  ;;  %v3018_v0 = vpop.f32.mrf.mxu1 }
 0x264   :  { %v3148_v4 = vmul.f32 3.8918573e-05, %v6410_v56 }
 0x265   :  { %v3098_v13 = vadd.f32 0.00028619796, %v3097_v27  ;;  %v3109_v30 = vadd.f32 0.001143296, %v3108_v20  ;;  %v3138_v33 = vadd.f32 0.00028619796, %v3137_v14  ;;  %v6422_v51 = vunpack.c.l.bf16 %v3085_v35 }
 0x266   :  { %v3149_v62 = vadd.f32 0.001143296, %v3148_v4  ;;  %v6424_v18 = vunpack.c.h.bf16 %v3085_v35  ;;  %v2181_v4 = vperm.slane %v6380_v19, 2 }
 0x267   :  { %v3099_v34 = vmul.f32 %v3098_v13, %v6408_v28  ;;  %v3110_v48 = vmul.f32 %v3109_v30, %v6408_v28  ;;  %v3139_v63 = vmul.f32 %v3138_v33, %v6410_v56  ;;  %v3255_v42 = vmul.f32 %v6422_v51, %v6422_v51 }
 0x268   :  { %v3150_v37 = vmul.f32 %v3149_v62, %v6410_v56  ;;  %v3295_v45 = vmul.f32 %v6424_v18, %v6424_v18 }
 0x269   :  { %v3100_v22 = vadd.f32 0.0036580483, %v3099_v34  ;;  %v3111_v54 = vadd.f32 0.014752088, %v3110_v48  ;;  %v6436_v12 = vmin.f32 %v3255_v42, 16.0  ;;  %v2182_v48 = vperm.slane %v6380_v19, 3  ;;  %v2978_v42 = vpop.f32.mrf.mxu2 }
 0x26a   :  { %v3151_v40 = vadd.f32 0.014752088, %v3150_v37  ;;  %v6438_v29 = vmin.f32 %v3295_v45, 16.0  ;;  %v3140_v1 = vadd.f32 0.0036580483, %v3139_v63  ;;  %v3006_v45 = vpop.f32.mrf.mxu0  ;;  %v5567_v19 = vld [vmem:[#allocation11 + $0x70] sm:$0xff] }
 0x26b   :  { %v3101_v15 = vmul.f32 %v3100_v22, %v6408_v28  ;;  %v3112_v58 = vmul.f32 %v3111_v54, %v6408_v28  ;;  %v3257_v32 = vmul.f32 2.1237322e-06, %v6436_v12  ;;  %v3268_v44 = vmul.f32 3.8918573e-05, %v6436_v12  ;;  %3742 = vmatpush.bf16.msra.mxu1 %v5567_v19  ;;  %v3020_v10 = vpop.f32.mrf.mxu1 }
 0x26c   :  { %v3152_v23 = vmul.f32 %v3151_v40, %v6410_v56  ;;  %v3297_v52 = vmul.f32 2.1237322e-06, %v6438_v29  ;;  %v3141_v36 = vmul.f32 %v3140_v1, %v6410_v56  ;;  %v3308_v57 = vmul.f32 3.8918573e-05, %v6438_v29 }
 0x26d   :  { %v3113_v50 = vadd.f32 0.112945676, %v3112_v58  ;;  %v3258_v24 = vadd.f32 0.00028619796, %v3257_v32  ;;  %v3269_v46 = vadd.f32 0.001143296, %v3268_v44  ;;  %v2949_v58 = vadd.f32 %v6392_v47, %v2181_v4 }
 0x26e   :  { %v3153_v59 = vadd.f32 0.112945676, %v3152_v23  ;;  %v3102_v8 = vadd.f32 0.05243302, %v3101_v15  ;;  %v3298_v5 = vadd.f32 0.00028619796, %v3297_v52  ;;  %v2951_v32 = vadd.f32 %v6419_v3, %v2181_v4 }
 0x26f   :  { %v3114_v11 = vmul.f32 %v3113_v50, %v6408_v28  ;;  %v3259_v2 = vmul.f32 %v3258_v24, %v6436_v12  ;;  %v3270_v7 = vmul.f32 %v3269_v46, %v6436_v12  ;;  %v3142_v13 = vadd.f32 0.05243302, %v3141_v36  ;;  %v5559_v23 = vld [vmem:[#allocation11 + $0x30] sm:$0xff]  ;;  %3743 = vmatpush.bf16.msra.mxu1 %v5566_v16 }
 0x270   :  { %v3154_v60 = vmul.f32 %v3153_v59, %v6410_v56  ;;  %v3299_v14 = vmul.f32 %v3298_v5, %v6438_v29  ;;  %v3103_v30 = vmul.f32 %v3102_v8, %v6408_v28  ;;  %v3309_v34 = vadd.f32 0.001143296, %v3308_v57  ;;  %3728 = vmatpush.bf16.msra.mxu0 %v5559_v23  ;;  %v2992_v8 = vpop.f32.mrf.mxu3  ;;  %v5558_v5 = vld [vmem:[#allocation11 + $0x28] sm:$0xff]  ;;  %v5563_v16 = vld [vmem:[#allocation11 + $0x50] sm:$0xff] }
 0x271   :  { %v3115_v55 = vadd.f32 0.4994258, %v3114_v11  ;;  %v3260_v27 = vadd.f32 0.0036580483, %v3259_v2  ;;  %v3271_v20 = vadd.f32 0.014752088, %v3270_v7  ;;  %v3143_v1 = vmul.f32 %v3142_v13, %v6410_v56 }
 0x272   :  { %v3155_v6 = vadd.f32 0.4994258, %v3154_v60  ;;  %v3300_v40 = vadd.f32 0.0036580483, %v3299_v14  ;;  %v3310_v15 = vmul.f32 %v3309_v34, %v6438_v29  ;;  %v3104_v44 = vadd.f32 0.18741608, %v3103_v30 }
 0x273   :  { %v3116_v35 = vmul.f32 %v3115_v55, %v6408_v28  ;;  %v3272_v62 = vmul.f32 %v3271_v20, %v6436_v12  ;;  %v3261_v37 = vmul.f32 %v3260_v27, %v6436_v12  ;;  %v3005_v52 = vadd.f32 %v3004_v49, %v2182_v48  ;;  %v5557_v30 = vld [vmem:[#allocation11 + $0x20] sm:$0xff] }
 0x274   :  { %v3156_v33 = vmul.f32 %v3155_v6, %v6410_v56  ;;  %v3007_v50 = vadd.f32 %v3006_v45, %v2182_v48  ;;  %v3301_v47 = vmul.f32 %v3300_v40, %v6438_v29  ;;  %v3311_v46 = vadd.f32 0.014752088, %v3310_v15  ;;  %3729 = vmatpush.bf16.msra.mxu0 %v5558_v5 }
 0x275   :  { %v6463_v63 = vadd.f32 1.0, %v3116_v35  ;;  %v3273_v54 = vadd.f32 0.112945676, %v3272_v62  ;;  %v3262_v59 = vadd.f32 0.05243302, %v3261_v37  ;;  %v2963_v11 = vadd.f32 %v6404_v25, %v2949_v58 }
 0x276   :  { %v6466_v22 = vadd.f32 1.0, %v3156_v33  ;;  %v3144_v36 = vadd.f32 0.18741608, %v3143_v1  ;;  %v2965_v3 = vadd.f32 %v6434_v39, %v2951_v32  ;;  %v3105_v49 = vmul.f32 %v3104_v44, %v6408_v28  ;;  %v5565_v33 = vld [vmem:[#allocation11 + $0x60] sm:$0xff]  ;;  %v5556_v32 = vld [vmem:[#allocation11 + $0x18] sm:$0xff] }
 0x277   :  { %5620 = vrcp.f32 %v6463_v63  ;;  %v3274_v24 = vmul.f32 %v3273_v54, %v6436_v12  ;;  %v3312_v2 = vmul.f32 %v3311_v46, %v6438_v29  ;;  %v3019_v57 = vadd.f32 %v3018_v0, %v3005_v52  ;;  %3744 = vmatpush.bf16.msra.mxu1 %v5565_v33  ;;  %v5564_v52 = vld [vmem:[#allocation11 + $0x58] sm:$0xff] }
 0x278   :  { %5622 = vrcp.f32 %v6466_v22  ;;  %v6482_v55 = vadd.f32 %v3020_v10, %v3007_v50  ;;  %v3263_v6 = vmul.f32 %v3262_v59, %v6436_v12  ;;  %v3302_v20 = vadd.f32 0.05243302, %v3301_v47  ;;  %3730 = vmatpush.bf16.msra.mxu0 %v5557_v30 }
 0x279   :  { %v3275_v60 = vadd.f32 0.4994258, %v3274_v24  ;;  %v2977_v14 = vadd.f32 %v6442_v17, %v2963_v11  ;;  %v3145_v4 = vmul.f32 %v3144_v36, %v6410_v56  ;;  %v3313_v35 = vadd.f32 0.112945676, %v3312_v2 }
 0x27a   :  { %v2979_v13 = vadd.f32 %v2978_v42, %v2965_v3  ;;  %v3106_v62 = vadd.f32 1.1283791, %v3105_v49  ;;  %v6498_v45 = vmul.f32 0.5, %v3055_v21  ;;  %v3264_v17 = vadd.f32 0.18741608, %v3263_v6 }
 0x27b   :  { %v3276_v28 = vmul.f32 %v3275_v60, %v6436_v12  ;;  %v3314_v56 = vmul.f32 %v3313_v35, %v6438_v29  ;;  %v6503_v42 = vmul.f32 0.5, %v3056_v53  ;;  %v3303_v40 = vmul.f32 %v3302_v20, %v6438_v29  ;;  %3745 = vmatpush.bf16.msra.mxu1 %v5564_v52  ;;  %v5562_v35 = vld [vmem:[#allocation11 + $0x48] sm:$0xff] }
 0x27c   :  { %v2991_v15 = vadd.f32 %v6454_v31, %v2977_v14  ;;  %v6510_v19 = vadd.f32 %v2992_v8, %v2979_v13  ;;  %v6513_v44 = vmul.f32 %v3106_v62, %v6394_v9  ;;  %vm3123_vm0 = vweird.f32 %v6463_v63  ;;  %3731 = vmatpush.bf16.msra.mxu0 %v5556_v32 }
 0x27d   :  { %v6480_v7 = vpop.eup %5620  ;;  %v6494_v48 = vadd.f32 1.0, %v3276_v28  ;;  %v3315_v23 = vadd.f32 0.4994258, %v3314_v56  ;;  %v3146_v43 = vadd.f32 1.1283791, %v3145_v4  ;;  %v3129_v31 = vand.u32 2147483648, %v6463_v63 }
 0x27e   :  { %v6485_v25 = vpop.eup %5622  ;;  %v3119_v39 = vmul.f32 %v6480_v7, %v6463_v63  ;;  %v3127_v50 = vand.u32 2147483647, %v6463_v63  ;;  %v3265_v59 = vmul.f32 %v3264_v17, %v6436_v12  ;;  %vm3124_vm1 = vweird.f32 %v6480_v7  ;;  %v5555_v12 = vld [vmem:[#allocation11 + $0x10] sm:$0xff] }
 0x27f   :  { %v3159_v0 = vmul.f32 %v6485_v25, %v6466_v22  ;;  %5624 = vrcp.f32 %v6494_v48  ;;  %v3316_v24 = vmul.f32 %v3315_v23, %v6438_v29  ;;  %v3167_v47 = vand.u32 2147483647, %v6466_v22  ;;  %vm6539_vm4 = vmor %vm3123_vm0, %vm3124_vm1  ;;  %3746 = vmatpush.bf16.msra.mxu1 %v5563_v16 }
 0x280   :  { %v3032_v27 = vpop.f32.mrf.mxu2  ;;  %v3120_v34 = vsub.f32 1.0, %v3119_v39  ;;  %v3046_v58 = vpop.f32.mrf.mxu3  ;;  %v3304_v9 = vadd.f32 0.18741608, %v3303_v40  ;;  %vm3164_vm2 = vweird.f32 %v6485_v25  ;;  %vm3163_vm3 = vweird.f32 %v6466_v22  ;;  %3732 = vmatpush.bf16.msra.mxu0 %v5555_v12 }
 0x281   :  { %v3033_v37 = vadd.f32 %v3032_v27, %v3019_v57  ;;  %v3160_v54 = vsub.f32 1.0, %v3159_v0  ;;  %v6527_v5 = vadd.f32 1.0, %v3316_v24  ;;  %v3169_v10 = vand.u32 2147483648, %v6466_v22  ;;  %vm6554_vm6 = vmor %vm3163_vm3, %vm3164_vm2  ;;  %v5554_v0 = vld [vmem:[#allocation11 + $0x8] sm:$0xff] }
 0x282   :  { %v3121_v21 = vmul.f32 %v6480_v7, %v3120_v34  ;;  %v3266_v57 = vadd.f32 1.1283791, %v3265_v59  ;;  %vm6547_vm5 = vcmp.eq.f32.partialorder %v3127_v50, 8.507059e+37  ;;  %v3130_v39 = vor.u32 1.1754944e-38, %v3129_v31 }
 0x283   :  { %v3161_v1 = vmul.f32 %v6485_v25, %v3160_v54  ;;  %v3047_v53 = vadd.f32 %v3046_v58, %v3033_v37  ;;  %5626 = vrcp.f32 %v6527_v5  ;;  %v3147_v63 = vmul.f32 %v3146_v43, %v6396_v61  ;;  %3747 = vmatpush.bf16.msra.mxu1 %v5562_v35 }
 0x284   :  { %v3122_v11 = vadd.f32 %v6480_v7, %v3121_v21  ;;  %vm6558_vm7 = vcmp.eq.f32.partialorder %v3167_v47, 8.507059e+37  ;;  %v3305_v4 = vmul.f32 %v3304_v9, %v6438_v29  ;;  %v3170_v13 = vor.u32 1.1754944e-38, %v3169_v10  ;;  %3733 = vmatpush.bf16.msra.mxu0 %v5554_v0  ;;  %v5553_v21 = vld [vmem:[#allocation11] sm:$0xff] }
 0x285   :  { %v6522_v46 = vpack.c.bf16 %v3047_v53, %v2991_v15  ;;  %v3162_v36 = vadd.f32 %v6485_v25, %v3161_v1  ;;  %v6529_v3 = vpop.eup %5624  ;;  %v3287_v30 = vand.u32 2147483647, %v6494_v48  ;;  %vm3283_vm8 = vweird.f32 %v6494_v48  ;;  %v5561_v1 = vld [vmem:[#allocation11 + $0x40] sm:$0xff] }
 0x286   :  { %v3279_v6 = vmul.f32 %v6529_v3, %v6494_v48  ;;  %v3289_v17 = vand.u32 2147483648, %v6494_v48  ;;  %vm3284_vm9 = vweird.f32 %v6529_v3  ;;  %v3327_v48 = vand.u32 2147483647, %v6527_v5 }
 0x287   :  { %v3057_v49 = vunpack.c.l.bf16 %v6522_v46  ;;  %v3058_v60 = vunpack.c.h.bf16 %v6522_v46  ;;  %v3166_v14 = vsel %vm6554_vm6, %v6485_v25, %v3162_v36  ;;  %vm6587_vm10 = vcmp.eq.f32.partialorder %v3287_v30, 8.507059e+37  ;;  %vm6601_vm11 = vmor %vm3283_vm8, %vm3284_vm9  ;;  %3748 = vmatpush.bf16.msra.mxu1 %v5561_v1 }
 0x288   :  { %v3034_v8 = vpop.f32.mrf.mxu2  ;;  %v3280_v61 = vsub.f32 1.0, %v3279_v6  ;;  %v3048_v34 = vpop.f32.mrf.mxu3  ;;  %v3171_v54 = vsel %vm6558_vm7, %v3170_v13, %v3166_v14  ;;  %3734 = vmatpush.bf16.msra.mxu0 %v5553_v21  ;;  %v3290_v24 = vor.u32 1.1754944e-38, %v3289_v17  ;;  %vm3323_vm13 = vweird.f32 %v6527_v5 }
 0x289   :  { %v3035_v22 = vadd.f32 %v3034_v8, %v6482_v55  ;;  %v3126_v55 = vsel %vm6539_vm4, %v6480_v7, %v3122_v11  ;;  %v3077_v33 = vmul.f32 0.70703125, %v3057_v49  ;;  %v3078_v62 = vmul.f32 0.70703125, %v3058_v60  ;;  %v5627_v40 = vpop.eup %5626 }
 0x28a   :  { %v3267_v7 = vmul.f32 %v3266_v57, %v6422_v51  ;;  %v3281_v37 = vmul.f32 %v6529_v3, %v3280_v61  ;;  %v3131_v29 = vsel %vm6547_vm5, %v3130_v39, %v3126_v55  ;;  %v3306_v51 = vadd.f32 1.1283791, %v3305_v4 }
 0x28b   :  { %v3049_v25 = vadd.f32 %v3048_v34, %v3035_v22  ;;  %v3084_v56 = vpack.c.bf16 %v3078_v62, %v3077_v33  ;;  %v3319_v32 = vmul.f32 %v5627_v40, %v6527_v5  ;;  %v3132_v52 = vmul.f32 %v3131_v29, %v6513_v44 }
 0x28c   :  { %v3282_v15 = vadd.f32 %v6529_v3, %v3281_v37  ;;  %v3172_v50 = vmul.f32 %v3171_v54, %v3147_v63  ;;  %vm3324_vm12 = vweird.f32 %v5627_v40  ;;  %vm3328_vm15 = vcmp.eq.f32.partialorder %v3327_v48, 8.507059e+37 }
 0x28d   :  { %v6585_v58 = vpack.c.bf16 %v3049_v25, %v6510_v19  ;;  %v6592_v43 = vunpack.c.l.bf16 %v3084_v56  ;;  %v6594_v53 = vunpack.c.h.bf16 %v3084_v56  ;;  %v3320_v47 = vsub.f32 1.0, %v3319_v32  ;;  %vm6629_vm14 = vmor %vm3323_vm13, %vm3324_vm12 }
 0x28e   :  { %v3286_v8 = vsel %vm6601_vm11, %v6529_v3, %v3282_v15  ;;  %v5097_v2 = vclamps-f32 %v3132_v52, 1.0  ;;  %v5098_v57 = vclamps-f32 %v3172_v50, 1.0  ;;  %v3329_v3 = vand.u32 2147483648, %v6527_v5 }
 0x28f   :  { %v3061_v31 = vunpack.c.l.bf16 %v6585_v58  ;;  %v3062_v19 = vunpack.c.h.bf16 %v6585_v58  ;;  %v3175_v9 = vmul.f32 %v6592_v43, %v6592_v43  ;;  %v3215_v44 = vmul.f32 %v6594_v53, %v6594_v53 }
 0x290   :  { %v3321_v36 = vmul.f32 %v5627_v40, %v3320_v47  ;;  %v3291_v63 = vsel %vm6587_vm10, %v3290_v24, %v3286_v8  ;;  %v3330_v0 = vor.u32 1.1754944e-38, %v3329_v3  ;;  %v3415_v56 = vpack.c.bf16 %v5098_v57, %v5097_v2 }
 0x291   :  { %v3081_v11 = vmul.f32 0.70703125, %v3061_v31  ;;  %v6615_v12 = vmin.f32 %v3175_v9, 16.0  ;;  %v6617_v16 = vmin.f32 %v3215_v44, 16.0  ;;  %v3082_v10 = vmul.f32 0.70703125, %v3062_v19 }
 0x292   :  { %v3322_v6 = vadd.f32 %v5627_v40, %v3321_v36  ;;  %v3292_v33 = vmul.f32 %v3291_v63, %v3267_v7  ;;  %v3419_v2 = vunpack.c.l.bf16 %v3415_v56  ;;  %v6678_v41 = vpack.c.bf16 %v6503_v42, %v6498_v45  ;;  %v5576_v42 = vld [vmem:[#allocation11 + $0xb8] sm:$0xff] }
 0x293   :  { %v3177_v22 = vmul.f32 2.1237322e-06, %v6615_v12  ;;  %v3188_v27 = vmul.f32 3.8918573e-05, %v6615_v12  ;;  %v3217_v39 = vmul.f32 2.1237322e-06, %v6617_v16  ;;  %v3086_v55 = vpack.c.bf16 %v3082_v10, %v3081_v11  ;;  %3755 = vmatpush.bf16.msra.mxu2 %v5576_v42 }
 0x294   :  { %v3228_v20 = vmul.f32 3.8918573e-05, %v6617_v16  ;;  %v3326_v5 = vsel %vm6629_vm14, %v5627_v40, %v3322_v6  ;;  %v3307_v40 = vmul.f32 %v3306_v51, %v6424_v18  ;;  %v5101_v52 = vclamps-f32 %v3292_v33, 1.0 }
 0x295   :  { %v3178_v14 = vadd.f32 0.00028619796, %v3177_v22  ;;  %v3189_v61 = vadd.f32 0.001143296, %v3188_v27  ;;  %v3218_v4 = vadd.f32 0.00028619796, %v3217_v39  ;;  %v6636_v13 = vunpack.c.l.bf16 %v3086_v55 }
 0x296   :  { %v3229_v35 = vadd.f32 0.001143296, %v3228_v20  ;;  %v6638_v30 = vunpack.c.h.bf16 %v3086_v55  ;;  %v3331_v25 = vsel %vm3328_vm15, %v3330_v0, %v3326_v5  ;;  %v3420_v22 = vunpack.c.h.bf16 %v3415_v56 }
 0x297   :  { %v3179_v62 = vmul.f32 %v3178_v14, %v6615_v12  ;;  %v3190_v34 = vmul.f32 %v3189_v61, %v6615_v12  ;;  %v3219_v37 = vmul.f32 %v3218_v4, %v6617_v16  ;;  %v3335_v54 = vmul.f32 %v6636_v13, %v6636_v13 }
 0x298   :  { %v3230_v29 = vmul.f32 %v3229_v35, %v6617_v16  ;;  %v3375_v17 = vmul.f32 %v6638_v30, %v6638_v30  ;;  %v3332_v50 = vmul.f32 %v3331_v25, %v3307_v40  ;;  %v3067_v61 = vmul.f32 0.5, %v3059_v38 }
 0x299   :  { %v3180_v15 = vadd.f32 0.0036580483, %v3179_v62  ;;  %v3191_v7 = vadd.f32 0.014752088, %v3190_v34  ;;  %v3220_v21 = vadd.f32 0.0036580483, %v3219_v37 }
 0x29a   :  { %v3231_v1 = vadd.f32 0.014752088, %v3230_v29  ;;  %v6649_v23 = vmin.f32 %v3335_v54, 16.0  ;;  %v6651_v32 = vmin.f32 %v3375_v17, 16.0  ;;  %v5102_v27 = vclamps-f32 %v3332_v50, 1.0 }
 0x29b   :  { %v3181_v59 = vmul.f32 %v3180_v15, %v6615_v12  ;;  %v3192_v24 = vmul.f32 %v3191_v7, %v6615_v12  ;;  %v3221_v47 = vmul.f32 %v3220_v21, %v6617_v16  ;;  %v3068_v4 = vmul.f32 0.5, %v3060_v26 }
 0x29c   :  { %v3232_v9 = vmul.f32 %v3231_v1, %v6617_v16  ;;  %v3337_v18 = vmul.f32 2.1237322e-06, %v6649_v23  ;;  %v3348_v51 = vmul.f32 3.8918573e-05, %v6649_v23  ;;  %v3377_v48 = vmul.f32 2.1237322e-06, %v6651_v32 }
 0x29d   :  { %v3182_v44 = vadd.f32 0.05243302, %v3181_v59  ;;  %v3193_v8 = vadd.f32 0.112945676, %v3192_v24  ;;  %v3222_v11 = vadd.f32 0.05243302, %v3221_v47  ;;  %v3417_v25 = vpack.c.bf16 %v5102_v27, %v5101_v52 }
 0x29e   :  { %v3233_v36 = vadd.f32 0.112945676, %v3232_v9  ;;  %v3338_v10 = vadd.f32 0.00028619796, %v3337_v18  ;;  %v3349_v6 = vadd.f32 0.001143296, %v3348_v51  ;;  %v6680_v26 = vpack.c.bf16 %v3068_v4, %v3067_v61 }
 0x29f   :  { %v3183_v57 = vmul.f32 %v3182_v44, %v6615_v12  ;;  %v3194_v3 = vmul.f32 %v3193_v8, %v6615_v12  ;;  %v3378_v63 = vadd.f32 0.00028619796, %v3377_v48  ;;  %v3388_v28 = vmul.f32 3.8918573e-05, %v6651_v32  ;;  %v5584_v24 = vld [vmem:[#allocation11 + $0xf8] sm:$0xff]  ;;  %v5574_v61 = vld [vmem:[#allocation11 + $0xa8] sm:$0xff] }
 0x2a0   :  { %v3234_v39 = vmul.f32 %v3233_v36, %v6617_v16  ;;  %v3223_v55 = vmul.f32 %v3222_v11, %v6617_v16  ;;  %v3339_v5 = vmul.f32 %v3338_v10, %v6649_v23  ;;  %v3350_v14 = vmul.f32 %v3349_v6, %v6649_v23  ;;  %3769 = vmatpush.bf16.msra.mxu3 %v5584_v24  ;;  %v5583_v6 = vld [vmem:[#allocation11 + $0xf0] sm:$0xff]  ;;  %v5582_v4 = vld [vmem:[#allocation11 + $0xe8] sm:$0xff] }
 0x2a1   :  { %v3195_v20 = vadd.f32 0.4994258, %v3194_v3  ;;  %v3427_v35 = vadd.f32 1.0, %v3419_v2  ;;  %v3184_v33 = vadd.f32 0.18741608, %v3183_v57  ;;  %v3428_v37 = vadd.f32 1.0, %v3420_v22 }
 0x2a2   :  { %v3235_v0 = vadd.f32 0.4994258, %v3234_v39  ;;  %v3351_v34 = vadd.f32 0.014752088, %v3350_v14  ;;  %v3379_v54 = vmul.f32 %v3378_v63, %v6651_v32  ;;  %v3389_v17 = vadd.f32 0.001143296, %v3388_v28 }
 0x2a3   :  { %v3196_v62 = vmul.f32 %v3195_v20, %v6615_v12  ;;  %v3224_v40 = vadd.f32 0.18741608, %v3223_v55  ;;  %v3340_v38 = vadd.f32 0.0036580483, %v3339_v5  ;;  %v3185_v21 = vmul.f32 %v3184_v33, %v6615_v12  ;;  %v5575_v3 = vld [vmem:[#allocation11 + $0xb0] sm:$0xff] }
 0x2a4   :  { %v3236_v29 = vmul.f32 %v3235_v0, %v6617_v16  ;;  %v3352_v7 = vmul.f32 %v3351_v34, %v6649_v23  ;;  %v3390_v1 = vmul.f32 %v3389_v17, %v6651_v32  ;;  %v6688_v52 = vpack.c.bf16 %v3428_v37, %v3427_v35  ;;  %3756 = vmatpush.bf16.msra.mxu2 %v5575_v3 }
 0x2a5   :  { %v6674_v56 = vadd.f32 1.0, %v3196_v62  ;;  %v3380_v50 = vadd.f32 0.0036580483, %v3379_v54  ;;  %v3423_v59 = vunpack.c.l.bf16 %v3417_v25  ;;  %v3424_v45 = vunpack.c.h.bf16 %v3417_v25  ;;  %3770 = vmatpush.bf16.msra.mxu3 %v5583_v6 }
 0x2a6   :  { %v6682_v15 = vadd.f32 1.0, %v3236_v29  ;;  %v3225_v47 = vmul.f32 %v3224_v40, %v6617_v16  ;;  %v3341_v9 = vmul.f32 %v3340_v38, %v6649_v23  ;;  %v3439_v18 = vunpack.c.l.bf16 %v6678_v41 }
 0x2a7   :  { %5628 = vrcp.f32 %v6674_v56  ;;  %v3440_v12 = vunpack.c.h.bf16 %v6678_v41  ;;  %v3443_v51 = vunpack.c.l.bf16 %v6680_v26  ;;  %v3353_v44 = vadd.f32 0.112945676, %v3352_v7 }
 0x2a8   :  { %5630 = vrcp.f32 %v6682_v15  ;;  %v3444_v8 = vunpack.c.h.bf16 %v6680_v26  ;;  %v6697_v48 = vadd.f32 1.1283791, %v3185_v21  ;;  %v3391_v11 = vadd.f32 0.014752088, %v3390_v1  ;;  %3757 = vmatpush.bf16.msra.mxu2 %v5574_v61  ;;  %v5573_v21 = vld [vmem:[#allocation11 + $0xa0] sm:$0xff]  ;;  %v5571_v61 = vld [vmem:[#allocation11 + $0x90] sm:$0xff] }
 0x2a9   :  { %v3447_v36 = vunpack.c.l.bf16 %v6688_v52  ;;  %v3354_v16 = vmul.f32 %v3353_v44, %v6649_v23  ;;  %v3381_v10 = vmul.f32 %v3380_v50, %v6651_v32  ;;  %v3431_v2 = vadd.f32 1.0, %v3423_v59  ;;  %3771 = vmatpush.bf16.msra.mxu3 %v5582_v4  ;;  %v5581_v1 = vld [vmem:[#allocation11 + $0xe0] sm:$0xff]  ;;  %v5579_v4 = vld [vmem:[#allocation11 + $0xd0] sm:$0xff] }
 0x2aa   :  { %v3432_v57 = vadd.f32 1.0, %v3424_v45  ;;  %v3207_v27 = vand.u32 2147483647, %v6674_v56  ;;  %v6705_v39 = vadd.f32 1.1283791, %v3225_v47  ;;  %v3392_v28 = vmul.f32 %v3391_v11, %v6651_v32 }
 0x2ab   :  { %v3342_v63 = vadd.f32 0.05243302, %v3341_v9  ;;  %vm3203_vm0 = vweird.f32 %v6674_v56  ;;  %v3209_v5 = vand.u32 2147483648, %v6674_v56  ;;  %v3355_v14 = vadd.f32 0.4994258, %v3354_v16 }
 0x2ac   :  { %vm3243_vm1 = vweird.f32 %v6682_v15  ;;  %v3249_v35 = vand.u32 2147483648, %v6682_v15  ;;  %v3393_v33 = vadd.f32 0.112945676, %v3392_v28  ;;  %v3382_v37 = vadd.f32 0.05243302, %v3381_v10  ;;  %3758 = vmatpush.bf16.msra.mxu2 %v5573_v21 }
 0x2ad   :  { %v6702_v22 = vpop.eup %5628  ;;  %v3356_v34 = vmul.f32 %v3355_v14, %v6649_v23  ;;  %v3437_v25 = vpack.c.bf16 %v3432_v57, %v3431_v2  ;;  %v3343_v54 = vmul.f32 %v3342_v63, %v6649_v23  ;;  %v3448_v40 = vunpack.c.h.bf16 %v6688_v52  ;;  %3772 = vmatpush.bf16.msra.mxu3 %v5581_v1 }
 0x2ae   :  { %v5631_v20 = vpop.eup %5630  ;;  %v3199_v55 = vmul.f32 %v6702_v22, %v6674_v56  ;;  %v3394_v17 = vmul.f32 %v3393_v33, %v6651_v32  ;;  %vm3204_vm2 = vweird.f32 %v6702_v22  ;;  %v3247_v24 = vand.u32 2147483647, %v6682_v15 }
 0x2af   :  { %v3239_v0 = vmul.f32 %v5631_v20, %v6682_v15  ;;  %v6721_v41 = vadd.f32 1.0, %v3356_v34  ;;  %v3451_v7 = vunpack.c.l.bf16 %v3437_v25  ;;  %vm3244_vm3 = vweird.f32 %v5631_v20  ;;  %vm6731_vm4 = vmor %vm3203_vm0, %vm3204_vm2  ;;  %v5580_v15 = vld [vmem:[#allocation11 + $0xd8] sm:$0xff]  ;;  %v5570_v34 = vld [vmem:[#allocation11 + $0x88] sm:$0xff] }
 0x2b0   :  { %v3200_v62 = vsub.f32 1.0, %v3199_v55  ;;  %v3395_v59 = vadd.f32 0.4994258, %v3394_v17  ;;  %v3452_v45 = vunpack.c.h.bf16 %v3437_v25  ;;  %v3383_v52 = vmul.f32 %v3382_v37, %v6651_v32  ;;  %vm6741_vm5 = vmor %vm3243_vm1, %vm3244_vm3  ;;  %v5578_v37 = vld [vmem:[#allocation11 + $0xc8] sm:$0xff] }
 0x2b1   :  { %v3240_v29 = vsub.f32 1.0, %v3239_v0  ;;  %5632 = vrcp.f32 %v6721_v41  ;;  %v3455_v11 = vmul.f32 %v3447_v36, %v3439_v18  ;;  %v3456_v16 = vmul.f32 %v3448_v40, %v3440_v12  ;;  %3773 = vmatpush.bf16.msra.mxu3 %v5580_v15 }
 0x2b2   :  { %v3201_v38 = vmul.f32 %v6702_v22, %v3200_v62  ;;  %v3396_v44 = vmul.f32 %v3395_v59, %v6651_v32  ;;  %v3344_v56 = vadd.f32 0.18741608, %v3343_v54  ;;  %v3459_v57 = vmul.f32 %v3451_v7, %v3443_v51  ;;  %v5569_v59 = vld [vmem:[#allocation11 + $0x80] sm:$0xff] }
 0x2b3   :  { %v3241_v50 = vmul.f32 %v5631_v20, %v3240_v29  ;;  %v3460_v3 = vmul.f32 %v3452_v45, %v3444_v8  ;;  %v3210_v6 = vor.u32 1.1754944e-38, %v3209_v5  ;;  %v3250_v12 = vor.u32 1.1754944e-38, %v3249_v35  ;;  %v5577_v45 = vld [vmem:[#allocation11 + $0xc0] sm:$0xff] }
 0x2b4   :  { %v3202_v42 = vadd.f32 %v6702_v22, %v3201_v38  ;;  %v6749_v36 = vadd.f32 1.0, %v3396_v44  ;;  %vm3208_vm6 = vcmp.eq.f32.partialorder %v3207_v27, 8.507059e+37  ;;  %vm3248_vm7 = vcmp.eq.f32.partialorder %v3247_v24, 8.507059e+37 }
 0x2b5   :  { %v3242_v9 = vadd.f32 %v5631_v20, %v3241_v50  ;;  %v3463_v63 = vpack.c.bf16 %v3459_v57, %v3455_v11  ;;  %v3464_v28 = vpack.c.bf16 %v3460_v3, %v3456_v16  ;;  %v3187_v51 = vmul.f32 %v6697_v48, %v6592_v43  ;;  %3774 = vmatpush.bf16.msra.mxu3 %v5579_v4 }
 0x2b6   :  { %v3206_v10 = vsel %vm6731_vm4, %v6702_v22, %v3202_v42  ;;  %v5572_v22 = vld [vmem:[#allocation11 + $0x98] sm:$0xff]  ;;  %5634 = vrcp.f32 %v6749_v36  ;;  %v3227_v8 = vmul.f32 %v6705_v39, %v6594_v53  ;;  %v3384_v5 = vadd.f32 0.18741608, %v3383_v52 }
 0x2b7   :  { %v3246_v18 = vsel %vm6741_vm5, %v5631_v20, %v3242_v9  ;;  %v3211_v55 = vsel %vm3208_vm6, %v3210_v6, %v3206_v10  ;;  %v5633_v26 = vpop.eup %5632  ;;  %v3345_v20 = vmul.f32 %v3344_v56, %v6649_v23  ;;  %3735 = vmatmul.bf16.vlgmr.msra.gmra.mxu0 %v3463_v63  ;;  %3749 = vmatmul.bf16.vlgmr.msra.gmra.mxu1 %v3464_v28  ;;  %v3369_v43 = vand.u32 2147483648, %v6721_v41 }
 0x2b8   :  { %v3251_v14 = vsel %vm3248_vm7, %v3250_v12, %v3246_v18  ;;  %v3359_v27 = vmul.f32 %v5633_v26, %v6721_v41  ;;  %3759 = vmatpush.bf16.msra.mxu2 %v5572_v22  ;;  %v3212_v0 = vmul.f32 %v3211_v55, %v3187_v51  ;;  %v3385_v48 = vmul.f32 %v3384_v5, %v6651_v32 }
 0x2b9   :  { %v3252_v35 = vmul.f32 %v3251_v14, %v3227_v8  ;;  %v3346_v62 = vadd.f32 1.1283791, %v3345_v20  ;;  %vm3364_vm8 = vweird.f32 %v5633_v26  ;;  %v3367_v23 = vand.u32 2147483647, %v6721_v41  ;;  %3775 = vmatpush.bf16.msra.mxu3 %v5578_v37 }
 0x2ba   :  { %v3360_v33 = vsub.f32 1.0, %v3359_v27  ;;  %v5099_v25 = vclamps-f32 %v3212_v0, 1.0  ;;  %vm3363_vm9 = vweird.f32 %v6721_v41  ;;  %v3370_v32 = vor.u32 1.1754944e-38, %v3369_v43 }
 0x2bb   :  { %v5100_v29 = vclamps-f32 %v3252_v35, 1.0  ;;  %v3347_v40 = vmul.f32 %v3346_v62, %v6636_v13  ;;  %vm3365_vm10 = vmor %vm3363_vm9, %vm3364_vm8  ;;  %v3386_v38 = vadd.f32 1.1283791, %v3385_v48  ;;  %vm3368_vm11 = vcmp.eq.f32.partialorder %v3367_v23, 8.507059e+37  ;;  %v5603_v48 = vld [vmem:[%s6791_s6] ss:$0 sm:$0xff] }
 0x2bc   :  { %v5635_v53 = vpop.eup %5634  ;;  %v3361_v39 = vmul.f32 %v5633_v26, %v3360_v33  ;;  %3760 = vmatpush.bf16.msra.mxu2 %v5571_v61  ;;  %v3407_v1 = vand.u32 2147483647, %v6749_v36  ;;  %v3409_v50 = vand.u32 2147483648, %v6749_v36  ;;  %vm3403_vm13 = vweird.f32 %v6749_v36 }
 0x2bd   :  { %v3399_v54 = vmul.f32 %v5635_v53, %v6749_v36  ;;  %v3416_v42 = vpack.c.bf16 %v5100_v29, %v5099_v25  ;;  %vm3404_vm12 = vweird.f32 %v5635_v53  ;;  %v3387_v47 = vmul.f32 %v3386_v38, %v6638_v30  ;;  %3776 = vmatpush.bf16.msra.mxu3 %v5577_v45 }
 0x2be   :  { %v3362_v17 = vadd.f32 %v5633_v26, %v3361_v39  ;;  %vm3405_vm14 = vmor %vm3403_vm13, %vm3404_vm12  ;;  %v3410_v9 = vor.u32 1.1754944e-38, %v3409_v50  ;;  %vm3408_vm15 = vcmp.eq.f32.partialorder %v3407_v1, 8.507059e+37  ;;  %v3065_v18 = vmul.f32 0.5, %v3057_v49 }
 0x2bf   :  { %v3400_v7 = vsub.f32 1.0, %v3399_v54  ;;  %v3421_v11 = vunpack.c.l.bf16 %v3416_v42  ;;  %v3422_v16 = vunpack.c.h.bf16 %v3416_v42  ;;  %v3066_v30 = vmul.f32 0.5, %v3058_v60 }
 0x2c0   :  { %v3366_v21 = vsel %vm3365_vm10, %v5633_v26, %v3362_v17  ;;  %3761 = vmatpush.bf16.msra.mxu2 %v5570_v34  ;;  %v3069_v12 = vmul.f32 0.5, %v3061_v31  ;;  %v3070_v36 = vmul.f32 0.5, %v3062_v19 }
 0x2c1   :  { %v3371_v24 = vsel %vm3368_vm11, %v3370_v32, %v3366_v21  ;;  %v3401_v52 = vmul.f32 %v5635_v53, %v3400_v7  ;;  %v3429_v3 = vadd.f32 1.0, %v3421_v11  ;;  %v3430_v6 = vadd.f32 1.0, %v3422_v16 }
 0x2c2   :  { %v3372_v41 = vmul.f32 %v3371_v24, %v3347_v40  ;;  %v3072_v55 = vpack.c.bf16 %v3066_v30, %v3065_v18  ;;  %v3074_v14 = vpack.c.bf16 %v3070_v36, %v3069_v12 }
 0x2c3   :  { %v3402_v13 = vadd.f32 %v5635_v53, %v3401_v52  ;;  %v3436_v28 = vpack.c.bf16 %v3430_v6, %v3429_v3 }
 0x2c4   :  { %3762 = vmatpush.bf16.msra.mxu2 %v5569_v59  ;;  %v5103_v2 = vclamps-f32 %v3372_v41, 1.0  ;;  %v3441_v5 = vunpack.c.l.bf16 %v3072_v55  ;;  %v3442_v46 = vunpack.c.h.bf16 %v3072_v55  ;;  %v3445_v60 = vunpack.c.l.bf16 %v3074_v14 }
 0x2c5   :  { %v3406_v44 = vsel %vm3405_vm14, %v5635_v53, %v3402_v13  ;;  %v3449_v20 = vunpack.c.l.bf16 %v3436_v28  ;;  %v3450_v49 = vunpack.c.h.bf16 %v3436_v28  ;;  %v3446_v27 = vunpack.c.h.bf16 %v3074_v14 }
 0x2c6   :  { %v3411_v10 = vsel %vm3408_vm15, %v3410_v9, %v3406_v44 }
 0x2c7   :  { %v3412_v56 = vmul.f32 %v3411_v10, %v3387_v47  ;;  %v3457_v4 = vmul.f32 %v3449_v20, %v3441_v5  ;;  %v3458_v19 = vmul.f32 %v3450_v49, %v3442_v46 }
 0x2c9   :  { %v5104_v57 = vclamps-f32 %v3412_v56, 1.0 }
 0x2cb   :  { %v3418_v22 = vpack.c.bf16 %v5104_v57, %v5103_v2 }
 0x2cd   :  { %v3425_v15 = vunpack.c.l.bf16 %v3418_v22  ;;  %v3426_v63 = vunpack.c.h.bf16 %v3418_v22 }
 0x2cf   :  { %v3433_v26 = vadd.f32 1.0, %v3425_v15  ;;  %v3434_v51 = vadd.f32 1.0, %v3426_v63 }
 0x2d1   :  { %v3438_v8 = vpack.c.bf16 %v3434_v51, %v3433_v26 }
 0x2d3   :  { %v3453_v61 = vunpack.c.l.bf16 %v3438_v8  ;;  %v3454_v31 = vunpack.c.h.bf16 %v3438_v8 }
 0x2d5   :  { %v3461_v58 = vmul.f32 %v3453_v61, %v3445_v60  ;;  %v3462_v0 = vmul.f32 %v3454_v31, %v3446_v27 }
 0x2d7   :  { %v3465_v35 = vpack.c.bf16 %v3461_v58, %v3457_v4  ;;  %v3466_v33 = vpack.c.bf16 %v3462_v0, %v3458_v19 }
 0x2d9   :  { %3763 = vmatmul.bf16.vlgmr.msra.gmra.mxu2 %v3465_v35  ;;  %3777 = vmatmul.bf16.vlgmr.msra.gmra.mxu3 %v3466_v33 }
 0x334   :  { %v3736_v62 = vpop.f32.mrf.mxu0  ;;  %v3750_v43 = vpop.f32.mrf.mxu1 }
 0x335   :  { %v3737_v34 = vadd.f32 %v5603_v48, %v3736_v62 }
 0x337   :  { %v3751_v25 = vadd.f32 %v3750_v43, %v3737_v34 }
 0x33c   :  { %v3738_v53 = vpop.f32.mrf.mxu0  ;;  %v3752_v29 = vpop.f32.mrf.mxu1 }
 0x33d   :  { %v3739_v37 = vadd.f32 %v5603_v48, %v3738_v53 }
 0x33f   :  { %v3753_v54 = vadd.f32 %v3752_v29, %v3739_v37 }
 0x35c   :  { %v3764_v39 = vpop.f32.mrf.mxu2  ;;  %v3778_v23 = vpop.f32.mrf.mxu3 }
 0x35d   :  { %v3765_v17 = vadd.f32 %v3764_v39, %v3751_v25 }
 0x35f   :  { %v3779_v7 = vadd.f32 %v3778_v23, %v3765_v17 }
 0x364   :  { %v3766_v40 = vpop.f32.mrf.mxu2  ;;  %v3780_v38 = vpop.f32.mrf.mxu3 }
 0x365   :  { %v3767_v32 = vadd.f32 %v3766_v40, %v3753_v54 }
 0x367   :  { %v3781_v21 = vadd.f32 %v3780_v38, %v3767_v32 }
 0x369   :  { %v5588_v1 = vpack.c.bf16 %v3781_v21, %v3779_v7 }
 0x36b   :  { %5589 = vst [vmem:[#allocation13] sm:$0xff] %v5588_v1  }
 0x36c   :  { %3799 = dma.vmem_to_hbm [thread:$0]  %s3792_s11, 128, %s3794_s14, [#allocation4], %s5824_s8, %s5824_s8, %s5825_s9  }
 0x36d   :  { %5812 = dma.done.wait [#allocation4], 128  }
 0x36e   :  { %5813 = vsyncadd [#allocation4], 4294967168 }
 0x36f   :  { %3804 = vsyncpa [#allocation3], 1 }
 0x370   :  { %3805 = vsyncpa [#allocation6], 1 }
 0x371   :  { %3806 = vsyncpa [#allocation9], 1 }
 0x372   :  { %3807 = vsyncpa [#allocation12], 1 }
 0x373   :  { %3808 = vsyncpa [#allocation4], 1 }

</bundles_post_ra>
